<compile_context>
chip_gen: v5e
topology: v5e:2x2
jax: 0.10.0
libtpu: 0.0.40
codegen_flags: <defaults>
</compile_context>

<pallas_src>
import math

import jax
import jax.numpy as jnp
from jax.experimental import pallas as pl
from jax.experimental.pallas import tpu as pltpu


def _round_up(v, m):
    return (v + m - 1) // m * m


def _level_params(h, w, num_layers):
    params = []
    for i in range(num_layers):
        level = i + 1
        kh = math.ceil(h / level)
        kw = math.ceil(w / level)
        sh, sw = kh, kw
        ph = math.floor((kh * level - h + 1) / 2)
        pw = math.floor((kw * level - w + 1) / 2)
        oh = (h + 2 * ph - kh) // sh + 1
        ow = (w + 2 * pw - kw) // sw + 1
        params.append((kh, kw, sh, sw, ph, pw, oh, ow))
    return params


def _make_fused_spp_kernel(h, w, params, pool_type):
    def kernel(x_ref, *o_refs):
        for o_ref, (kh, kw, sh, sw, ph, pw, oh, ow) in zip(o_refs, params):
            inv_area = 1.0 / float(kh * kw)

            if oh == 1 and ow == 1:
                # Global pool: single full-block reduction over leading axes.
                if pool_type == "max_pool":
                    v = x_ref[...].max(axis=0).max(axis=0)            # (bb, C)
                else:
                    v = x_ref[...].astype(jnp.float32)
                    v = v.sum(axis=0).sum(axis=0) * inv_area
                o_ref[...] = v[:, None, :].astype(o_ref.dtype)
                continue

            vals = []
            for oy in range(oh):
                y0 = oy * sh - ph
                y1 = min(y0 + kh, h)
                y0c = max(y0, 0)
                for ox in range(ow):
                    x0 = ox * sw - pw
                    x1 = min(x0 + kw, w)
                    x0c = max(x0, 0)
                    assert y1 > y0c and x1 > x0c  # static sanity check
                    # (wh, ww, bb, C) window; reducing the two leading axes is
                    # an elementwise VPU tree over (bb, C) slabs.
                    win = x_ref[y0c:y1, x0c:x1, :, :]
                    if pool_type == "max_pool":
                        v = win.max(axis=0).max(axis=0)
                    else:
                        v = win.astype(jnp.float32).sum(axis=0).sum(axis=0) * inv_area
                    vals.append(v)                                    # (bb, C)
            lvl = jnp.stack(vals, axis=1)                             # (bb, L, C)
            o_ref[...] = lvl.astype(o_ref.dtype)

    return kernel


def spp_layer(x, num_layers, pool_type="max_pool"):
    b, c, h, w = x.shape
    params = _level_params(h, w, num_layers)
    level_ls = [oh * ow for (_, _, _, _, _, _, oh, ow) in params]

    # Batch block: sublane-aligned multiple of 8 when possible, else full B.
    bb = 8 if b % 8 == 0 else b
    n_blocks = b // bb

    # Channel-last layout: (H, W, B, C) puts C on lanes / B on sublanes.
    x_t = jnp.transpose(x, (2, 3, 0, 1))

    out_shape = tuple(jax.ShapeDtypeStruct((b, L, c), x.dtype) for L in level_ls)
    out_specs = [pl.BlockSpec((bb, L, c), lambda i: (i, 0, 0)) for L in level_ls]
    in_specs = [pl.BlockSpec((h, w, bb, c), lambda i: (0, 0, i, 0))]

    # Explicit VMEM budget: double-buffered padded input tile + outputs + margin.
    itemsize = jnp.dtype(x.dtype).itemsize
    in_tile = h * w * _round_up(bb, 8) * _round_up(c, 128) * itemsize
    out_tiles = sum(
        bb * _round_up(L, 8) * _round_up(c, 128) * itemsize for L in level_ls
    )
    est = 2 * in_tile + 2 * out_tiles
    vmem_limit = int(min(max(2 * est + (8 << 20), 16 << 20), 64 << 20))

    kernel = _make_fused_spp_kernel(h, w, params, pool_type)
    outs = pl.pallas_call(
        kernel,
        out_shape=out_shape,
        grid=(n_blocks,),
        in_specs=in_specs,
        out_specs=out_specs,
        compiler_params=pltpu.CompilerParams(
            dimension_semantics=("parallel",),
            vmem_limit_bytes=vmem_limit,
        ),
    )(x_t)

    # Tiny pooled features: reorder to PyTorch's per-level (c*L + window)
    # flatten and concatenate the levels (cheap XLA glue, O(B*C*sum L) elems).
    feats = [
        jnp.transpose(o, (0, 2, 1)).reshape(b, c * L)
        for o, L in zip(outs, level_ls)
    ]
    return jnp.concatenate(feats, axis=1)


def _reference_spp(x, num_layers, pool_type="max_pool"):
    """Independent pure-JAX reference using lax.reduce_window."""
    b, c, h, w = x.shape
    feats = []
    for (kh, kw, sh, sw, ph, pw, _, _) in _level_params(h, w, num_layers):
        pad = ((0, 0), (0, 0), (ph, ph), (pw, pw))
        if pool_type == "max_pool":
            pooled = jax.lax.reduce_window(
                x, -jnp.inf, jax.lax.max, (1, 1, kh, kw), (1, 1, sh, sw), pad
            )
        else:
            pooled = (
                jax.lax.reduce_window(
                    x, 0.0, jax.lax.add, (1, 1, kh, kw), (1, 1, sh, sw), pad
                )
                / float(kh * kw)
            )
        feats.append(pooled.reshape(b, -1))
    return jnp.concatenate(feats, axis=1)


if __name__ == "__main__":
    B, C, H, W = 2, 4, 16, 16
    NUM_LAYERS = 3

    key = jax.random.PRNGKey(0)
    x = jax.random.normal(key, (B, C, H, W), dtype=jnp.float32)

    spp = jax.jit(spp_layer, static_argnums=(1, 2))
    expected_feats = C * sum((i + 1) ** 2 for i in range(NUM_LAYERS))

    out_max = jax.block_until_ready(spp(x, NUM_LAYERS, "max_pool"))
    ref_max = _reference_spp(x, NUM_LAYERS, "max_pool")
    assert out_max.shape == (B, expected_feats), out_max.shape
    assert jnp.allclose(out_max, ref_max, atol=1e-5, rtol=1e-5), "max_pool mismatch"

    out_avg = jax.block_until_ready(spp(x, NUM_LAYERS, "avg_pool"))
    ref_avg = _reference_spp(x, NUM_LAYERS, "avg_pool")
    assert out_avg.shape == (B, expected_feats), out_avg.shape
    assert jnp.allclose(out_avg, ref_avg, atol=1e-5, rtol=1e-5), "avg_pool mismatch"

    print("KERNEL_OK")
</pallas_src>

<mosaic_0001>
module attributes {stable_mosaic.version = 11 : i64} {
  func.func @kernel(%arg0: i32, %arg1: memref<16x16x2x4xf32, #tpu.memory_space<vmem>>, %arg2: memref<2x1x4xf32, #tpu.memory_space<vmem>>, %arg3: memref<2x4x4xf32, #tpu.memory_space<vmem>>, %arg4: memref<2x9x4xf32, #tpu.memory_space<vmem>>) attributes {dimension_semantics = [#tpu.dimension_semantics<parallel>], iteration_bounds = array<i64: 1>, scalar_prefetch = 0 : i64, scratch_operands = 0 : i64, tpu.core_type = #tpu.core_type<tc>, window_params = [{transform_indices = @transform_0, window_bounds = array<i64: 16, 16, 2, 4>}, {transform_indices = @transform_1, window_bounds = array<i64: 2, 1, 4>}, {transform_indices = @transform_2, window_bounds = array<i64: 2, 4, 4>}, {transform_indices = @transform_3, window_bounds = array<i64: 2, 9, 4>}]} {
    %c0 = arith.constant 0 : index
    %c0_0 = arith.constant 0 : index
    %c0_1 = arith.constant 0 : index
    %c0_2 = arith.constant 0 : index
    %0 = vector.load %arg1[%c0, %c0_0, %c0_1, %c0_2] : memref<16x16x2x4xf32, #tpu.memory_space<vmem>>, vector<16x16x2x4xf32>
    %cst = arith.constant dense<0xFF800000> : vector<16x2x4xf32>
    %1 = vector.multi_reduction <maximumf>, %0, %cst [0] : vector<16x16x2x4xf32> to vector<16x2x4xf32>
    %cst_3 = arith.constant dense<0xFF800000> : vector<2x4xf32>
    %2 = vector.multi_reduction <maximumf>, %1, %cst_3 [0] : vector<16x2x4xf32> to vector<2x4xf32>
    %3 = vector.shape_cast %2 : vector<2x4xf32> to vector<2x1x4xf32>
    %c0_4 = arith.constant 0 : index
    %c0_5 = arith.constant 0 : index
    %c0_6 = arith.constant 0 : index
    %4 = vector.load %arg2[%c0_4, %c0_5, %c0_6] : memref<2x1x4xf32, #tpu.memory_space<vmem>>, vector<2x1x4xf32>
    tpu.vector_store %arg2[%c0_4, %c0_5, %c0_6], %3 {strides = array<i32>} : memref<2x1x4xf32, #tpu.memory_space<vmem>>, vector<2x1x4xf32>,
    %c0_7 = arith.constant 0 : index
    %c0_8 = arith.constant 0 : index
    %c0_9 = arith.constant 0 : index
    %c0_10 = arith.constant 0 : index
    %5 = vector.load %arg1[%c0_7, %c0_8, %c0_9, %c0_10] : memref<16x16x2x4xf32, #tpu.memory_space<vmem>>, vector<8x8x2x4xf32>
    %cst_11 = arith.constant dense<0xFF800000> : vector<8x2x4xf32>
    %6 = vector.multi_reduction <maximumf>, %5, %cst_11 [0] : vector<8x8x2x4xf32> to vector<8x2x4xf32>
    %cst_12 = arith.constant dense<0xFF800000> : vector<2x4xf32>
    %7 = vector.multi_reduction <maximumf>, %6, %cst_12 [0] : vector<8x2x4xf32> to vector<2x4xf32>
    %c0_13 = arith.constant 0 : index
    %c8 = arith.constant 8 : index
    %c0_14 = arith.constant 0 : index
    %c0_15 = arith.constant 0 : index
    %8 = vector.load %arg1[%c0_13, %c8, %c0_14, %c0_15] : memref<16x16x2x4xf32, #tpu.memory_space<vmem>>, vector<8x8x2x4xf32>
    %cst_16 = arith.constant dense<0xFF800000> : vector<8x2x4xf32>
    %9 = vector.multi_reduction <maximumf>, %8, %cst_16 [0] : vector<8x8x2x4xf32> to vector<8x2x4xf32>
    %cst_17 = arith.constant dense<0xFF800000> : vector<2x4xf32>
    %10 = vector.multi_reduction <maximumf>, %9, %cst_17 [0] : vector<8x2x4xf32> to vector<2x4xf32>
    %c8_18 = arith.constant 8 : index
    %c0_19 = arith.constant 0 : index
    %c0_20 = arith.constant 0 : index
    %c0_21 = arith.constant 0 : index
    %11 = vector.load %arg1[%c8_18, %c0_19, %c0_20, %c0_21] : memref<16x16x2x4xf32, #tpu.memory_space<vmem>>, vector<8x8x2x4xf32>
    %cst_22 = arith.constant dense<0xFF800000> : vector<8x2x4xf32>
    %12 = vector.multi_reduction <maximumf>, %11, %cst_22 [0] : vector<8x8x2x4xf32> to vector<8x2x4xf32>
    %cst_23 = arith.constant dense<0xFF800000> : vector<2x4xf32>
    %13 = vector.multi_reduction <maximumf>, %12, %cst_23 [0] : vector<8x2x4xf32> to vector<2x4xf32>
    %c8_24 = arith.constant 8 : index
    %c8_25 = arith.constant 8 : index
    %c0_26 = arith.constant 0 : index
    %c0_27 = arith.constant 0 : index
    %14 = vector.load %arg1[%c8_24, %c8_25, %c0_26, %c0_27] : memref<16x16x2x4xf32, #tpu.memory_space<vmem>>, vector<8x8x2x4xf32>
    %cst_28 = arith.constant dense<0xFF800000> : vector<8x2x4xf32>
    %15 = vector.multi_reduction <maximumf>, %14, %cst_28 [0] : vector<8x8x2x4xf32> to vector<8x2x4xf32>
    %cst_29 = arith.constant dense<0xFF800000> : vector<2x4xf32>
    %16 = vector.multi_reduction <maximumf>, %15, %cst_29 [0] : vector<8x2x4xf32> to vector<2x4xf32>
    %17 = vector.shape_cast %7 : vector<2x4xf32> to vector<2x1x4xf32>
    %18 = vector.shape_cast %10 : vector<2x4xf32> to vector<2x1x4xf32>
    %19 = vector.shape_cast %13 : vector<2x4xf32> to vector<2x1x4xf32>
    %20 = vector.shape_cast %16 : vector<2x4xf32> to vector<2x1x4xf32>
    %21 = tpu.concatenate %17, %18, %19, %20 in 1 : vector<2x1x4xf32>, vector<2x1x4xf32>, vector<2x1x4xf32>, vector<2x1x4xf32> -> vector<2x4x4xf32>
    %c0_30 = arith.constant 0 : index
    %c0_31 = arith.constant 0 : index
    %c0_32 = arith.constant 0 : index
    %22 = vector.load %arg3[%c0_30, %c0_31, %c0_32] : memref<2x4x4xf32, #tpu.memory_space<vmem>>, vector<2x4x4xf32>
    tpu.vector_store %arg3[%c0_30, %c0_31, %c0_32], %21 {strides = array<i32>} : memref<2x4x4xf32, #tpu.memory_space<vmem>>, vector<2x4x4xf32>,
    %c0_33 = arith.constant 0 : index
    %c0_34 = arith.constant 0 : index
    %c0_35 = arith.constant 0 : index
    %c0_36 = arith.constant 0 : index
    %23 = vector.load %arg1[%c0_33, %c0_34, %c0_35, %c0_36] : memref<16x16x2x4xf32, #tpu.memory_space<vmem>>, vector<5x5x2x4xf32>
    %cst_37 = arith.constant dense<0xFF800000> : vector<5x2x4xf32>
    %24 = vector.multi_reduction <maximumf>, %23, %cst_37 [0] : vector<5x5x2x4xf32> to vector<5x2x4xf32>
    %cst_38 = arith.constant dense<0xFF800000> : vector<2x4xf32>
    %25 = vector.multi_reduction <maximumf>, %24, %cst_38 [0] : vector<5x2x4xf32> to vector<2x4xf32>
    %c0_39 = arith.constant 0 : index
    %c5 = arith.constant 5 : index
    %c0_40 = arith.constant 0 : index
    %c0_41 = arith.constant 0 : index
    %26 = vector.load %arg1[%c0_39, %c5, %c0_40, %c0_41] : memref<16x16x2x4xf32, #tpu.memory_space<vmem>>, vector<5x6x2x4xf32>
    %cst_42 = arith.constant dense<0xFF800000> : vector<6x2x4xf32>
    %27 = vector.multi_reduction <maximumf>, %26, %cst_42 [0] : vector<5x6x2x4xf32> to vector<6x2x4xf32>
    %cst_43 = arith.constant dense<0xFF800000> : vector<2x4xf32>
    %28 = vector.multi_reduction <maximumf>, %27, %cst_43 [0] : vector<6x2x4xf32> to vector<2x4xf32>
    %c0_44 = arith.constant 0 : index
    %c11 = arith.constant 11 : index
    %c0_45 = arith.constant 0 : index
    %c0_46 = arith.constant 0 : index
    %29 = vector.load %arg1[%c0_44, %c11, %c0_45, %c0_46] : memref<16x16x2x4xf32, #tpu.memory_space<vmem>>, vector<5x5x2x4xf32>
    %cst_47 = arith.constant dense<0xFF800000> : vector<5x2x4xf32>
    %30 = vector.multi_reduction <maximumf>, %29, %cst_47 [0] : vector<5x5x2x4xf32> to vector<5x2x4xf32>
    %cst_48 = arith.constant dense<0xFF800000> : vector<2x4xf32>
    %31 = vector.multi_reduction <maximumf>, %30, %cst_48 [0] : vector<5x2x4xf32> to vector<2x4xf32>
    %c5_49 = arith.constant 5 : index
    %c0_50 = arith.constant 0 : index
    %c0_51 = arith.constant 0 : index
    %c0_52 = arith.constant 0 : index
    %32 = vector.load %arg1[%c5_49, %c0_50, %c0_51, %c0_52] : memref<16x16x2x4xf32, #tpu.memory_space<vmem>>, vector<6x5x2x4xf32>
    %cst_53 = arith.constant dense<0xFF800000> : vector<5x2x4xf32>
    %33 = vector.multi_reduction <maximumf>, %32, %cst_53 [0] : vector<6x5x2x4xf32> to vector<5x2x4xf32>
    %cst_54 = arith.constant dense<0xFF800000> : vector<2x4xf32>
    %34 = vector.multi_reduction <maximumf>, %33, %cst_54 [0] : vector<5x2x4xf32> to vector<2x4xf32>
    %c5_55 = arith.constant 5 : index
    %c5_56 = arith.constant 5 : index
    %c0_57 = arith.constant 0 : index
    %c0_58 = arith.constant 0 : index
    %35 = vector.load %arg1[%c5_55, %c5_56, %c0_57, %c0_58] : memref<16x16x2x4xf32, #tpu.memory_space<vmem>>, vector<6x6x2x4xf32>
    %cst_59 = arith.constant dense<0xFF800000> : vector<6x2x4xf32>
    %36 = vector.multi_reduction <maximumf>, %35, %cst_59 [0] : vector<6x6x2x4xf32> to vector<6x2x4xf32>
    %cst_60 = arith.constant dense<0xFF800000> : vector<2x4xf32>
    %37 = vector.multi_reduction <maximumf>, %36, %cst_60 [0] : vector<6x2x4xf32> to vector<2x4xf32>
    %c5_61 = arith.constant 5 : index
    %c11_62 = arith.constant 11 : index
    %c0_63 = arith.constant 0 : index
    %c0_64 = arith.constant 0 : index
    %38 = vector.load %arg1[%c5_61, %c11_62, %c0_63, %c0_64] : memref<16x16x2x4xf32, #tpu.memory_space<vmem>>, vector<6x5x2x4xf32>
    %cst_65 = arith.constant dense<0xFF800000> : vector<5x2x4xf32>
    %39 = vector.multi_reduction <maximumf>, %38, %cst_65 [0] : vector<6x5x2x4xf32> to vector<5x2x4xf32>
    %cst_66 = arith.constant dense<0xFF800000> : vector<2x4xf32>
    %40 = vector.multi_reduction <maximumf>, %39, %cst_66 [0] : vector<5x2x4xf32> to vector<2x4xf32>
    %c11_67 = arith.constant 11 : index
    %c0_68 = arith.constant 0 : index
    %c0_69 = arith.constant 0 : index
    %c0_70 = arith.constant 0 : index
    %41 = vector.load %arg1[%c11_67, %c0_68, %c0_69, %c0_70] : memref<16x16x2x4xf32, #tpu.memory_space<vmem>>, vector<5x5x2x4xf32>
    %cst_71 = arith.constant dense<0xFF800000> : vector<5x2x4xf32>
    %42 = vector.multi_reduction <maximumf>, %41, %cst_71 [0] : vector<5x5x2x4xf32> to vector<5x2x4xf32>
    %cst_72 = arith.constant dense<0xFF800000> : vector<2x4xf32>
    %43 = vector.multi_reduction <maximumf>, %42, %cst_72 [0] : vector<5x2x4xf32> to vector<2x4xf32>
    %c11_73 = arith.constant 11 : index
    %c5_74 = arith.constant 5 : index
    %c0_75 = arith.constant 0 : index
    %c0_76 = arith.constant 0 : index
    %44 = vector.load %arg1[%c11_73, %c5_74, %c0_75, %c0_76] : memref<16x16x2x4xf32, #tpu.memory_space<vmem>>, vector<5x6x2x4xf32>
    %cst_77 = arith.constant dense<0xFF800000> : vector<6x2x4xf32>
    %45 = vector.multi_reduction <maximumf>, %44, %cst_77 [0] : vector<5x6x2x4xf32> to vector<6x2x4xf32>
    %cst_78 = arith.constant dense<0xFF800000> : vector<2x4xf32>
    %46 = vector.multi_reduction <maximumf>, %45, %cst_78 [0] : vector<6x2x4xf32> to vector<2x4xf32>
    %c11_79 = arith.constant 11 : index
    %c11_80 = arith.constant 11 : index
    %c0_81 = arith.constant 0 : index
    %c0_82 = arith.constant 0 : index
    %47 = vector.load %arg1[%c11_79, %c11_80, %c0_81, %c0_82] : memref<16x16x2x4xf32, #tpu.memory_space<vmem>>, vector<5x5x2x4xf32>
    %cst_83 = arith.constant dense<0xFF800000> : vector<5x2x4xf32>
    %48 = vector.multi_reduction <maximumf>, %47, %cst_83 [0] : vector<5x5x2x4xf32> to vector<5x2x4xf32>
    %cst_84 = arith.constant dense<0xFF800000> : vector<2x4xf32>
    %49 = vector.multi_reduction <maximumf>, %48, %cst_84 [0] : vector<5x2x4xf32> to vector<2x4xf32>
    %50 = vector.shape_cast %25 : vector<2x4xf32> to vector<2x1x4xf32>
    %51 = vector.shape_cast %28 : vector<2x4xf32> to vector<2x1x4xf32>
    %52 = vector.shape_cast %31 : vector<2x4xf32> to vector<2x1x4xf32>
    %53 = vector.shape_cast %34 : vector<2x4xf32> to vector<2x1x4xf32>
    %54 = vector.shape_cast %37 : vector<2x4xf32> to vector<2x1x4xf32>
    %55 = vector.shape_cast %40 : vector<2x4xf32> to vector<2x1x4xf32>
    %56 = vector.shape_cast %43 : vector<2x4xf32> to vector<2x1x4xf32>
    %57 = vector.shape_cast %46 : vector<2x4xf32> to vector<2x1x4xf32>
    %58 = vector.shape_cast %49 : vector<2x4xf32> to vector<2x1x4xf32>
    %59 = tpu.concatenate %50, %51, %52, %53, %54, %55, %56, %57, %58 in 1 : vector<2x1x4xf32>, vector<2x1x4xf32>, vector<2x1x4xf32>, vector<2x1x4xf32>, vector<2x1x4xf32>, vector<2x1x4xf32>, vector<2x1x4xf32>, vector<2x1x4xf32>, vector<2x1x4xf32> -> vector<2x9x4xf32>
    %c0_85 = arith.constant 0 : index
    %c0_86 = arith.constant 0 : index
    %c0_87 = arith.constant 0 : index
    %60 = vector.load %arg4[%c0_85, %c0_86, %c0_87] : memref<2x9x4xf32, #tpu.memory_space<vmem>>, vector<2x9x4xf32>
    tpu.vector_store %arg4[%c0_85, %c0_86, %c0_87], %59 {strides = array<i32>} : memref<2x9x4xf32, #tpu.memory_space<vmem>>, vector<2x9x4xf32>,
    return
  }
  func.func @transform_0(%arg0: i32) -> (i32, i32, i32, i32) {
    %c0_i32 = arith.constant 0 : i32
    %c0_i32_0 = arith.constant 0 : i32
    %c0_i32_1 = arith.constant 0 : i32
    %c0_i32_2 = arith.constant 0 : i32
    return %c0_i32, %c0_i32_0, %arg0, %c0_i32_1 : i32, i32, i32, i32
  }
  func.func @transform_1(%arg0: i32) -> (i32, i32, i32) {
    %c0_i32 = arith.constant 0 : i32
    %c0_i32_0 = arith.constant 0 : i32
    %c0_i32_1 = arith.constant 0 : i32
    return %arg0, %c0_i32, %c0_i32_0 : i32, i32, i32
  }
  func.func @transform_2(%arg0: i32) -> (i32, i32, i32) {
    %c0_i32 = arith.constant 0 : i32
    %c0_i32_0 = arith.constant 0 : i32
    %c0_i32_1 = arith.constant 0 : i32
    return %arg0, %c0_i32, %c0_i32_0 : i32, i32, i32
  }
  func.func @transform_3(%arg0: i32) -> (i32, i32, i32) {
    %c0_i32 = arith.constant 0 : i32
    %c0_i32_0 = arith.constant 0 : i32
    %c0_i32_1 = arith.constant 0 : i32
    return %arg0, %c0_i32, %c0_i32_0 : i32, i32, i32
  }
}

</mosaic_0001>

<bundles_post_ra>
// kernel: spp_layer.1
= control target key start
LH: loop header
LB: loop body
LE: loop exit
PB: predicated region body
PF: predicated region fallthrough
CT: control target
= control target key end

     0   :  { %vm267_vm0 = vcmask 25600   ;;  %vm798_vm1 = vcmask 24576   ;;  %vm1621_vm2 = vcmask 1040384   ;;  %vm1624_vm3 = vcmask 1041408   ;;  %s6671_s0 = inlined_call_operand.vmem [shape: f32[16,16,2,4], index: 0, kind: input, shape index: {}]   ;;  %s6672_s1 = inlined_call_operand.vmem [shape: f32[2,1,4], index: 1, kind: output, shape index: {0}]   ;;  %s6673_s2 = inlined_call_operand.vmem [shape: f32[2,4,4], index: 2, kind: output, shape index: {1}]   ;;  %s6674_s3 = inlined_call_operand.vmem [shape: f32[2,9,4], index: 3, kind: output, shape index: {2}]  }
   0x1   :  { %v11_v0 = vld [vmem:[%s6671_s0] sm:$0x3]  ;;  %v12_v7 = vld [vmem:[%s6671_s0 + $0x2] sm:$0x3]  ;;  %v13_v24 = vld [vmem:[%s6671_s0 + $0x4] sm:$0x3] }
   0x2   :  { %v27_v1 = vld [vmem:[%s6671_s0 + $0x20] sm:$0x3]  ;;  %v268_v4 = vsel %vm267_vm0, %v11_v0, -inf  ;;  %v28_v8 = vld [vmem:[%s6671_s0 + $0x22] sm:$0x3]  ;;  %v299_v17 = vsel %vm267_vm0, %v12_v7, -inf }
   0x3   :  { %v43_v2 = vld [vmem:[%s6671_s0 + $0x40] sm:$0x3]  ;;  %v269_v5 = vsel %vm267_vm0, %v27_v1, -inf  ;;  %v44_v11 = vld [vmem:[%s6671_s0 + $0x42] sm:$0x3]  ;;  %v300_v18 = vsel %vm267_vm0, %v28_v8, -inf }
   0x4   :  { %v59_v3 = vld [vmem:[%s6671_s0 + $0x60] sm:$0x3]  ;;  %v271_v6 = vsel %vm267_vm0, %v43_v2, -inf  ;;  %v270_v10 = vmax.f32 %v268_v4, %v269_v5  ;;  %v60_v13 = vld [vmem:[%s6671_s0 + $0x62] sm:$0x3]  ;;  %v301_v22 = vmax.f32 %v299_v17, %v300_v18  ;;  %v302_v23 = vsel %vm267_vm0, %v44_v11, -inf }
   0x5   :  { %v75_v9 = vld [vmem:[%s6671_s0 + $0x80] sm:$0x3]  ;;  %v273_v12 = vsel %vm267_vm0, %v59_v3, -inf  ;;  %v76_v19 = vld [vmem:[%s6671_s0 + $0x82] sm:$0x3]  ;;  %v304_v27 = vsel %vm267_vm0, %v60_v13, -inf }
   0x6   :  { %v91_v14 = vld [vmem:[%s6671_s0 + $0xa0] sm:$0x3]  ;;  %v272_v15 = vmax.f32 %v270_v10, %v271_v6  ;;  %v275_v16 = vsel %vm267_vm0, %v75_v9, -inf  ;;  %v29_v28 = vld [vmem:[%s6671_s0 + $0x24] sm:$0x3]  ;;  %v303_v32 = vmax.f32 %v301_v22, %v302_v23  ;;  %v306_v35 = vsel %vm267_vm0, %v76_v19, -inf }
   0x7   :  { %v107_v20 = vld [vmem:[%s6671_s0 + $0xc0] sm:$0x3]  ;;  %v277_v26 = vsel %vm267_vm0, %v91_v14, -inf  ;;  %v45_v29 = vld [vmem:[%s6671_s0 + $0x44] sm:$0x3]  ;;  %v330_v44 = vsel %vm267_vm0, %v13_v24, -inf }
   0x8   :  { %v274_v21 = vmax.f32 %v272_v15, %v273_v12  ;;  %v123_v25 = vld [vmem:[%s6671_s0 + $0xe0] sm:$0x3]  ;;  %v92_v30 = vld [vmem:[%s6671_s0 + $0xa2] sm:$0x3]  ;;  %v61_v33 = vld [vmem:[%s6671_s0 + $0x64] sm:$0x3]  ;;  %v305_v41 = vmax.f32 %v303_v32, %v304_v27 }
   0x9   :  { %v279_v34 = vsel %vm267_vm0, %v107_v20, -inf  ;;  %v77_v36 = vld [vmem:[%s6671_s0 + $0x84] sm:$0x3]  ;;  %v108_v37 = vld [vmem:[%s6671_s0 + $0xc2] sm:$0x3]  ;;  %v281_v40 = vsel %vm267_vm0, %v123_v25, -inf }
   0xa   :  { %v276_v31 = vmax.f32 %v274_v21, %v275_v16  ;;  %v139_v38 = vld [vmem:[%s6671_s0 + $0x100] sm:$0x3]  ;;  %v308_v43 = vsel %vm267_vm0, %v92_v30, -inf  ;;  %v331_v45 = vsel %vm267_vm0, %v29_v28, -inf  ;;  %v333_v46 = vsel %vm267_vm0, %v45_v29, -inf }
   0xb   :  { %v155_v42 = vld [vmem:[%s6671_s0 + $0x120] sm:$0x3]  ;;  %v14_v47 = vld [vmem:[%s6671_s0 + $0x6] sm:$0x3]  ;;  %v124_v50 = vld [vmem:[%s6671_s0 + $0xe2] sm:$0x3]  ;;  %v307_v54 = vmax.f32 %v305_v41, %v306_v35  ;;  %v332_v55 = vmax.f32 %v330_v44, %v331_v45 }
   0xc   :  { %v278_v39 = vmax.f32 %v276_v31, %v277_v26  ;;  %v30_v48 = vld [vmem:[%s6671_s0 + $0x26] sm:$0x3]  ;;  %v171_v51 = vld [vmem:[%s6671_s0 + $0x140] sm:$0x3]  ;;  %v140_v56 = vld [vmem:[%s6671_s0 + $0x102] sm:$0x3] }
   0xd   :  { %v46_v49 = vld [vmem:[%s6671_s0 + $0x46] sm:$0x3]  ;;  %v187_v52 = vld [vmem:[%s6671_s0 + $0x160] sm:$0x3]  ;;  %v283_v57 = vsel %vm267_vm0, %v139_v38, -inf  ;;  %v310_v58 = vsel %vm267_vm0, %v108_v37, -inf  ;;  %v309_v0 = vmax.f32 %v307_v54, %v308_v43  ;;  %v334_v1 = vmax.f32 %v332_v55, %v333_v46 }
   0xe   :  { %v280_v53 = vmax.f32 %v278_v39, %v279_v34  ;;  %v335_v59 = vsel %vm267_vm0, %v61_v33, -inf  ;;  %v62_v60 = vld [vmem:[%s6671_s0 + $0x66] sm:$0x3]  ;;  %v93_v61 = vld [vmem:[%s6671_s0 + $0xa4] sm:$0x3]  ;;  %v285_v63 = vsel %vm267_vm0, %v155_v42, -inf }
   0xf   :  { %v109_v2 = vld [vmem:[%s6671_s0 + $0xc4] sm:$0x3]  ;;  %v287_v3 = vsel %vm267_vm0, %v171_v51, -inf  ;;  %v3093_v4 = vsel %vm267_vm0, %v187_v52, -inf  ;;  %v312_v5 = vsel %vm267_vm0, %v124_v50, -inf  ;;  %v337_v6 = vsel %vm267_vm0, %v77_v36, -inf }
  0x10   :  { %v282_v62 = vmax.f32 %v280_v53, %v281_v40  ;;  %v78_v7 = vld [vmem:[%s6671_s0 + $0x86] sm:$0x3]  ;;  %v203_v8 = vld [vmem:[%s6671_s0 + $0x180] sm:$0x3]  ;;  %v311_v11 = vmax.f32 %v309_v0, %v310_v58  ;;  %v314_v12 = vsel %vm267_vm0, %v140_v56, -inf  ;;  %v336_v13 = vmax.f32 %v334_v1, %v335_v59 }
  0x11   :  { %v219_v9 = vld [vmem:[%s6671_s0 + $0x1a0] sm:$0x3]  ;;  %v125_v14 = vld [vmem:[%s6671_s0 + $0xe4] sm:$0x3]  ;;  %v339_v15 = vsel %vm267_vm0, %v93_v61, -inf  ;;  %v361_v16 = vsel %vm267_vm0, %v14_v47, -inf }
  0x12   :  { %v284_v10 = vmax.f32 %v282_v62, %v283_v57  ;;  %v362_v17 = vsel %vm267_vm0, %v30_v48, -inf  ;;  %v364_v18 = vsel %vm267_vm0, %v46_v49, -inf  ;;  %v156_v19 = vld [vmem:[%s6671_s0 + $0x122] sm:$0x3]  ;;  %v235_v21 = vld [vmem:[%s6671_s0 + $0x1c0] sm:$0x3]  ;;  %v313_v23 = vmax.f32 %v311_v11, %v312_v5 }
  0x13   :  { %v172_v20 = vld [vmem:[%s6671_s0 + $0x142] sm:$0x3]  ;;  %v338_v24 = vmax.f32 %v336_v13, %v337_v6  ;;  %v363_v25 = vmax.f32 %v361_v16, %v362_v17  ;;  %v251_v26 = vld [vmem:[%s6671_s0 + $0x1e0] sm:$0x3]  ;;  %v291_v27 = vsel %vm267_vm0, %v203_v8, -inf  ;;  %v3128_v28 = vsel %vm267_vm0, %v219_v9, -inf }
  0x14   :  { %v286_v22 = vmax.f32 %v284_v10, %v285_v63  ;;  %v341_v29 = vsel %vm267_vm0, %v109_v2, -inf  ;;  %v366_v30 = vsel %vm267_vm0, %v62_v60, -inf  ;;  %v15_v31 = vld [vmem:[%s6671_s0 + $0x8] sm:$0x3]  ;;  %v94_v33 = vld [vmem:[%s6671_s0 + $0xa6] sm:$0x3]  ;;  %v315_v37 = vmax.f32 %v313_v23, %v314_v12 }
  0x15   :  { %v31_v32 = vld [vmem:[%s6671_s0 + $0x28] sm:$0x3]  ;;  %v141_v34 = vld [vmem:[%s6671_s0 + $0x104] sm:$0x3]  ;;  %v188_v35 = vld [vmem:[%s6671_s0 + $0x162] sm:$0x3]  ;;  %v340_v38 = vmax.f32 %v338_v24, %v339_v15  ;;  %v365_v39 = vmax.f32 %v363_v25, %v364_v18 }
  0x16   :  { %v288_v36 = vmax.f32 %v286_v22, %v287_v3  ;;  %v47_v40 = vld [vmem:[%s6671_s0 + $0x48] sm:$0x3]  ;;  %v204_v41 = vld [vmem:[%s6671_s0 + $0x182] sm:$0x3]  ;;  %v3154_v42 = vsel %vm267_vm0, %v235_v21, -inf  ;;  %v316_v43 = vsel %vm267_vm0, %v156_v19, -inf }
  0x17   :  { %v343_v44 = vsel %vm267_vm0, %v125_v14, -inf  ;;  %v368_v45 = vsel %vm267_vm0, %v78_v7, -inf  ;;  %v110_v46 = vld [vmem:[%s6671_s0 + $0xc6] sm:$0x3]  ;;  %v157_v47 = vld [vmem:[%s6671_s0 + $0x124] sm:$0x3]  ;;  %v342_v50 = vmax.f32 %v340_v38, %v341_v29  ;;  %v367_v51 = vmax.f32 %v365_v39, %v366_v30 }
  0x18   :  { %v3166_v48 = vsel %vm267_vm0, %v251_v26, -inf  ;;  %v318_v49 = vsel %vm267_vm0, %v172_v20, -inf  ;;  %v63_v52 = vld [vmem:[%s6671_s0 + $0x68] sm:$0x3]  ;;  %v220_v53 = vld [vmem:[%s6671_s0 + $0x1a2] sm:$0x3]  ;;  %v290_v54 = vmax.f32 %v288_v36, %v3093_v4  ;;  %v317_v60 = vmax.f32 %v315_v37, %v316_v43 }
  0x19   :  { %v3177_v55 = vsel %vm267_vm0, %v188_v35, -inf  ;;  %v345_v56 = vsel %vm267_vm0, %v141_v34, -inf  ;;  %v370_v57 = vsel %vm267_vm0, %v94_v33, -inf  ;;  %v126_v58 = vld [vmem:[%s6671_s0 + $0xe6] sm:$0x3]  ;;  %v3188_v61 = vsel %vm267_vm0, %v204_v41, -inf }
  0x1a   :  { %v236_v59 = vld [vmem:[%s6671_s0 + $0x1c2] sm:$0x3]  ;;  %v344_v62 = vmax.f32 %v342_v50, %v343_v44  ;;  %v369_v63 = vmax.f32 %v367_v51, %v368_v45  ;;  %v79_v0 = vld [vmem:[%s6671_s0 + $0x88] sm:$0x3]  ;;  %v142_v1 = vld [vmem:[%s6671_s0 + $0x106] sm:$0x3]  ;;  %v292_v16 = vmax.f32 %v290_v54, %v291_v27  ;;  %v319_v22 = vmax.f32 %v317_v60, %v318_v49 }
  0x1b   :  { %v347_v2 = vsel %vm267_vm0, %v157_v47, -inf  ;;  %v372_v3 = vsel %vm267_vm0, %v110_v46, -inf  ;;  %v392_v4 = vsel %vm267_vm0, %v15_v31, -inf  ;;  %v393_v5 = vsel %vm267_vm0, %v31_v32, -inf  ;;  %v158_v6 = vld [vmem:[%s6671_s0 + $0x126] sm:$0x3] }
  0x1c   :  { %v173_v7 = vld [vmem:[%s6671_s0 + $0x144] sm:$0x3]  ;;  %v252_v8 = vld [vmem:[%s6671_s0 + $0x1e2] sm:$0x3]  ;;  %v3210_v9 = vsel %vm267_vm0, %v220_v53, -inf  ;;  %v346_v10 = vmax.f32 %v344_v62, %v345_v56  ;;  %v371_v11 = vmax.f32 %v369_v63, %v370_v57  ;;  %v395_v12 = vsel %vm267_vm0, %v47_v40, -inf }
  0x1d   :  { %v95_v13 = vld [vmem:[%s6671_s0 + $0xa8] sm:$0x3]  ;;  %v189_v14 = vld [vmem:[%s6671_s0 + $0x164] sm:$0x3]  ;;  %v3223_v17 = vsel %vm267_vm0, %v236_v59, -inf  ;;  %v374_v18 = vsel %vm267_vm0, %v126_v58, -inf  ;;  %v394_v19 = vmax.f32 %v392_v4, %v393_v5  ;;  %v294_v43 = vmax.f32 %v292_v16, %v3128_v28 }
  0x1e   :  { %v205_v15 = vld [vmem:[%s6671_s0 + $0x184] sm:$0x3]  ;;  %v174_v20 = vld [vmem:[%s6671_s0 + $0x146] sm:$0x3]  ;;  %v348_v23 = vmax.f32 %v346_v10, %v347_v2  ;;  %v373_v24 = vmax.f32 %v371_v11, %v372_v3  ;;  %v397_v25 = vsel %vm267_vm0, %v63_v52, -inf  ;;  %v3240_v29 = vsel %vm267_vm0, %v252_v8, -inf }
  0x1f   :  { %v221_v21 = vld [vmem:[%s6671_s0 + $0x1a4] sm:$0x3]  ;;  %v16_v26 = vld [vmem:[%s6671_s0 + $0xa] sm:$0x3]  ;;  %v349_v30 = vsel %vm267_vm0, %v173_v7, -inf  ;;  %v376_v31 = vsel %vm267_vm0, %v142_v1, -inf  ;;  %v396_v32 = vmax.f32 %v394_v19, %v395_v12  ;;  %v321_v50 = vmax.f32 %v319_v22, %v3177_v55 }
  0x20   :  { %v237_v27 = vld [vmem:[%s6671_s0 + $0x1c4] sm:$0x3]  ;;  %v32_v33 = vld [vmem:[%s6671_s0 + $0x2a] sm:$0x3]  ;;  %v351_v36 = vsel %vm267_vm0, %v189_v14, -inf  ;;  %v353_v37 = vsel %vm267_vm0, %v205_v15, -inf  ;;  %v375_v38 = vmax.f32 %v373_v24, %v374_v18  ;;  %v350_v51 = vmax.f32 %v348_v23, %v349_v30 }
  0x21   :  { %v48_v34 = vld [vmem:[%s6671_s0 + $0x4a] sm:$0x3]  ;;  %v253_v35 = vld [vmem:[%s6671_s0 + $0x1e4] sm:$0x3]  ;;  %v399_v39 = vsel %vm267_vm0, %v79_v0, -inf  ;;  %v3264_v44 = vsel %vm267_vm0, %v221_v21, -inf  ;;  %v398_v46 = vmax.f32 %v396_v32, %v397_v25  ;;  %v3300_v2 = vmax.f32 %v294_v43, %v3154_v42 }
  0x22   :  { %v111_v40 = vld [vmem:[%s6671_s0 + $0xc8] sm:$0x3]  ;;  %v190_v41 = vld [vmem:[%s6671_s0 + $0x166] sm:$0x3]  ;;  %v378_v45 = vsel %vm267_vm0, %v158_v6, -inf  ;;  %v377_v52 = vmax.f32 %v375_v38, %v376_v31  ;;  %v401_v28 = vsel %vm267_vm0, %v95_v13, -inf  ;;  %v323_v8 = vmax.f32 %v321_v50, %v3188_v61 }
  0x23   :  { %v64_v47 = vld [vmem:[%s6671_s0 + $0x6a] sm:$0x3]  ;;  %v127_v49 = vld [vmem:[%s6671_s0 + $0xe8] sm:$0x3]  ;;  %v3279_v54 = vsel %vm267_vm0, %v237_v27, -inf  ;;  %v3282_v56 = vsel %vm267_vm0, %v253_v35, -inf  ;;  %v400_v58 = vmax.f32 %v398_v46, %v399_v39  ;;  %v352_v10 = vmax.f32 %v350_v51, %v351_v36 }
  0x24   :  { %v143_v53 = vld [vmem:[%s6671_s0 + $0x108] sm:$0x3]  ;;  %v380_v57 = vsel %vm267_vm0, %v174_v20, -inf  ;;  %v206_v55 = vld [vmem:[%s6671_s0 + $0x186] sm:$0x3]  ;;  %v379_v59 = vmax.f32 %v377_v52, %v378_v45  ;;  %v3289_v60 = vsel %vm267_vm0, %v190_v41, -inf  ;;  %v298_v27 = vmax.f32 %v3300_v2, %v3166_v48 }
  0x25   :  { %v403_v62 = vsel %vm267_vm0, %v111_v40, -inf  ;;  %v423_v63 = vsel %vm267_vm0, %v16_v26, -inf  ;;  %v222_v0 = vld [vmem:[%s6671_s0 + $0x1a6] sm:$0x3]  ;;  %v402_v3 = vmax.f32 %v400_v58, %v401_v28  ;;  %v424_v4 = vsel %vm267_vm0, %v32_v33, -inf }
  0x26   :  { %v238_v1 = vld [vmem:[%s6671_s0 + $0x1c6] sm:$0x3]  ;;  %v426_v5 = vsel %vm267_vm0, %v48_v34, -inf  ;;  %v80_v6 = vld [vmem:[%s6671_s0 + $0x8a] sm:$0x3]  ;;  %v405_v11 = vsel %vm267_vm0, %v127_v49, -inf  ;;  %v425_v42 = vmax.f32 %v423_v63, %v424_v4  ;;  %v381_v15 = vmax.f32 %v379_v59, %v380_v57 }
  0x27   :  { %v254_v7 = vld [vmem:[%s6671_s0 + $0x1e6] sm:$0x3]  ;;  %v17_v12 = vld [vmem:[%s6671_s0 + $0xc] sm:$0x3]  ;;  %v96_v14 = vld [vmem:[%s6671_s0 + $0xaa] sm:$0x3]  ;;  %v404_v18 = vmax.f32 %v402_v3, %v403_v62  ;;  %v325_v35 = vmax.f32 %v323_v8, %v3210_v9  ;;  %v354_v36 = vmax.f32 %v352_v10, %v353_v37 }
  0x28   :  { %v33_v13 = vld [vmem:[%s6671_s0 + $0x2c] sm:$0x3]  ;;  %v159_v61 = vld [vmem:[%s6671_s0 + $0x128] sm:$0x3]  ;;  %v384_v16 = vsel %vm267_vm0, %v206_v55, -inf  ;;  %v428_v19 = vsel %vm267_vm0, %v64_v47, -inf  ;;  %v427_v24 = vmax.f32 %v425_v42, %v426_v5  ;;  %v383_v43 = vmax.f32 %v381_v15, %v3289_v60 }
  0x29   :  { %v175_v20 = vld [vmem:[%s6671_s0 + $0x148] sm:$0x3]  ;;  %v3330_v21 = vsel %vm267_vm0, %v222_v0, -inf  ;;  %v3333_v22 = vsel %vm267_vm0, %v238_v1, -inf  ;;  %v407_v23 = vsel %vm267_vm0, %v143_v53, -inf  ;;  %v3345_v30 = vsel %vm267_vm0, %v254_v7, -inf }
  0x2a   :  { %v49_v25 = vld [vmem:[%s6671_s0 + $0x4c] sm:$0x3]  ;;  %v191_v26 = vld [vmem:[%s6671_s0 + $0x168] sm:$0x3]  ;;  %v406_v31 = vmax.f32 %v404_v18, %v405_v11  ;;  %v430_v32 = vsel %vm267_vm0, %v80_v6, -inf  ;;  %v409_v38 = vsel %vm267_vm0, %v159_v61, -inf  ;;  %v429_v39 = vmax.f32 %v427_v24, %v428_v19 }
  0x2b   :  { %v65_v33 = vld [vmem:[%s6671_s0 + $0x6c] sm:$0x3]  ;;  %v112_v34 = vld [vmem:[%s6671_s0 + $0xca] sm:$0x3]  ;;  %v411_v46 = vsel %vm267_vm0, %v175_v20, -inf  ;;  %v432_v47 = vsel %vm267_vm0, %v96_v14, -inf  ;;  %v3391_v63 = vmax.f32 %v325_v35, %v3223_v17  ;;  %v356_v0 = vmax.f32 %v354_v36, %v3264_v44 }
  0x2c   :  { %v81_v40 = vld [vmem:[%s6671_s0 + $0x8c] sm:$0x3]  ;;  %v128_v41 = vld [vmem:[%s6671_s0 + $0xea] sm:$0x3]  ;;  %v408_v45 = vmax.f32 %v406_v31, %v407_v23  ;;  %v207_v9 = vld [vmem:[%s6671_s0 + $0x188] sm:$0x3]  ;;  %v431_v49 = vmax.f32 %v429_v39, %v430_v32  ;;  %v385_v6 = vmax.f32 %v383_v43, %v384_v16 }
  0x2d   :  { %v3369_v37 = vsel %vm267_vm0, %v191_v26, -inf  ;;  %v454_v50 = vsel %vm267_vm0, %v17_v12, -inf  ;;  %v455_v51 = vsel %vm267_vm0, %v33_v13, -inf  ;;  %v223_v52 = vld [vmem:[%s6671_s0 + $0x1a8] sm:$0x3]  ;;  %v434_v57 = vsel %vm267_vm0, %v112_v34, -inf }
  0x2e   :  { %v239_v28 = vld [vmem:[%s6671_s0 + $0x1c8] sm:$0x3]  ;;  %v410_v53 = vmax.f32 %v408_v45, %v409_v38  ;;  %v456_v58 = vmax.f32 %v454_v50, %v455_v51  ;;  %v457_v55 = vsel %vm267_vm0, %v49_v25, -inf  ;;  %v18_v59 = vld [vmem:[%s6671_s0 + $0xe] sm:$0x3]  ;;  %v433_v1 = vmax.f32 %v431_v49, %v432_v47 }
  0x2f   :  { %v144_v60 = vld [vmem:[%s6671_s0 + $0x10a] sm:$0x3]  ;;  %v255_v62 = vld [vmem:[%s6671_s0 + $0x1e8] sm:$0x3]  ;;  %v459_v3 = vsel %vm267_vm0, %v65_v33, -inf  ;;  %v415_v7 = vsel %vm267_vm0, %v207_v9, -inf  ;;  %v329_v23 = vmax.f32 %v3391_v63, %v3240_v29  ;;  %v3432_v24 = vmax.f32 %v356_v0, %v3279_v54 }
  0x30   :  { %v34_v4 = vld [vmem:[%s6671_s0 + $0x2e] sm:$0x3]  ;;  %v97_v5 = vld [vmem:[%s6671_s0 + $0xac] sm:$0x3]  ;;  %v436_v8 = vsel %vm267_vm0, %v128_v41, -inf  ;;  %v458_v17 = vmax.f32 %v456_v58, %v457_v55  ;;  %v3407_v10 = vsel %vm267_vm0, %v223_v52, -inf  ;;  %v435_v42 = vmax.f32 %v433_v1, %v434_v57 }
  0x31   :  { %v160_v44 = vld [vmem:[%s6671_s0 + $0x12a] sm:$0x3]  ;;  %v3410_v11 = vsel %vm267_vm0, %v239_v28, -inf  ;;  %v461_v12 = vsel %vm267_vm0, %v81_v40, -inf  ;;  %v50_v13 = vld [vmem:[%s6671_s0 + $0x4e] sm:$0x3]  ;;  %v412_v61 = vmax.f32 %v410_v53, %v411_v46  ;;  %v387_v34 = vmax.f32 %v385_v6, %v3330_v21 }
  0x32   :  { %v113_v14 = vld [vmem:[%s6671_s0 + $0xcc] sm:$0x3]  ;;  %v3420_v15 = vsel %vm267_vm0, %v255_v62, -inf  ;;  %v438_v16 = vsel %vm267_vm0, %v144_v60, -inf  ;;  %v460_v18 = vmax.f32 %v458_v17, %v459_v3  ;;  %v66_v19 = vld [vmem:[%s6671_s0 + $0x6e] sm:$0x3]  ;;  %v437_v25 = vmax.f32 %v435_v42, %v436_v8 }
  0x33   :  { %v176_v20 = vld [vmem:[%s6671_s0 + $0x14a] sm:$0x3]  ;;  %v463_v26 = vsel %vm267_vm0, %v97_v5, -inf  ;;  %v82_v31 = vld [vmem:[%s6671_s0 + $0x8e] sm:$0x3]  ;;  %v440_v54 = vsel %vm267_vm0, %v160_v44, -inf  ;;  %v414_v47 = vmax.f32 %v412_v61, %v3369_v37  ;;  %v360_v60 = vmax.f32 %v3432_v24, %v3282_v56 }
  0x34   :  { %v129_v32 = vld [vmem:[%s6671_s0 + $0xec] sm:$0x3]  ;;  %v192_v33 = vld [vmem:[%s6671_s0 + $0x16a] sm:$0x3]  ;;  %v462_v35 = vmax.f32 %v460_v18, %v461_v12  ;;  %v485_v36 = vsel %vm267_vm0, %v18_v59, -inf  ;;  %v439_v39 = vmax.f32 %v437_v25, %v438_v16  ;;  %v465_v40 = vsel %vm267_vm0, %v113_v14, -inf }
  0x35   :  { %v208_v38 = vld [vmem:[%s6671_s0 + $0x18a] sm:$0x3]  ;;  %v486_v41 = vsel %vm267_vm0, %v34_v4, -inf  ;;  %v488_v43 = vsel %vm267_vm0, %v50_v13, -inf  ;;  %v98_v21 = vld [vmem:[%s6671_s0 + $0xae] sm:$0x3]  ;;  %v3493_v4 = vmax.f32 %v387_v34, %v3333_v22  ;;  %v416_v42 = vmax.f32 %v414_v47, %v415_v7 }
  0x36   :  { %v145_v45 = vld [vmem:[%s6671_s0 + $0x10c] sm:$0x3]  ;;  %v224_v46 = vld [vmem:[%s6671_s0 + $0x1aa] sm:$0x3]  ;;  %v442_v9 = vsel %vm267_vm0, %v176_v20, -inf  ;;  %v464_v49 = vmax.f32 %v462_v35, %v463_v26  ;;  %v487_v50 = vmax.f32 %v485_v36, %v486_v41  ;;  %v441_v53 = vmax.f32 %v439_v39, %v440_v54 }
  0x37   :  { %v19_v51 = vld [vmem:[%s6671_s0 + $0x10] sm:$0x3]  ;;  %v240_v28 = vld [vmem:[%s6671_s0 + $0x1ca] sm:$0x3]  ;;  %v3474_v57 = vsel %vm267_vm0, %v192_v33, -inf  ;;  %v467_v37 = vsel %vm267_vm0, %v129_v32, -inf  ;;  %v391_v35 = vmax.f32 %v3493_v4, %v3345_v30 }
  0x38   :  { %v35_v52 = vld [vmem:[%s6671_s0 + $0x30] sm:$0x3]  ;;  %v490_v58 = vsel %vm267_vm0, %v66_v19, -inf  ;;  %v161_v55 = vld [vmem:[%s6671_s0 + $0x12c] sm:$0x3]  ;;  %v3487_v62 = vsel %vm267_vm0, %v208_v38, -inf  ;;  %v466_v0 = vmax.f32 %v464_v49, %v465_v40  ;;  %v489_v1 = vmax.f32 %v487_v50, %v488_v43 }
  0x39   :  { %v256_v59 = vld [vmem:[%s6671_s0 + $0x1ea] sm:$0x3]  ;;  %v51_v3 = vld [vmem:[%s6671_s0 + $0x50] sm:$0x3]  ;;  %v3496_v5 = vsel %vm267_vm0, %v224_v46, -inf  ;;  %v469_v6 = vsel %vm267_vm0, %v145_v45, -inf  ;;  %v443_v16 = vmax.f32 %v441_v53, %v442_v9  ;;  %v418_v43 = vmax.f32 %v416_v42, %v3407_v10 }
  0x3a   :  { %v492_v8 = vsel %vm267_vm0, %v82_v31, -inf  ;;  %v67_v17 = vld [vmem:[%s6671_s0 + $0x70] sm:$0x3]  ;;  %v114_v44 = vld [vmem:[%s6671_s0 + $0xce] sm:$0x3]  ;;  %v3507_v12 = vsel %vm267_vm0, %v240_v28, -inf  ;;  %v468_v22 = vmax.f32 %v466_v0, %v467_v37  ;;  %v491_v13 = vmax.f32 %v489_v1, %v490_v58 }
  0x3b   :  { %v83_v14 = vld [vmem:[%s6671_s0 + $0x90] sm:$0x3]  ;;  %v177_v61 = vld [vmem:[%s6671_s0 + $0x14c] sm:$0x3]  ;;  %v3516_v18 = vsel %vm267_vm0, %v256_v59, -inf  ;;  %v471_v19 = vsel %vm267_vm0, %v161_v55, -inf  ;;  %v445_v50 = vmax.f32 %v443_v16, %v3474_v57  ;;  %v3591_v42 = vmax.f32 %v418_v43, %v3410_v11 }
  0x3c   :  { %v494_v7 = vsel %vm267_vm0, %v98_v21, -inf  ;;  %v130_v20 = vld [vmem:[%s6671_s0 + $0xee] sm:$0x3]  ;;  %v470_v26 = vmax.f32 %v468_v22, %v469_v6  ;;  %v493_v31 = vmax.f32 %v491_v13, %v492_v8  ;;  %v516_v32 = vsel %vm267_vm0, %v19_v51, -inf  ;;  %v193_v34 = vld [vmem:[%s6671_s0 + $0x16c] sm:$0x3] }
  0x3d   :  { %v146_v25 = vld [vmem:[%s6671_s0 + $0x10e] sm:$0x3]  ;;  %v517_v33 = vsel %vm267_vm0, %v35_v52, -inf  ;;  %v209_v54 = vld [vmem:[%s6671_s0 + $0x18c] sm:$0x3]  ;;  %v496_v36 = vsel %vm267_vm0, %v114_v44, -inf  ;;  %v447_v11 = vmax.f32 %v445_v50, %v3487_v62 }
  0x3e   :  { %v518_v38 = vmax.f32 %v516_v32, %v517_v33  ;;  %v519_v39 = vsel %vm267_vm0, %v51_v3, -inf  ;;  %v225_v40 = vld [vmem:[%s6671_s0 + $0x1ac] sm:$0x3]  ;;  %v473_v21 = vsel %vm267_vm0, %v177_v61, -inf  ;;  %v495_v45 = vmax.f32 %v493_v31, %v494_v7  ;;  %v20_v47 = vld [vmem:[%s6671_s0 + $0x12] sm:$0x3] }
  0x3f   :  { %v241_v41 = vld [vmem:[%s6671_s0 + $0x1cc] sm:$0x3]  ;;  %v521_v46 = vsel %vm267_vm0, %v67_v17, -inf  ;;  %v36_v9 = vld [vmem:[%s6671_s0 + $0x32] sm:$0x3]  ;;  %v472_v51 = vmax.f32 %v470_v26, %v471_v19  ;;  %v498_v52 = vsel %vm267_vm0, %v130_v20, -inf }
  0x40   :  { %v99_v49 = vld [vmem:[%s6671_s0 + $0xb0] sm:$0x3]  ;;  %v257_v10 = vld [vmem:[%s6671_s0 + $0x1ec] sm:$0x3]  ;;  %v520_v28 = vmax.f32 %v518_v38, %v519_v39  ;;  %v52_v53 = vld [vmem:[%s6671_s0 + $0x52] sm:$0x3]  ;;  %v497_v59 = vmax.f32 %v495_v45, %v496_v36 }
  0x41   :  { %v162_v37 = vld [vmem:[%s6671_s0 + $0x12e] sm:$0x3]  ;;  %v3568_v58 = vsel %vm267_vm0, %v193_v34, -inf  ;;  %v3571_v55 = vsel %vm267_vm0, %v209_v54, -inf  ;;  %v523_v57 = vsel %vm267_vm0, %v83_v14, -inf  ;;  %v3578_v1 = vsel %vm267_vm0, %v225_v40, -inf }
  0x42   :  { %v115_v0 = vld [vmem:[%s6671_s0 + $0xd0] sm:$0x3]  ;;  %v3581_v3 = vsel %vm267_vm0, %v241_v41, -inf  ;;  %v500_v6 = vsel %vm267_vm0, %v146_v25, -inf  ;;  %v522_v8 = vmax.f32 %v520_v28, %v521_v46  ;;  %v68_v17 = vld [vmem:[%s6671_s0 + $0x72] sm:$0x3]  ;;  %v499_v13 = vmax.f32 %v497_v59, %v498_v52 }
  0x43   :  { %v178_v44 = vld [vmem:[%s6671_s0 + $0x14e] sm:$0x3]  ;;  %v3594_v22 = vsel %vm267_vm0, %v257_v10, -inf  ;;  %v525_v14 = vsel %vm267_vm0, %v99_v49, -inf  ;;  %v84_v61 = vld [vmem:[%s6671_s0 + $0x92] sm:$0x3]  ;;  %v474_v7 = vmax.f32 %v472_v51, %v473_v21  ;;  %v449_v51 = vmax.f32 %v447_v11, %v3496_v5 }
  0x44   :  { %v131_v16 = vld [vmem:[%s6671_s0 + $0xf0] sm:$0x3]  ;;  %v194_v19 = vld [vmem:[%s6671_s0 + $0x16e] sm:$0x3]  ;;  %v502_v20 = vsel %vm267_vm0, %v162_v37, -inf  ;;  %v524_v25 = vmax.f32 %v522_v8, %v523_v57  ;;  %v501_v31 = vmax.f32 %v499_v13, %v500_v6  ;;  %v527_v32 = vsel %vm267_vm0, %v115_v0, -inf }
  0x45   :  { %v147_v26 = vld [vmem:[%s6671_s0 + $0x110] sm:$0x3]  ;;  %v547_v33 = vsel %vm267_vm0, %v20_v47, -inf  ;;  %v548_v34 = vsel %vm267_vm0, %v36_v9, -inf  ;;  %v210_v54 = vld [vmem:[%s6671_s0 + $0x18e] sm:$0x3]  ;;  %v476_v52 = vmax.f32 %v474_v7, %v3568_v58  ;;  %v422_v59 = vmax.f32 %v3591_v42, %v3420_v15 }
  0x46   :  { %v226_v62 = vld [vmem:[%s6671_s0 + $0x1ae] sm:$0x3]  ;;  %v504_v36 = vsel %vm267_vm0, %v178_v44, -inf  ;;  %v526_v38 = vmax.f32 %v524_v25, %v525_v14  ;;  %v549_v39 = vmax.f32 %v547_v33, %v548_v34  ;;  %v550_v40 = vsel %vm267_vm0, %v52_v53, -inf  ;;  %v21_v47 = vld [vmem:[%s6671_s0 + $0x14] sm:$0x3] }
  0x47   :  { %v242_v41 = vld [vmem:[%s6671_s0 + $0x1ce] sm:$0x3]  ;;  %v503_v43 = vmax.f32 %v501_v31, %v502_v20  ;;  %v3626_v21 = vsel %vm267_vm0, %v194_v19, -inf  ;;  %v529_v45 = vsel %vm267_vm0, %v131_v16, -inf  ;;  %v552_v46 = vsel %vm267_vm0, %v68_v17, -inf }
  0x48   :  { %v37_v9 = vld [vmem:[%s6671_s0 + $0x34] sm:$0x3]  ;;  %v100_v49 = vld [vmem:[%s6671_s0 + $0xb2] sm:$0x3]  ;;  %v163_v10 = vld [vmem:[%s6671_s0 + $0x130] sm:$0x3]  ;;  %v528_v28 = vmax.f32 %v526_v38, %v527_v32  ;;  %v551_v53 = vmax.f32 %v549_v39, %v550_v40  ;;  %v478_v31 = vmax.f32 %v476_v52, %v3571_v55 }
  0x49   :  { %v258_v50 = vld [vmem:[%s6671_s0 + $0x1ee] sm:$0x3]  ;;  %v53_v37 = vld [vmem:[%s6671_s0 + $0x54] sm:$0x3]  ;;  %v508_v57 = vsel %vm267_vm0, %v210_v54, -inf  ;;  %v531_v0 = vsel %vm267_vm0, %v147_v26, -inf  ;;  %v3685_v26 = vmax.f32 %v449_v51, %v3507_v12 }
  0x4a   :  { %v554_v6 = vsel %vm267_vm0, %v84_v61, -inf  ;;  %v69_v5 = vld [vmem:[%s6671_s0 + $0x74] sm:$0x3]  ;;  %v116_v58 = vld [vmem:[%s6671_s0 + $0xd2] sm:$0x3]  ;;  %v3662_v8 = vsel %vm267_vm0, %v226_v62, -inf  ;;  %v530_v44 = vmax.f32 %v528_v28, %v529_v45  ;;  %v553_v13 = vmax.f32 %v551_v53, %v552_v46 }
  0x4b   :  { %v3665_v17 = vsel %vm267_vm0, %v242_v41, -inf  ;;  %v179_v14 = vld [vmem:[%s6671_s0 + $0x150] sm:$0x3]  ;;  %v505_v61 = vmax.f32 %v503_v43, %v504_v36  ;;  %v3671_v16 = vsel %vm267_vm0, %v258_v50, -inf  ;;  %v533_v19 = vsel %vm267_vm0, %v163_v10, -inf }
  0x4c   :  { %v556_v11 = vsel %vm267_vm0, %v100_v49, -inf  ;;  %v85_v7 = vld [vmem:[%s6671_s0 + $0x94] sm:$0x3]  ;;  %v132_v20 = vld [vmem:[%s6671_s0 + $0xf2] sm:$0x3]  ;;  %v532_v32 = vmax.f32 %v530_v44, %v531_v0  ;;  %v555_v33 = vmax.f32 %v553_v13, %v554_v6  ;;  %v558_v54 = vsel %vm267_vm0, %v116_v58, -inf }
  0x4d   :  { %v195_v25 = vld [vmem:[%s6671_s0 + $0x170] sm:$0x3]  ;;  %v578_v62 = vsel %vm267_vm0, %v21_v47, -inf  ;;  %v579_v36 = vsel %vm267_vm0, %v37_v9, -inf  ;;  %v581_v38 = vsel %vm267_vm0, %v53_v37, -inf  ;;  %v535_v41 = vsel %vm267_vm0, %v179_v14, -inf }
  0x4e   :  { %v211_v34 = vld [vmem:[%s6671_s0 + $0x190] sm:$0x3]  ;;  %v101_v12 = vld [vmem:[%s6671_s0 + $0xb4] sm:$0x3]  ;;  %v148_v55 = vld [vmem:[%s6671_s0 + $0x112] sm:$0x3]  ;;  %v534_v40 = vmax.f32 %v532_v32, %v533_v19  ;;  %v557_v43 = vmax.f32 %v555_v33, %v556_v11  ;;  %v580_v45 = vmax.f32 %v578_v62, %v579_v36  ;;  %v507_v47 = vmax.f32 %v505_v61, %v3626_v21 }
  0x4f   :  { %v227_v39 = vld [vmem:[%s6671_s0 + $0x1b0] sm:$0x3]  ;;  %v3710_v9 = vsel %vm267_vm0, %v195_v25, -inf  ;;  %v560_v49 = vsel %vm267_vm0, %v132_v20, -inf  ;;  %v583_v10 = vsel %vm267_vm0, %v69_v5, -inf  ;;  %v480_v28 = vmax.f32 %v478_v31, %v3578_v1 }
  0x50   :  { %v243_v46 = vld [vmem:[%s6671_s0 + $0x1d0] sm:$0x3]  ;;  %v22_v50 = vld [vmem:[%s6671_s0 + $0x16] sm:$0x3]  ;;  %v164_v52 = vld [vmem:[%s6671_s0 + $0x132] sm:$0x3]  ;;  %v559_v37 = vmax.f32 %v557_v43, %v558_v54  ;;  %v582_v0 = vmax.f32 %v580_v45, %v581_v38  ;;  %v453_v5 = vmax.f32 %v3685_v26, %v3516_v18  ;;  %v536_v61 = vmax.f32 %v534_v40, %v535_v41 }
  0x51   :  { %v38_v51 = vld [vmem:[%s6671_s0 + $0x36] sm:$0x3]  ;;  %v259_v21 = vld [vmem:[%s6671_s0 + $0x1f0] sm:$0x3]  ;;  %v539_v53 = vsel %vm267_vm0, %v211_v34, -inf  ;;  %v3734_v58 = vsel %vm267_vm0, %v227_v39, -inf  ;;  %v509_v31 = vmax.f32 %v507_v47, %v508_v57  ;;  %v3765_v57 = vmax.f32 %v480_v28, %v3581_v3 }
  0x52   :  { %v180_v6 = vld [vmem:[%s6671_s0 + $0x152] sm:$0x3]  ;;  %v562_v44 = vsel %vm267_vm0, %v148_v55, -inf  ;;  %v585_v13 = vsel %vm267_vm0, %v85_v7, -inf  ;;  %v54_v1 = vld [vmem:[%s6671_s0 + $0x56] sm:$0x3]  ;;  %v561_v11 = vmax.f32 %v559_v37, %v560_v49  ;;  %v584_v20 = vmax.f32 %v582_v0, %v583_v10 }
  0x53   :  { %v117_v14 = vld [vmem:[%s6671_s0 + $0xd4] sm:$0x3]  ;;  %v3745_v19 = vsel %vm267_vm0, %v243_v46, -inf  ;;  %v70_v25 = vld [vmem:[%s6671_s0 + $0x76] sm:$0x3]  ;;  %v3751_v7 = vsel %vm267_vm0, %v259_v21, -inf  ;;  %v538_v47 = vmax.f32 %v536_v61, %v3710_v9  ;;  %v511_v21 = vmax.f32 %v509_v31, %v3662_v8 }
  0x54   :  { %v564_v32 = vsel %vm267_vm0, %v164_v52, -inf  ;;  %v587_v33 = vsel %vm267_vm0, %v101_v12, -inf  ;;  %v86_v34 = vld [vmem:[%s6671_s0 + $0x96] sm:$0x3]  ;;  %v133_v54 = vld [vmem:[%s6671_s0 + $0xf4] sm:$0x3]  ;;  %v563_v36 = vmax.f32 %v561_v11, %v562_v44  ;;  %v586_v55 = vmax.f32 %v584_v20, %v585_v13 }
  0x55   :  { %v196_v62 = vld [vmem:[%s6671_s0 + $0x172] sm:$0x3]  ;;  %v566_v38 = vsel %vm267_vm0, %v180_v6, -inf  ;;  %v589_v39 = vsel %vm267_vm0, %v117_v14, -inf  ;;  %v609_v40 = vsel %vm267_vm0, %v22_v50, -inf  ;;  %v610_v41 = vsel %vm267_vm0, %v38_v51, -inf }
  0x56   :  { %v212_v12 = vld [vmem:[%s6671_s0 + $0x192] sm:$0x3]  ;;  %v612_v43 = vsel %vm267_vm0, %v54_v1, -inf  ;;  %v149_v3 = vld [vmem:[%s6671_s0 + $0x114] sm:$0x3]  ;;  %v565_v49 = vmax.f32 %v563_v36, %v564_v32  ;;  %v588_v10 = vmax.f32 %v586_v55, %v587_v33  ;;  %v611_v50 = vmax.f32 %v609_v40, %v610_v41 }
  0x57   :  { %v228_v45 = vld [vmem:[%s6671_s0 + $0x1b2] sm:$0x3]  ;;  %v23_v51 = vld [vmem:[%s6671_s0 + $0x18] sm:$0x3]  ;;  %v102_v52 = vld [vmem:[%s6671_s0 + $0xb6] sm:$0x3]  ;;  %v6675_v56 = vmax.f32 %v3765_v57, %v3594_v22 }
  0x58   :  { %v244_v46 = vld [vmem:[%s6671_s0 + $0x1d2] sm:$0x3]  ;;  %v3793_v28 = vsel %vm267_vm0, %v196_v62, -inf  ;;  %v591_v37 = vsel %vm267_vm0, %v133_v54, -inf  ;;  %v614_v9 = vsel %vm267_vm0, %v70_v25, -inf  ;;  %v570_v13 = vsel %vm267_vm0, %v212_v12, -inf }
  0x59   :  { %v39_v0 = vld [vmem:[%s6671_s0 + $0x38] sm:$0x3]  ;;  %v165_v6 = vld [vmem:[%s6671_s0 + $0x134] sm:$0x3]  ;;  %v260_v44 = vld [vmem:[%s6671_s0 + $0x1f2] sm:$0x3]  ;;  %v590_v1 = vmax.f32 %v588_v10, %v589_v39  ;;  %v613_v14 = vmax.f32 %v611_v50, %v612_v43  ;;  %v540_v62 = vmax.f32 %v538_v47, %v539_v53  ;;  %v567_v36 = vmax.f32 %v565_v49, %v566_v38 }
  0x5a   :  { %v181_v61 = vld [vmem:[%s6671_s0 + $0x154] sm:$0x3]  ;;  %v3813_v11 = vsel %vm267_vm0, %v228_v45, -inf  ;;  %v3816_v20 = vsel %vm267_vm0, %v244_v46, -inf  ;;  %v593_v25 = vsel %vm267_vm0, %v149_v3, -inf  ;;  %v616_v31 = vsel %vm267_vm0, %v86_v34, -inf }
  0x5b   :  { %v55_v32 = vld [vmem:[%s6671_s0 + $0x58] sm:$0x3]  ;;  %v118_v33 = vld [vmem:[%s6671_s0 + $0xd6] sm:$0x3]  ;;  %v197_v54 = vld [vmem:[%s6671_s0 + $0x174] sm:$0x3]  ;;  %v592_v55 = vmax.f32 %v590_v1, %v591_v37  ;;  %v615_v12 = vmax.f32 %v613_v14, %v614_v9  ;;  %v3833_v39 = vmax.f32 %v511_v21, %v3665_v17 }
  0x5c   :  { %v71_v34 = vld [vmem:[%s6671_s0 + $0x78] sm:$0x3]  ;;  %v3836_v40 = vsel %vm267_vm0, %v260_v44, -inf  ;;  %v595_v41 = vsel %vm267_vm0, %v165_v6, -inf  ;;  %v618_v43 = vsel %vm267_vm0, %v102_v52, -inf  ;;  %v597_v45 = vsel %vm267_vm0, %v181_v61, -inf }
  0x5d   :  { %v87_v53 = vld [vmem:[%s6671_s0 + $0x98] sm:$0x3]  ;;  %v134_v38 = vld [vmem:[%s6671_s0 + $0xf6] sm:$0x3]  ;;  %v213_v17 = vld [vmem:[%s6671_s0 + $0x194] sm:$0x3]  ;;  %v594_v3 = vmax.f32 %v592_v55, %v593_v25  ;;  %v617_v46 = vmax.f32 %v615_v12, %v616_v31  ;;  %v542_v6 = vmax.f32 %v540_v62, %v3734_v58  ;;  %v569_v44 = vmax.f32 %v567_v36, %v3793_v28 }
  0x5e   :  { %v640_v47 = vsel %vm267_vm0, %v23_v51, -inf  ;;  %v229_v49 = vld [vmem:[%s6671_s0 + $0x1b4] sm:$0x3]  ;;  %v3855_v10 = vsel %vm267_vm0, %v197_v54, -inf  ;;  %v620_v50 = vsel %vm267_vm0, %v118_v33, -inf  ;;  %v641_v52 = vsel %vm267_vm0, %v39_v0, -inf }
  0x5f   :  { %v643_v21 = vsel %vm267_vm0, %v55_v32, -inf  ;;  %v150_v37 = vld [vmem:[%s6671_s0 + $0x116] sm:$0x3]  ;;  %v245_v51 = vld [vmem:[%s6671_s0 + $0x1d4] sm:$0x3]  ;;  %v619_v1 = vmax.f32 %v617_v46, %v618_v43  ;;  %v642_v0 = vmax.f32 %v640_v47, %v641_v52  ;;  %v596_v31 = vmax.f32 %v594_v3, %v595_v41 }
  0x60   :  { %v261_v9 = vld [vmem:[%s6671_s0 + $0x1f4] sm:$0x3]  ;;  %v24_v14 = vld [vmem:[%s6671_s0 + $0x1a] sm:$0x3]  ;;  %v622_v32 = vsel %vm267_vm0, %v134_v38, -inf  ;;  %v645_v58 = vsel %vm267_vm0, %v71_v34, -inf  ;;  %v6676_v30 = vmax.f32 %v3833_v39, %v3671_v16 }
  0x61   :  { %v40_v61 = vld [vmem:[%s6671_s0 + $0x3a] sm:$0x3]  ;;  %v103_v33 = vld [vmem:[%s6671_s0 + $0xb8] sm:$0x3]  ;;  %v166_v54 = vld [vmem:[%s6671_s0 + $0x136] sm:$0x3]  ;;  %v621_v55 = vmax.f32 %v619_v1, %v620_v50  ;;  %v644_v12 = vmax.f32 %v642_v0, %v643_v21  ;;  %v571_v50 = vmax.f32 %v569_v44, %v570_v13 }
  0x62   :  { %v56_v28 = vld [vmem:[%s6671_s0 + $0x5a] sm:$0x3]  ;;  %v3891_v62 = vsel %vm267_vm0, %v213_v17, -inf  ;;  %v3894_v36 = vsel %vm267_vm0, %v229_v49, -inf  ;;  %v182_v34 = vld [vmem:[%s6671_s0 + $0x156] sm:$0x3]  ;;  %v3917_v49 = vmax.f32 %v542_v6, %v3745_v19 }
  0x63   :  { %v3900_v41 = vsel %vm267_vm0, %v245_v51, -inf  ;;  %v3903_v43 = vsel %vm267_vm0, %v261_v9, -inf  ;;  %v624_v38 = vsel %vm267_vm0, %v150_v37, -inf  ;;  %v647_v17 = vsel %vm267_vm0, %v87_v53, -inf  ;;  %v72_v3 = vld [vmem:[%s6671_s0 + $0x7a] sm:$0x3] }
  0x64   :  { %v119_v46 = vld [vmem:[%s6671_s0 + $0xd8] sm:$0x3]  ;;  %v198_v47 = vld [vmem:[%s6671_s0 + $0x176] sm:$0x3]  ;;  %v623_v52 = vmax.f32 %v621_v55, %v622_v32  ;;  %v646_v21 = vmax.f32 %v644_v12, %v645_v58  ;;  %v88_v53 = vld [vmem:[%s6671_s0 + $0x9a] sm:$0x3]  ;;  %v598_v51 = vmax.f32 %v596_v31, %v597_v45 }
  0x65   :  { %v135_v37 = vld [vmem:[%s6671_s0 + $0xf8] sm:$0x3]  ;;  %v626_v9 = vsel %vm267_vm0, %v166_v54, -inf  ;;  %v649_v1 = vsel %vm267_vm0, %v103_v33, -inf  ;;  %v671_v0 = vsel %vm267_vm0, %v24_v14, -inf  ;;  %v628_v44 = vsel %vm267_vm0, %v182_v34, -inf }
  0x66   :  { %v151_v19 = vld [vmem:[%s6671_s0 + $0x118] sm:$0x3]  ;;  %v214_v13 = vld [vmem:[%s6671_s0 + $0x196] sm:$0x3]  ;;  %v625_v6 = vmax.f32 %v623_v52, %v624_v38  ;;  %v648_v32 = vmax.f32 %v646_v21, %v647_v17  ;;  %v672_v45 = vsel %vm267_vm0, %v40_v61, -inf  ;;  %v3940_v14 = vsel %vm267_vm0, %v198_v47, -inf }
  0x67   :  { %v230_v31 = vld [vmem:[%s6671_s0 + $0x1b6] sm:$0x3]  ;;  %v651_v58 = vsel %vm267_vm0, %v119_v46, -inf  ;;  %v673_v33 = vmax.f32 %v671_v0, %v672_v45  ;;  %v674_v54 = vsel %vm267_vm0, %v56_v28, -inf  ;;  %v25_v55 = vld [vmem:[%s6671_s0 + $0x1c] sm:$0x3]  ;;  %v573_v34 = vmax.f32 %v571_v50, %v3813_v11 }
  0x68   :  { %v246_v61 = vld [vmem:[%s6671_s0 + $0x1d6] sm:$0x3]  ;;  %v627_v38 = vmax.f32 %v625_v6, %v626_v9  ;;  %v650_v17 = vmax.f32 %v648_v32, %v649_v1  ;;  %v676_v46 = vsel %vm267_vm0, %v72_v3, -inf  ;;  %v41_v28 = vld [vmem:[%s6671_s0 + $0x3c] sm:$0x3]  ;;  %v546_v21 = vmax.f32 %v3917_v49, %v3751_v7 }
  0x69   :  { %v262_v12 = vld [vmem:[%s6671_s0 + $0x1f6] sm:$0x3]  ;;  %v57_v47 = vld [vmem:[%s6671_s0 + $0x5c] sm:$0x3]  ;;  %v104_v52 = vld [vmem:[%s6671_s0 + $0xba] sm:$0x3]  ;;  %v600_v11 = vmax.f32 %v598_v51, %v3855_v10  ;;  %v675_v3 = vmax.f32 %v673_v33, %v674_v54 }
  0x6a   :  { %v653_v50 = vsel %vm267_vm0, %v135_v37, -inf  ;;  %v167_v9 = vld [vmem:[%s6671_s0 + $0x138] sm:$0x3]  ;;  %v632_v1 = vsel %vm267_vm0, %v214_v13, -inf  ;;  %v3973_v0 = vsel %vm267_vm0, %v230_v31, -inf  ;;  %v652_v6 = vmax.f32 %v650_v17, %v651_v58 }
  0x6b   :  { %v678_v32 = vsel %vm267_vm0, %v88_v53, -inf  ;;  %v120_v45 = vld [vmem:[%s6671_s0 + $0xda] sm:$0x3]  ;;  %v3980_v10 = vsel %vm267_vm0, %v246_v61, -inf  ;;  %v3983_v37 = vsel %vm267_vm0, %v262_v12, -inf  ;;  %v655_v51 = vsel %vm267_vm0, %v151_v19, -inf }
  0x6c   :  { %v677_v33 = vmax.f32 %v675_v3, %v676_v46  ;;  %v183_v13 = vld [vmem:[%s6671_s0 + $0x158] sm:$0x3]  ;;  %v3993_v31 = vmax.f32 %v573_v34, %v3816_v20  ;;  %v629_v58 = vmax.f32 %v627_v38, %v628_v44  ;;  %v654_v54 = vmax.f32 %v652_v6, %v653_v50  ;;  %v73_v19 = vld [vmem:[%s6671_s0 + $0x7c] sm:$0x3]  ;;  %v136_v12 = vld [vmem:[%s6671_s0 + $0xfa] sm:$0x3] }
  0x6d   :  { %v199_v53 = vld [vmem:[%s6671_s0 + $0x178] sm:$0x3]  ;;  %v680_v61 = vsel %vm267_vm0, %v104_v52, -inf  ;;  %v602_v17 = vmax.f32 %v600_v11, %v3891_v62  ;;  %v657_v46 = vsel %vm267_vm0, %v167_v9, -inf  ;;  %v702_v20 = vsel %vm267_vm0, %v25_v55, -inf }
  0x6e   :  { %v679_v3 = vmax.f32 %v677_v33, %v678_v32  ;;  %v215_v44 = vld [vmem:[%s6671_s0 + $0x198] sm:$0x3]  ;;  %v656_v34 = vmax.f32 %v654_v54, %v655_v51  ;;  %v682_v38 = vsel %vm267_vm0, %v120_v45, -inf  ;;  %v703_v52 = vsel %vm267_vm0, %v41_v28, -inf  ;;  %v89_v62 = vld [vmem:[%s6671_s0 + $0x9c] sm:$0x3] }
  0x6f   :  { %v705_v50 = vsel %vm267_vm0, %v57_v47, -inf  ;;  %v152_v11 = vld [vmem:[%s6671_s0 + $0x11a] sm:$0x3]  ;;  %v659_v55 = vsel %vm267_vm0, %v183_v13, -inf  ;;  %v661_v9 = vsel %vm267_vm0, %v199_v53, -inf  ;;  %v704_v32 = vmax.f32 %v702_v20, %v703_v52 }
  0x70   :  { %v681_v6 = vmax.f32 %v679_v3, %v680_v61  ;;  %v26_v28 = vld [vmem:[%s6671_s0 + $0x1e] sm:$0x3]  ;;  %v231_v47 = vld [vmem:[%s6671_s0 + $0x1b8] sm:$0x3]  ;;  %v631_v51 = vmax.f32 %v629_v58, %v3940_v14  ;;  %v658_v33 = vmax.f32 %v656_v34, %v657_v46  ;;  %v684_v13 = vsel %vm267_vm0, %v136_v12, -inf }
  0x71   :  { %v247_v45 = vld [vmem:[%s6671_s0 + $0x1d8] sm:$0x3]  ;;  %v707_v53 = vsel %vm267_vm0, %v73_v19, -inf  ;;  %v105_v54 = vld [vmem:[%s6671_s0 + $0xbc] sm:$0x3]  ;;  %v604_v3 = vmax.f32 %v602_v17, %v3894_v36  ;;  %v663_v20 = vsel %vm267_vm0, %v215_v44, -inf  ;;  %v706_v25 = vmax.f32 %v704_v32, %v705_v50 }
  0x72   :  { %v168_v61 = vld [vmem:[%s6671_s0 + $0x13a] sm:$0x3]  ;;  %v683_v52 = vmax.f32 %v681_v6, %v682_v38  ;;  %v42_v14 = vld [vmem:[%s6671_s0 + $0x3e] sm:$0x3]  ;;  %v577_v19 = vmax.f32 %v3993_v31, %v3836_v40  ;;  %v660_v12 = vmax.f32 %v658_v33, %v659_v55  ;;  %v686_v46 = vsel %vm267_vm0, %v152_v11, -inf }
  0x73   :  { %v58_v58 = vld [vmem:[%s6671_s0 + $0x5e] sm:$0x3]  ;;  %v709_v36 = vsel %vm267_vm0, %v89_v62, -inf  ;;  %v121_v17 = vld [vmem:[%s6671_s0 + $0xdc] sm:$0x3]  ;;  %v4056_v34 = vsel %vm267_vm0, %v231_v47, -inf  ;;  %v708_v55 = vmax.f32 %v706_v25, %v707_v53  ;;  %v633_v6 = vmax.f32 %v631_v51, %v632_v1 }
  0x74   :  { %v184_v44 = vld [vmem:[%s6671_s0 + $0x15a] sm:$0x3]  ;;  %v4059_v38 = vsel %vm267_vm0, %v247_v45, -inf  ;;  %v685_v50 = vmax.f32 %v683_v52, %v684_v13  ;;  %v74_v62 = vld [vmem:[%s6671_s0 + $0x7e] sm:$0x3]  ;;  %v662_v32 = vmax.f32 %v660_v12, %v661_v9  ;;  %v688_v33 = vsel %vm267_vm0, %v168_v61, -inf }
  0x75   :  { %v200_v11 = vld [vmem:[%s6671_s0 + $0x17a] sm:$0x3]  ;;  %v711_v47 = vsel %vm267_vm0, %v105_v54, -inf  ;;  %v90_v45 = vld [vmem:[%s6671_s0 + $0x9e] sm:$0x3]  ;;  %v4076_v13 = vmax.f32 %v604_v3, %v3900_v41  ;;  %v710_v52 = vmax.f32 %v708_v55, %v709_v36  ;;  %v733_v1 = vsel %vm267_vm0, %v26_v28, -inf }
  0x76   :  { %v137_v25 = vld [vmem:[%s6671_s0 + $0xfc] sm:$0x3]  ;;  %v687_v53 = vmax.f32 %v685_v50, %v686_v46  ;;  %v263_v9 = vld [vmem:[%s6671_s0 + $0x1f8] sm:$0x3]  ;;  %v690_v51 = vsel %vm267_vm0, %v184_v44, -inf  ;;  %v713_v54 = vsel %vm267_vm0, %v121_v17, -inf  ;;  %v664_v44 = vmax.f32 %v662_v32, %v663_v20 }
  0x77   :  { %v734_v61 = vsel %vm267_vm0, %v42_v14, -inf  ;;  %v736_v12 = vsel %vm267_vm0, %v58_v58, -inf  ;;  %v153_v41 = vld [vmem:[%s6671_s0 + $0x11c] sm:$0x3]  ;;  %v216_v28 = vld [vmem:[%s6671_s0 + $0x19a] sm:$0x3]  ;;  %v712_v36 = vmax.f32 %v710_v52, %v711_v47  ;;  %v635_v58 = vmax.f32 %v633_v6, %v3973_v0 }
  0x78   :  { %v689_v3 = vmax.f32 %v687_v53, %v688_v33  ;;  %v692_v46 = vsel %vm267_vm0, %v200_v11, -inf  ;;  %v735_v50 = vmax.f32 %v733_v1, %v734_v61  ;;  %v106_v17 = vld [vmem:[%s6671_s0 + $0xbe] sm:$0x3]  ;;  %v232_v14 = vld [vmem:[%s6671_s0 + $0x1ba] sm:$0x3]  ;;  %v715_v55 = vsel %vm267_vm0, %v137_v25, -inf }
  0x79   :  { %v738_v8 = vsel %vm267_vm0, %v74_v62, -inf  ;;  %v122_v11 = vld [vmem:[%s6671_s0 + $0xde] sm:$0x3]  ;;  %v169_v33 = vld [vmem:[%s6671_s0 + $0x13c] sm:$0x3]  ;;  %v4112_v53 = vsel %vm267_vm0, %v263_v9, -inf  ;;  %v714_v20 = vmax.f32 %v712_v36, %v713_v54  ;;  %v608_v32 = vmax.f32 %v4076_v13, %v3903_v43 }
  0x7a   :  { %v185_v47 = vld [vmem:[%s6671_s0 + $0x15c] sm:$0x3]  ;;  %v691_v0 = vmax.f32 %v689_v3, %v690_v51  ;;  %v737_v6 = vmax.f32 %v735_v50, %v736_v12  ;;  %v248_v62 = vld [vmem:[%s6671_s0 + $0x1da] sm:$0x3]  ;;  %v694_v25 = vsel %vm267_vm0, %v216_v28, -inf  ;;  %v717_v52 = vsel %vm267_vm0, %v153_v41, -inf }
  0x7b   :  { %v740_v1 = vsel %vm267_vm0, %v90_v45, -inf  ;;  %v201_v9 = vld [vmem:[%s6671_s0 + $0x17c] sm:$0x3]  ;;  %v264_v51 = vld [vmem:[%s6671_s0 + $0x1fa] sm:$0x3]  ;;  %v696_v61 = vsel %vm267_vm0, %v232_v14, -inf  ;;  %v716_v12 = vmax.f32 %v714_v20, %v715_v55  ;;  %v4136_v41 = vmax.f32 %v635_v58, %v3980_v10 }
  0x7c   :  { %v693_v54 = vmax.f32 %v691_v0, %v692_v46  ;;  %v739_v3 = vmax.f32 %v737_v6, %v738_v8  ;;  %v138_v28 = vld [vmem:[%s6671_s0 + $0xfe] sm:$0x3]  ;;  %v217_v45 = vld [vmem:[%s6671_s0 + $0x19c] sm:$0x3]  ;;  %v666_v36 = vmax.f32 %v664_v44, %v4056_v34  ;;  %v719_v50 = vsel %vm267_vm0, %v169_v33, -inf }
  0x7d   :  { %v742_v46 = vsel %vm267_vm0, %v106_v17, -inf  ;;  %v233_v8 = vld [vmem:[%s6671_s0 + $0x1bc] sm:$0x3]  ;;  %v698_v0 = vsel %vm267_vm0, %v248_v62, -inf  ;;  %v718_v20 = vmax.f32 %v716_v12, %v717_v52  ;;  %v4152_v58 = vsel %vm267_vm0, %v264_v51, -inf }
  0x7e   :  { %v249_v14 = vld [vmem:[%s6671_s0 + $0x1dc] sm:$0x3]  ;;  %v695_v55 = vmax.f32 %v693_v54, %v694_v25  ;;  %v741_v10 = vmax.f32 %v739_v3, %v740_v1  ;;  %v721_v17 = vsel %vm267_vm0, %v185_v47, -inf  ;;  %v723_v44 = vsel %vm267_vm0, %v201_v9, -inf  ;;  %v154_v6 = vld [vmem:[%s6671_s0 + $0x11e] sm:$0x3] }
  0x7f   :  { %v265_v34 = vld [vmem:[%s6671_s0 + $0x1fc] sm:$0x3]  ;;  %v744_v33 = vsel %vm267_vm0, %v122_v11, -inf  ;;  %v720_v25 = vmax.f32 %v718_v20, %v719_v50  ;;  %v725_v52 = vsel %vm267_vm0, %v217_v45, -inf  ;;  %v170_v51 = vld [vmem:[%s6671_s0 + $0x13e] sm:$0x3]  ;;  %v639_v47 = vmax.f32 %v4136_v41, %v3983_v37 }
  0x80   :  { %v697_v62 = vmax.f32 %v695_v55, %v696_v61  ;;  %v743_v1 = vmax.f32 %v741_v10, %v742_v46  ;;  %v668_v9 = vmax.f32 %v666_v36, %v4059_v38  ;;  %v727_v11 = vsel %vm267_vm0, %v233_v8, -inf  ;;  %v186_v61 = vld [vmem:[%s6671_s0 + $0x15e] sm:$0x3]  ;;  %v801_v48 = vld [vmem:[%s6671_s0] sm:$0x3] }
  0x81   :  { %v746_v54 = vsel %vm267_vm0, %v138_v28, -inf  ;;  %v202_v12 = vld [vmem:[%s6671_s0 + $0x17e] sm:$0x3]  ;;  %v722_v3 = vmax.f32 %v720_v25, %v721_v17  ;;  %v729_v45 = vsel %vm267_vm0, %v249_v14, -inf  ;;  %v4177_v50 = vsel %vm267_vm0, %v265_v34, -inf }
  0x82   :  { %v745_v46 = vmax.f32 %v743_v1, %v744_v33  ;;  %v699_v38 = vmax.f32 %v697_v62, %v698_v0  ;;  %v748_v36 = vsel %vm267_vm0, %v154_v6, -inf  ;;  %v764_v28 = vsel %vm267_vm0, %v298_v27, -inf  ;;  %v809_v2 = vld [vmem:[%s6671_s0 + $0x20] sm:$0x3]  ;;  %v802_v49 = vld [vmem:[%s6671_s0 + $0x2] sm:$0x3] }
  0x83   :  { %v768_v8 = vsel %vm267_vm0, %v422_v59, -inf  ;;  %v724_v55 = vmax.f32 %v722_v3, %v723_v44  ;;  %v765_v14 = vsel %vm267_vm0, %v329_v23, -inf  ;;  %v770_v0 = vsel %vm267_vm0, %v453_v5, -inf  ;;  %v218_v23 = vld [vmem:[%s6671_s0 + $0x19e] sm:$0x3] }
  0x84   :  { %v747_v20 = vmax.f32 %v745_v46, %v746_v54  ;;  %v670_v27 = vmax.f32 %v668_v9, %v4112_v53  ;;  %v750_v15 = vsel %vm267_vm0, %v170_v51, -inf  ;;  %v752_v29 = vsel %vm267_vm0, %v186_v61, -inf  ;;  %v817_v5 = vld [vmem:[%s6671_s0 + $0x40] sm:$0x3]  ;;  %v234_v44 = vld [vmem:[%s6671_s0 + $0x1be] sm:$0x3] }
  0x85   :  { %v754_v63 = vsel %vm267_vm0, %v202_v12, -inf  ;;  %v726_v18 = vmax.f32 %v724_v55, %v725_v52  ;;  %v769_v59 = vmax.f32 %v764_v28, %v768_v8  ;;  %v776_v26 = vsel %vm267_vm0, %v546_v21, -inf  ;;  %v810_v40 = vld [vmem:[%s6671_s0 + $0x22] sm:$0x3]  ;;  %v825_v4 = vld [vmem:[%s6671_s0 + $0x60] sm:$0x3] }
  0x86   :  { %v749_v42 = vmax.f32 %v747_v20, %v748_v36  ;;  %v701_v53 = vmax.f32 %v699_v38, %v4152_v58  ;;  %v771_v10 = vmax.f32 %v765_v14, %v770_v0  ;;  %v865_v34 = vsel %vm267_vm0, %v801_v48, -inf  ;;  %v266_v22 = vld [vmem:[%s6671_s0 + $0x1fe] sm:$0x3]  ;;  %v803_v16 = vld [vmem:[%s6671_s0 + $0x4] sm:$0x3] }
  0x87   :  { %v866_v17 = vsel %vm267_vm0, %v809_v2, -inf  ;;  %v728_v33 = vmax.f32 %v726_v18, %v727_v11  ;;  %v778_v7 = vsel %vm267_vm0, %v577_v19, -inf  ;;  %v756_v58 = vsel %vm267_vm0, %v218_v23, -inf  ;;  %v250_v19 = vld [vmem:[%s6671_s0 + $0x1de] sm:$0x3] }
  0x88   :  { %v751_v6 = vmax.f32 %v749_v42, %v750_v15  ;;  %v867_v21 = vmax.f32 %v865_v34, %v866_v17  ;;  %v766_v62 = vsel %vm267_vm0, %v360_v60, -inf  ;;  %v767_v25 = vsel %vm267_vm0, %v391_v35, -inf  ;;  %v818_v46 = vld [vmem:[%s6671_s0 + $0x42] sm:$0x3]  ;;  %v811_v20 = vld [vmem:[%s6671_s0 + $0x24] sm:$0x3] }
  0x89   :  { %v868_v31 = vsel %vm267_vm0, %v817_v5, -inf  ;;  %v730_v52 = vmax.f32 %v728_v33, %v729_v45  ;;  %v772_v24 = vsel %vm267_vm0, %v6675_v56, -inf  ;;  %v774_v60 = vsel %vm267_vm0, %v6676_v30, -inf  ;;  %v833_v14 = vld [vmem:[%s6671_s0 + $0x80] sm:$0x3] }
  0x8a   :  { %v753_v1 = vmax.f32 %v751_v6, %v752_v29  ;;  %v777_v35 = vmax.f32 %v769_v59, %v776_v26  ;;  %v779_v51 = vmax.f32 %v771_v10, %v778_v7  ;;  %v784_v9 = vsel %vm267_vm0, %v670_v27, -inf  ;;  %v804_v43 = vld [vmem:[%s6671_s0 + $0x6] sm:$0x3]  ;;  %v841_v13 = vld [vmem:[%s6671_s0 + $0xa0] sm:$0x3] }
  0x8b   :  { %v786_v11 = vsel %vm267_vm0, %v701_v53, -inf  ;;  %v869_v39 = vmax.f32 %v867_v21, %v868_v31  ;;  %v880_v54 = vsel %vm267_vm0, %v802_v49, -inf  ;;  %v881_v61 = vsel %vm267_vm0, %v810_v40, -inf  ;;  %v812_v37 = vld [vmem:[%s6671_s0 + $0x26] sm:$0x3] }
  0x8c   :  { %v755_v57 = vmax.f32 %v753_v1, %v754_v63  ;;  %v758_v12 = vsel %vm267_vm0, %v234_v44, -inf  ;;  %v760_v3 = vsel %vm267_vm0, %v250_v19, -inf  ;;  %v773_v45 = vmax.f32 %v766_v62, %v772_v24  ;;  %v826_v41 = vld [vmem:[%s6671_s0 + $0x62] sm:$0x3]  ;;  %v819_v63 = vld [vmem:[%s6671_s0 + $0x44] sm:$0x3] }
  0x8d   :  { %v870_v38 = vsel %vm267_vm0, %v825_v4, -inf  ;;  %v732_v36 = vmax.f32 %v730_v52, %v4177_v50  ;;  %v775_v8 = vmax.f32 %v767_v25, %v774_v60  ;;  %v780_v55 = vsel %vm267_vm0, %v608_v32, -inf  ;;  %v849_v53 = vld [vmem:[%s6671_s0 + $0xc0] sm:$0x3]  ;;  %v805_v44 = vld [vmem:[%s6671_s0 + $0x8] sm:$0x3] }
  0x8e   :  { %v757_v28 = vmax.f32 %v755_v57, %v756_v58  ;;  %v782_v50 = vsel %vm267_vm0, %v639_v47, -inf  ;;  %v785_v0 = vmax.f32 %v777_v35, %v784_v9  ;;  %v787_v48 = vmax.f32 %v779_v51, %v786_v11  ;;  %v857_v10 = vld [vmem:[%s6671_s0 + $0xe0] sm:$0x3]  ;;  %v813_v33 = vld [vmem:[%s6671_s0 + $0x28] sm:$0x3] }
  0x8f   :  { %v882_v32 = vmax.f32 %v880_v54, %v881_v61  ;;  %v762_v27 = vsel %vm267_vm0, %v266_v22, -inf  ;;  %v871_v47 = vmax.f32 %v869_v39, %v870_v38  ;;  %v883_v15 = vsel %vm267_vm0, %v818_v46, -inf  ;;  %v834_v6 = vld [vmem:[%s6671_s0 + $0x82] sm:$0x3]  ;;  %v820_v25 = vld [vmem:[%s6671_s0 + $0x46] sm:$0x3] }
  0x90   :  { %v759_v2 = vmax.f32 %v757_v28, %v758_v12  ;;  %v781_v29 = vmax.f32 %v773_v45, %v780_v55  ;;  %v872_v23 = vsel %vm267_vm0, %v833_v14, -inf  ;;  %v895_v18 = vsel %vm267_vm0, %v803_v16, -inf  ;;  %v842_v7 = vld [vmem:[%s6671_s0 + $0xa2] sm:$0x3]  ;;  %v821_v56 = vld [vmem:[%s6671_s0 + $0x48] sm:$0x3] }
  0x91   :  { %v896_v42 = vsel %vm267_vm0, %v811_v20, -inf  ;;  %v783_v26 = vmax.f32 %v775_v8, %v782_v50  ;;  %v788_v5 = vsel %vm267_vm0, %v732_v36, -inf  ;;  %v4315_v34 = vsel %vm267_vm0, %v841_v13, -inf  ;;  %v850_v40 = vld [vmem:[%s6671_s0 + $0xc2] sm:$0x3] }
  0x92   :  { %v761_v59 = vmax.f32 %v759_v2, %v760_v3  ;;  %v792_v17 = vmax.f32 %v785_v0, %v787_v48  ;;  %v884_v49 = vmax.f32 %v882_v32, %v883_v15  ;;  %v885_v21 = vsel %vm267_vm0, %v826_v41, -inf  ;;  %v827_v24 = vld [vmem:[%s6671_s0 + $0x64] sm:$0x3]  ;;  %v858_v51 = vld [vmem:[%s6671_s0 + $0xe2] sm:$0x3] }
  0x93   :  { %v910_v58 = vsel %vm267_vm0, %v804_v43, -inf  ;;  %v873_v31 = vmax.f32 %v871_v47, %v872_v23  ;;  %v897_v19 = vmax.f32 %v895_v18, %v896_v42  ;;  %v911_v52 = vsel %vm267_vm0, %v812_v37, -inf  ;;  %v806_v16 = vld [vmem:[%s6671_s0 + $0xa] sm:$0x3]  ;;  %v829_v39 = vld [vmem:[%s6671_s0 + $0x68] sm:$0x3] }
  0x94   :  { %v763_v62 = vmax.f32 %v761_v59, %v762_v27  ;;  %v789_v1 = vmax.f32 %v781_v29, %v788_v5  ;;  %v876_v30 = vsel %vm267_vm0, %v849_v53, -inf  ;;  %v4346_v60 = vsel %vm267_vm0, %v857_v10, -inf  ;;  %v835_v54 = vld [vmem:[%s6671_s0 + $0x84] sm:$0x3]  ;;  %v814_v45 = vld [vmem:[%s6671_s0 + $0x2a] sm:$0x3] }
  0x95   :  { %v898_v4 = vsel %vm267_vm0, %v819_v63, -inf  ;;  %v887_v9 = vsel %vm267_vm0, %v834_v6, -inf  ;;  %v4355_v11 = vsel %vm267_vm0, %v842_v7, -inf  ;;  %v912_v22 = vmax.f32 %v910_v58, %v911_v52  ;;  %v828_v46 = vld [vmem:[%s6671_s0 + $0x66] sm:$0x3] }
  0x96   :  { %v790_v35 = vsel %vm267_vm0, %v763_v62, -inf  ;;  %v886_v61 = vmax.f32 %v884_v49, %v885_v21  ;;  %v4367_v12 = vsel %vm267_vm0, %v850_v40, -inf  ;;  %v913_v3 = vsel %vm267_vm0, %v820_v25, -inf  ;;  %v822_v20 = vld [vmem:[%s6671_s0 + $0x4a] sm:$0x3] }
  0x97   :  { %v791_v57 = vmax.f32 %v783_v26, %v790_v35  ;;  %v875_v38 = vmax.f32 %v873_v31, %v4315_v34  ;;  %v899_v36 = vmax.f32 %v897_v19, %v898_v4  ;;  %v925_v28 = vsel %vm267_vm0, %v805_v44, -inf  ;;  %v843_v14 = vld [vmem:[%s6671_s0 + $0xa4] sm:$0x3]  ;;  %v830_v43 = vld [vmem:[%s6671_s0 + $0x6a] sm:$0x3] }
  0x98   :  { %v926_v8 = vsel %vm267_vm0, %v813_v33, -inf  ;;  %v4386_v50 = vsel %vm267_vm0, %v858_v51, -inf  ;;  %v900_v0 = vsel %vm267_vm0, %v827_v24, -inf  ;;  %v851_v13 = vld [vmem:[%s6671_s0 + $0xc4] sm:$0x3]  ;;  %v902_v32 = vsel %vm267_vm0, %v835_v54, -inf }
  0x99   :  { %v793_v55 = vmax.f32 %v789_v1, %v791_v57  ;;  %v927_v48 = vmax.f32 %v925_v28, %v926_v8  ;;  %v914_v2 = vmax.f32 %v912_v22, %v913_v3  ;;  %v928_v27 = vsel %vm267_vm0, %v821_v56, -inf  ;;  %v807_v47 = vld [vmem:[%s6671_s0 + $0xc] sm:$0x3]  ;;  %v836_v29 = vld [vmem:[%s6671_s0 + $0x86] sm:$0x3] }
  0x9a   :  { %v930_v37 = vsel %vm267_vm0, %v829_v39, -inf  ;;  %v815_v15 = vld [vmem:[%s6671_s0 + $0x2c] sm:$0x3]  ;;  %v837_v63 = vld [vmem:[%s6671_s0 + $0x88] sm:$0x3]  ;;  %v4410_v23 = vmax.f32 %v886_v61, %v887_v9  ;;  %v915_v18 = vsel %vm267_vm0, %v828_v46, -inf  ;;  %v4422_v53 = vmax.f32 %v875_v38, %v876_v30 }
  0x9b   :  { %v794_v41 = vmax.f32 %v792_v17, %v793_v55  ;;  %v929_v42 = vmax.f32 %v927_v48, %v928_v27  ;;  %v823_v59 = vld [vmem:[%s6671_s0 + $0x4c] sm:$0x3]  ;;  %v838_v26 = vld [vmem:[%s6671_s0 + $0x8a] sm:$0x3]  ;;  %v859_v5 = vld [vmem:[%s6671_s0 + $0xe4] sm:$0x3]  ;;  %v901_v10 = vmax.f32 %v899_v36, %v900_v0  ;;  %v916_v62 = vmax.f32 %v914_v2, %v915_v18 }
  0x9c   :  { %v940_v34 = vsel %vm267_vm0, %v806_v16, -inf  ;;  %v941_v17 = vsel %vm267_vm0, %v814_v45, -inf  ;;  %v831_v33 = vld [vmem:[%s6671_s0 + $0x6c] sm:$0x3]  ;;  %v4434_v6 = vsel %vm267_vm0, %v843_v14, -inf  ;;  %v4437_v7 = vsel %vm267_vm0, %v851_v13, -inf }
  0x9d   :  { %v796_v44 = vrot.slane %v794_v41, 1  ;;  %799 = vst.msk [vmem:[%s6672_s1] sm:$0x1] %vm798_vm1, %v794_v41  ;;  %v931_v49 = vmax.f32 %v929_v42, %v930_v37  ;;  %v839_v21 = vld [vmem:[%s6671_s0 + $0x8c] sm:$0x3]  ;;  %v932_v25 = vsel %vm267_vm0, %v837_v63, -inf  ;;  %v942_v40 = vmax.f32 %v940_v34, %v941_v17 }
  0x9e   :  { %v845_v58 = vld [vmem:[%s6671_s0 + $0xa8] sm:$0x3]  ;;  %v943_v31 = vsel %vm267_vm0, %v822_v20, -inf  ;;  %v808_v19 = vld [vmem:[%s6671_s0 + $0xe] sm:$0x3]  ;;  %v890_v52 = vmax.f32 %v4410_v23, %v4355_v11  ;;  %v4457_v1 = vsel %vm267_vm0, %v859_v5, -inf  ;;  %v903_v35 = vmax.f32 %v901_v10, %v902_v32 }
  0x9f   :  { %800 = vst.msk [vmem:[%s6672_s1 + $0x1] sm:$0x1] %vm798_vm1, %v796_v44  ;;  %v917_v56 = vsel %vm267_vm0, %v836_v29, -inf  ;;  %v945_v24 = vsel %vm267_vm0, %v830_v43, -inf  ;;  %v844_v30 = vld [vmem:[%s6671_s0 + $0xa6] sm:$0x3]  ;;  %v944_v51 = vmax.f32 %v942_v40, %v943_v31  ;;  %v933_v16 = vmax.f32 %v931_v49, %v932_v25 }
  0xa0   :  { %v846_v4 = vld [vmem:[%s6671_s0 + $0xaa] sm:$0x3]  ;;  %v955_v9 = vsel %vm267_vm0, %v807_v47, -inf  ;;  %v956_v11 = vsel %vm267_vm0, %v815_v15, -inf  ;;  %v816_v22 = vld [vmem:[%s6671_s0 + $0x2e] sm:$0x3]  ;;  %v918_v46 = vmax.f32 %v916_v62, %v917_v56  ;;  %v905_v41 = vmax.f32 %v903_v35, %v4434_v6 }
  0xa1   :  { %v824_v57 = vld [vmem:[%s6671_s0 + $0x4e] sm:$0x3]  ;;  %v947_v39 = vsel %vm267_vm0, %v838_v26, -inf  ;;  %v957_v54 = vmax.f32 %v955_v9, %v956_v11  ;;  %v958_v61 = vsel %vm267_vm0, %v823_v59, -inf  ;;  %v847_v45 = vld [vmem:[%s6671_s0 + $0xac] sm:$0x3]  ;;  %v946_v36 = vmax.f32 %v944_v51, %v945_v24 }
  0xa2   :  { %v832_v3 = vld [vmem:[%s6671_s0 + $0x6e] sm:$0x3]  ;;  %v934_v38 = vsel %vm267_vm0, %v845_v58, -inf  ;;  %v960_v28 = vsel %vm267_vm0, %v831_v33, -inf  ;;  %v853_v8 = vld [vmem:[%s6671_s0 + $0xc8] sm:$0x3]  ;;  %v892_v58 = vmax.f32 %v890_v52, %v4367_v12  ;;  %v4532_v40 = vmax.f32 %v905_v41, %v4437_v7 }
  0xa3   :  { %v919_v55 = vsel %vm267_vm0, %v844_v30, -inf  ;;  %v949_v20 = vsel %vm267_vm0, %v846_v4, -inf  ;;  %v959_v14 = vmax.f32 %v957_v54, %v958_v61  ;;  %v962_v0 = vsel %vm267_vm0, %v839_v21, -inf  ;;  %v854_v48 = vld [vmem:[%s6671_s0 + $0xca] sm:$0x3] }
  0xa4   :  { %v948_v43 = vmax.f32 %v946_v36, %v947_v39  ;;  %v970_v13 = vsel %vm267_vm0, %v808_v19, -inf  ;;  %v971_v32 = vsel %vm267_vm0, %v816_v22, -inf  ;;  %v973_v2 = vsel %vm267_vm0, %v824_v57, -inf  ;;  %v840_v27 = vld [vmem:[%s6671_s0 + $0x8e] sm:$0x3] }
  0xa5   :  { %v852_v37 = vld [vmem:[%s6671_s0 + $0xc6] sm:$0x3]  ;;  %v935_v47 = vmax.f32 %v933_v16, %v934_v38  ;;  %v961_v15 = vmax.f32 %v959_v14, %v960_v28  ;;  %v972_v29 = vmax.f32 %v970_v13, %v971_v32  ;;  %v848_v63 = vld [vmem:[%s6671_s0 + $0xae] sm:$0x3]  ;;  %v861_v23 = vld [vmem:[%s6671_s0 + $0xe8] sm:$0x3]  ;;  %v920_v18 = vmax.f32 %v918_v46, %v919_v55 }
  0xa6   :  { %v936_v42 = vsel %vm267_vm0, %v853_v8, -inf  ;;  %v950_v59 = vmax.f32 %v948_v43, %v949_v20  ;;  %v975_v26 = vsel %vm267_vm0, %v832_v3, -inf  ;;  %v855_v5 = vld [vmem:[%s6671_s0 + $0xcc] sm:$0x3]  ;;  %v951_v10 = vsel %vm267_vm0, %v854_v48, -inf }
  0xa7   :  { %v963_v34 = vmax.f32 %v961_v15, %v962_v0  ;;  %v964_v17 = vsel %vm267_vm0, %v847_v45, -inf  ;;  %v974_v44 = vmax.f32 %v972_v29, %v973_v2  ;;  %v2531_v33 = vld [vmem:[%s6671_s0 + $0x10] sm:$0x3]  ;;  %v860_v6 = vld [vmem:[%s6671_s0 + $0xe6] sm:$0x3]  ;;  %v879_v21 = vmax.f32 %v4422_v53, %v4346_v60 }
  0xa8   :  { %v862_v49 = vld [vmem:[%s6671_s0 + $0xea] sm:$0x3]  ;;  %v921_v62 = vsel %vm267_vm0, %v852_v37, -inf  ;;  %v977_v25 = vsel %vm267_vm0, %v840_v27, -inf  ;;  %v937_v31 = vmax.f32 %v935_v47, %v936_v42  ;;  %v938_v19 = vsel %vm267_vm0, %v861_v23, -inf }
  0xa9   :  { %v976_v56 = vmax.f32 %v974_v44, %v975_v26  ;;  %v2539_v24 = vld [vmem:[%s6671_s0 + $0x30] sm:$0x3]  ;;  %v856_v12 = vld [vmem:[%s6671_s0 + $0xce] sm:$0x3]  ;;  %v863_v53 = vld [vmem:[%s6671_s0 + $0xec] sm:$0x3]  ;;  %v952_v7 = vmax.f32 %v950_v59, %v951_v10  ;;  %v965_v52 = vmax.f32 %v963_v34, %v964_v17  ;;  %v922_v35 = vmax.f32 %v920_v18, %v921_v62 }
  0xaa   :  { %v2547_v60 = vld [vmem:[%s6671_s0 + $0x50] sm:$0x3]  ;;  %v979_v30 = vsel %vm267_vm0, %v848_v63, -inf  ;;  %v1065_v4 = vsel %vm267_vm0, %v2531_v33, -inf  ;;  %v953_v51 = vsel %vm267_vm0, %v862_v49, -inf  ;;  %v966_v9 = vsel %vm267_vm0, %v855_v5, -inf }
  0xab   :  { %v978_v11 = vmax.f32 %v976_v56, %v977_v25  ;;  %v2532_v22 = vld [vmem:[%s6671_s0 + $0x12] sm:$0x3]  ;;  %v2555_v57 = vld [vmem:[%s6671_s0 + $0x70] sm:$0x3]  ;;  %v894_v16 = vmax.f32 %v892_v58, %v4386_v50  ;;  %v923_v39 = vsel %vm267_vm0, %v860_v6, -inf  ;;  %v1066_v61 = vsel %vm267_vm0, %v2539_v24, -inf }
  0xac   :  { %v2563_v54 = vld [vmem:[%s6671_s0 + $0x90] sm:$0x3]  ;;  %v1068_v3 = vsel %vm267_vm0, %v2547_v60, -inf  ;;  %v909_v45 = vmax.f32 %v4532_v40, %v4457_v1  ;;  %v981_v38 = vsel %vm267_vm0, %v856_v12, -inf  ;;  %v2540_v50 = vld [vmem:[%s6671_s0 + $0x32] sm:$0x3]  ;;  %v1067_v28 = vmax.f32 %v1065_v4, %v1066_v61 }
  0xad   :  { %v980_v46 = vmax.f32 %v978_v11, %v979_v30  ;;  %v2548_v36 = vld [vmem:[%s6671_s0 + $0x52] sm:$0x3]  ;;  %v864_v8 = vld [vmem:[%s6671_s0 + $0xee] sm:$0x3]  ;;  %v939_v55 = vmax.f32 %v937_v31, %v938_v19  ;;  %v954_v20 = vmax.f32 %v952_v7, %v953_v51  ;;  %v967_v14 = vmax.f32 %v965_v52, %v966_v9  ;;  %v2533_v43 = vld [vmem:[%s6671_s0 + $0x14] sm:$0x3] }
  0xae   :  { %v1070_v1 = vsel %vm267_vm0, %v2555_v57, -inf  ;;  %v924_v0 = vmax.f32 %v922_v35, %v923_v39  ;;  %v968_v48 = vsel %vm267_vm0, %v863_v53, -inf  ;;  %v1069_v13 = vmax.f32 %v1067_v28, %v1068_v3  ;;  %v2556_v27 = vld [vmem:[%s6671_s0 + $0x72] sm:$0x3]  ;;  %v2541_v63 = vld [vmem:[%s6671_s0 + $0x34] sm:$0x3] }
  0xaf   :  { %v1072_v32 = vsel %vm267_vm0, %v2563_v54, -inf  ;;  %v982_v2 = vmax.f32 %v980_v46, %v981_v38  ;;  %v1080_v37 = vsel %vm267_vm0, %v2532_v22, -inf  ;;  %v1081_v41 = vsel %vm267_vm0, %v2540_v50, -inf  ;;  %v2571_v23 = vld [vmem:[%s6671_s0 + $0xb0] sm:$0x3] }
  0xb0   :  { %v1083_v47 = vsel %vm267_vm0, %v2548_v36, -inf  ;;  %v983_v15 = vsel %vm267_vm0, %v864_v8, -inf  ;;  %v985_v29 = vsel %vm267_vm0, %v879_v21, -inf  ;;  %v1071_v18 = vmax.f32 %v1069_v13, %v1070_v1  ;;  %v2534_v34 = vld [vmem:[%s6671_s0 + $0x16] sm:$0x3] }
  0xb1   :  { %v1082_v42 = vmax.f32 %v1080_v37, %v1081_v41  ;;  %v969_v59 = vmax.f32 %v967_v14, %v968_v48  ;;  %v986_v26 = vsel %vm267_vm0, %v894_v16, -inf  ;;  %v989_v5 = vsel %vm267_vm0, %v939_v55, -inf  ;;  %v2542_v17 = vld [vmem:[%s6671_s0 + $0x36] sm:$0x3]  ;;  %v2549_v44 = vld [vmem:[%s6671_s0 + $0x54] sm:$0x3] }
  0xb2   :  { %v991_v10 = vsel %vm267_vm0, %v954_v20, -inf  ;;  %v2579_v33 = vld [vmem:[%s6671_s0 + $0xd0] sm:$0x3]  ;;  %v1073_v6 = vmax.f32 %v1071_v18, %v1072_v32  ;;  %v1085_v21 = vsel %vm267_vm0, %v2556_v27, -inf  ;;  %v984_v58 = vmax.f32 %v982_v2, %v983_v15  ;;  %v2564_v62 = vld [vmem:[%s6671_s0 + $0x92] sm:$0x3] }
  0xb3   :  { %v1084_v49 = vmax.f32 %v1082_v42, %v1083_v47  ;;  %v1074_v25 = vsel %vm267_vm0, %v2571_v23, -inf  ;;  %v1095_v40 = vsel %vm267_vm0, %v2533_v43, -inf  ;;  %v1096_v31 = vsel %vm267_vm0, %v2541_v63, -inf  ;;  %v2550_v60 = vld [vmem:[%s6671_s0 + $0x56] sm:$0x3] }
  0xb4   :  { %v4619_v19 = vsel %vm267_vm0, %v909_v45, -inf  ;;  %v990_v56 = vmax.f32 %v985_v29, %v989_v5  ;;  %v992_v24 = vmax.f32 %v986_v26, %v991_v10  ;;  %v2587_v12 = vld [vmem:[%s6671_s0 + $0xf0] sm:$0x3]  ;;  %v4628_v53 = vsel %vm267_vm0, %v924_v0, -inf  ;;  %v2535_v52 = vld [vmem:[%s6671_s0 + $0x18] sm:$0x3] }
  0xb5   :  { %v4631_v7 = vsel %vm267_vm0, %v969_v59, -inf  ;;  %v2572_v30 = vld [vmem:[%s6671_s0 + $0xb2] sm:$0x3]  ;;  %v1076_v4 = vsel %vm267_vm0, %v2579_v33, -inf  ;;  %v1086_v35 = vmax.f32 %v1084_v49, %v1085_v21  ;;  %v2543_v51 = vld [vmem:[%s6671_s0 + $0x38] sm:$0x3]  ;;  %v1075_v57 = vmax.f32 %v1073_v6, %v1074_v25 }
  0xb6   :  { %v2551_v9 = vld [vmem:[%s6671_s0 + $0x58] sm:$0x3]  ;;  %v2580_v11 = vld [vmem:[%s6671_s0 + $0xd2] sm:$0x3]  ;;  %v1087_v16 = vsel %vm267_vm0, %v2564_v62, -inf  ;;  %v1097_v39 = vmax.f32 %v1095_v40, %v1096_v31  ;;  %v1110_v54 = vsel %vm267_vm0, %v2534_v34, -inf  ;;  %v994_v50 = vmax.f32 %v4619_v19, %v4631_v7 }
  0xb7   :  { %v2588_v22 = vld [vmem:[%s6671_s0 + $0xf2] sm:$0x3]  ;;  %v4655_v61 = vsel %vm267_vm0, %v984_v58, -inf  ;;  %v2557_v3 = vld [vmem:[%s6671_s0 + $0x74] sm:$0x3]  ;;  %v4661_v45 = vsel %vm267_vm0, %v2587_v12, -inf  ;;  %v4667_v36 = vmax.f32 %v990_v56, %v992_v24  ;;  %v1088_v48 = vmax.f32 %v1086_v35, %v1087_v16 }
  0xb8   :  { %v1098_v46 = vsel %vm267_vm0, %v2549_v44, -inf  ;;  %v1111_v38 = vsel %vm267_vm0, %v2542_v17, -inf  ;;  %v2536_v28 = vld [vmem:[%s6671_s0 + $0x1a] sm:$0x3]  ;;  %v2565_v8 = vld [vmem:[%s6671_s0 + $0x94] sm:$0x3]  ;;  %v996_v2 = vmax.f32 %v4628_v53, %v4655_v61  ;;  %v4701_v47 = vmax.f32 %v1075_v57, %v1076_v4 }
  0xb9   :  { %v2573_v55 = vld [vmem:[%s6671_s0 + $0xb4] sm:$0x3]  ;;  %v1089_v20 = vsel %vm267_vm0, %v2572_v30, -inf  ;;  %v1112_v14 = vmax.f32 %v1110_v54, %v1111_v38  ;;  %v2544_v1 = vld [vmem:[%s6671_s0 + $0x3a] sm:$0x3]  ;;  %v1091_v43 = vsel %vm267_vm0, %v2580_v11, -inf  ;;  %v1099_v15 = vmax.f32 %v1097_v39, %v1098_v46 }
  0xba   :  { %v2581_v0 = vld [vmem:[%s6671_s0 + $0xd4] sm:$0x3]  ;;  %v4687_v13 = vsel %vm267_vm0, %v2588_v22, -inf  ;;  %v1113_v32 = vsel %vm267_vm0, %v2550_v60, -inf  ;;  %v2552_v27 = vld [vmem:[%s6671_s0 + $0x5a] sm:$0x3]  ;;  %v1090_v21 = vmax.f32 %v1088_v48, %v1089_v20  ;;  %v1079_v56 = vmax.f32 %v4701_v47, %v4661_v45 }
  0xbb   :  { %v2558_v37 = vld [vmem:[%s6671_s0 + $0x76] sm:$0x3]  ;;  %v2559_v41 = vld [vmem:[%s6671_s0 + $0x78] sm:$0x3]  ;;  %v1125_v29 = vsel %vm267_vm0, %v2535_v52, -inf  ;;  %v1100_v23 = vsel %vm267_vm0, %v2557_v3, -inf  ;;  %v1114_v44 = vmax.f32 %v1112_v14, %v1113_v32  ;;  %v4882_v47 = vmax.f32 %v994_v50, %v996_v2 }
  0xbc   :  { %v2560_v63 = vld [vmem:[%s6671_s0 + $0x7a] sm:$0x3]  ;;  %v1102_v18 = vsel %vm267_vm0, %v2565_v8, -inf  ;;  %v1126_v42 = vsel %vm267_vm0, %v2543_v51, -inf  ;;  %v1128_v59 = vsel %vm267_vm0, %v2551_v9, -inf  ;;  %v4721_v34 = vsel %vm267_vm0, %v2573_v55, -inf }
  0xbd   :  { %v2537_v26 = vld [vmem:[%s6671_s0 + $0x1c] sm:$0x3]  ;;  %v2566_v5 = vld [vmem:[%s6671_s0 + $0x96] sm:$0x3]  ;;  %v2567_v10 = vld [vmem:[%s6671_s0 + $0x98] sm:$0x3]  ;;  %v1127_v33 = vmax.f32 %v1125_v29, %v1126_v42  ;;  %v1101_v24 = vmax.f32 %v1099_v15, %v1100_v23  ;;  %v4769_v38 = vmax.f32 %v1090_v21, %v1091_v43 }
  0xbe   :  { %v4724_v17 = vsel %vm267_vm0, %v2581_v0, -inf  ;;  %v2545_v6 = vld [vmem:[%s6671_s0 + $0x3c] sm:$0x3]  ;;  %v2574_v49 = vld [vmem:[%s6671_s0 + $0xb6] sm:$0x3]  ;;  %v1115_v58 = vsel %vm267_vm0, %v2558_v37, -inf }
  0xbf   :  { %v1130_v62 = vsel %vm267_vm0, %v2559_v41, -inf  ;;  %v1140_v25 = vsel %vm267_vm0, %v2536_v28, -inf  ;;  %v2553_v40 = vld [vmem:[%s6671_s0 + $0x5c] sm:$0x3]  ;;  %v2575_v31 = vld [vmem:[%s6671_s0 + $0xb8] sm:$0x3]  ;;  %v1129_v60 = vmax.f32 %v1127_v33, %v1128_v59  ;;  %v1116_v22 = vmax.f32 %v1114_v44, %v1115_v58 }
  0xc0   :  { %v1141_v12 = vsel %vm267_vm0, %v2544_v1, -inf  ;;  %v2568_v52 = vld [vmem:[%s6671_s0 + $0x9a] sm:$0x3]  ;;  %v1117_v30 = vsel %vm267_vm0, %v2566_v5, -inf  ;;  %v1132_v4 = vsel %vm267_vm0, %v2567_v10, -inf  ;;  %v1143_v51 = vsel %vm267_vm0, %v2552_v27, -inf }
  0xc1   :  { %v1142_v35 = vmax.f32 %v1140_v25, %v1141_v12  ;;  %v2538_v9 = vld [vmem:[%s6671_s0 + $0x1e] sm:$0x3]  ;;  %v2583_v11 = vld [vmem:[%s6671_s0 + $0xd8] sm:$0x3]  ;;  %v4757_v57 = vsel %vm267_vm0, %v2574_v49, -inf  ;;  %v1131_v16 = vmax.f32 %v1129_v60, %v1130_v62  ;;  %v1145_v39 = vsel %vm267_vm0, %v2560_v63, -inf }
  0xc2   :  { %v2546_v54 = vld [vmem:[%s6671_s0 + $0x3e] sm:$0x3]  ;;  %v2561_v3 = vld [vmem:[%s6671_s0 + $0x7c] sm:$0x3]  ;;  %v2576_v46 = vld [vmem:[%s6671_s0 + $0xba] sm:$0x3]  ;;  %v1103_v27 = vmax.f32 %v1101_v24, %v1102_v18  ;;  %v1118_v23 = vmax.f32 %v1116_v22, %v1117_v30 }
  0xc3   :  { %v1134_v28 = vsel %vm267_vm0, %v2575_v31, -inf  ;;  %v1144_v8 = vmax.f32 %v1142_v35, %v1143_v51  ;;  %v1155_v55 = vsel %vm267_vm0, %v2537_v26, -inf  ;;  %v2584_v20 = vld [vmem:[%s6671_s0 + $0xda] sm:$0x3]  ;;  %v1133_v14 = vmax.f32 %v1131_v16, %v1132_v4  ;;  %v2554_v43 = vld [vmem:[%s6671_s0 + $0x5e] sm:$0x3] }
  0xc4   :  { %v1147_v1 = vsel %vm267_vm0, %v2568_v52, -inf  ;;  %v1156_v0 = vsel %vm267_vm0, %v2545_v6, -inf  ;;  %v1158_v48 = vsel %vm267_vm0, %v2553_v40, -inf  ;;  %v2569_v32 = vld [vmem:[%s6671_s0 + $0x9c] sm:$0x3]  ;;  %v1136_v37 = vsel %vm267_vm0, %v2583_v11, -inf }
  0xc5   :  { %v1146_v41 = vmax.f32 %v1144_v8, %v1145_v39  ;;  %v1157_v15 = vmax.f32 %v1155_v55, %v1156_v0  ;;  %v2562_v29 = vld [vmem:[%s6671_s0 + $0x7e] sm:$0x3]  ;;  %v2591_v63 = vld [vmem:[%s6671_s0 + $0xf8] sm:$0x3]  ;;  %v1135_v42 = vmax.f32 %v1133_v14, %v1134_v28  ;;  %v1149_v59 = vsel %vm267_vm0, %v2576_v46, -inf }
  0xc6   :  { %v1160_v26 = vsel %vm267_vm0, %v2561_v3, -inf  ;;  %v2577_v18 = vld [vmem:[%s6671_s0 + $0xbc] sm:$0x3]  ;;  %v2592_v5 = vld [vmem:[%s6671_s0 + $0xfa] sm:$0x3]  ;;  %v1151_v44 = vsel %vm267_vm0, %v2584_v20, -inf  ;;  %v1105_v30 = vmax.f32 %v1103_v27, %v4721_v34  ;;  %v1120_v34 = vmax.f32 %v1118_v23, %v4757_v57 }
  0xc7   :  { %v1148_v10 = vmax.f32 %v1146_v41, %v1147_v1  ;;  %v1159_v33 = vmax.f32 %v1157_v15, %v1158_v48  ;;  %v1170_v6 = vsel %vm267_vm0, %v2538_v9, -inf  ;;  %v1137_v49 = vmax.f32 %v1135_v42, %v1136_v37  ;;  %v2570_v25 = vld [vmem:[%s6671_s0 + $0x9e] sm:$0x3]  ;;  %v2582_v40 = vld [vmem:[%s6671_s0 + $0xd6] sm:$0x3] }
  0xc8   :  { %v1162_v21 = vsel %vm267_vm0, %v2569_v32, -inf  ;;  %v1171_v58 = vsel %vm267_vm0, %v2546_v54, -inf  ;;  %v1173_v62 = vsel %vm267_vm0, %v2554_v43, -inf  ;;  %v1138_v31 = vsel %vm267_vm0, %v2591_v63, -inf  ;;  %v2585_v52 = vld [vmem:[%s6671_s0 + $0xdc] sm:$0x3] }
  0xc9   :  { %v1150_v24 = vmax.f32 %v1148_v10, %v1149_v59  ;;  %v1161_v60 = vmax.f32 %v1159_v33, %v1160_v26  ;;  %v1172_v12 = vmax.f32 %v1170_v6, %v1171_v58  ;;  %v1153_v4 = vsel %vm267_vm0, %v2592_v5, -inf  ;;  %v2578_v9 = vld [vmem:[%s6671_s0 + $0xbe] sm:$0x3]  ;;  %v2589_v11 = vld [vmem:[%s6671_s0 + $0xf4] sm:$0x3] }
  0xca   :  { %v1164_v35 = vsel %vm267_vm0, %v2577_v18, -inf  ;;  %v1175_v51 = vsel %vm267_vm0, %v2562_v29, -inf  ;;  %v2590_v22 = vld [vmem:[%s6671_s0 + $0xf6] sm:$0x3]  ;;  %v2586_v3 = vld [vmem:[%s6671_s0 + $0xde] sm:$0x3]  ;;  %v1094_v46 = vmax.f32 %v4769_v38, %v4687_v13  ;;  %v1139_v8 = vmax.f32 %v1137_v49, %v1138_v31 }
  0xcb   :  { %v1152_v16 = vmax.f32 %v1150_v24, %v1151_v44  ;;  %v1163_v39 = vmax.f32 %v1161_v60, %v1162_v21  ;;  %v1174_v54 = vmax.f32 %v1172_v12, %v1173_v62  ;;  %v1121_v28 = vsel %vm267_vm0, %v2582_v40, -inf  ;;  %v2595_v20 = vld [vmem:[%s6671_s0 + $0x100] sm:$0x3]  ;;  %v2593_v57 = vld [vmem:[%s6671_s0 + $0xfc] sm:$0x3] }
  0xcc   :  { %v1177_v55 = vsel %vm267_vm0, %v2570_v25, -inf  ;;  %v1166_v0 = vsel %vm267_vm0, %v2585_v52, -inf  ;;  %v2603_v13 = vld [vmem:[%s6671_s0 + $0x120] sm:$0x3]  ;;  %v1107_v38 = vmax.f32 %v1105_v30, %v4724_v17  ;;  %v1108_v43 = vsel %vm267_vm0, %v2589_v11, -inf }
  0xcd   :  { %v1154_v14 = vmax.f32 %v1152_v16, %v1153_v4  ;;  %v1165_v1 = vmax.f32 %v1163_v39, %v1164_v35  ;;  %v1176_v48 = vmax.f32 %v1174_v54, %v1175_v51  ;;  %v1123_v32 = vsel %vm267_vm0, %v2590_v22, -inf  ;;  %v2611_v37 = vld [vmem:[%s6671_s0 + $0x140] sm:$0x3]  ;;  %v2594_v41 = vld [vmem:[%s6671_s0 + $0xfe] sm:$0x3] }
  0xce   :  { %v1179_v27 = vsel %vm267_vm0, %v2578_v9, -inf  ;;  %v1122_v15 = vmax.f32 %v1120_v34, %v1121_v28  ;;  %v1181_v63 = vsel %vm267_vm0, %v2586_v3, -inf  ;;  %v2596_v17 = vld [vmem:[%s6671_s0 + $0x102] sm:$0x3]  ;;  %v1265_v23 = vsel %vm267_vm0, %v2595_v20, -inf }
  0xcf   :  { %v1178_v29 = vmax.f32 %v1176_v48, %v1177_v55  ;;  %v1167_v42 = vmax.f32 %v1165_v1, %v1166_v0  ;;  %v1185_v59 = vsel %vm267_vm0, %v1079_v56, -inf  ;;  %v1186_v26 = vsel %vm267_vm0, %v1094_v46, -inf  ;;  %v2619_v5 = vld [vmem:[%s6671_s0 + $0x160] sm:$0x3]  ;;  %v2604_v33 = vld [vmem:[%s6671_s0 + $0x122] sm:$0x3] }
  0xd0   :  { %v1189_v18 = vsel %vm267_vm0, %v1139_v8, -inf  ;;  %v1191_v44 = vsel %vm267_vm0, %v1154_v14, -inf  ;;  %v1266_v6 = vsel %vm267_vm0, %v2603_v13, -inf  ;;  %v1268_v45 = vsel %vm267_vm0, %v2611_v37, -inf  ;;  %v2612_v21 = vld [vmem:[%s6671_s0 + $0x142] sm:$0x3] }
  0xd1   :  { %v1180_v10 = vmax.f32 %v1178_v29, %v1179_v27  ;;  %v1109_v56 = vmax.f32 %v1107_v38, %v1108_v43  ;;  %v1168_v49 = vsel %vm267_vm0, %v2593_v57, -inf  ;;  %v2627_v58 = vld [vmem:[%s6671_s0 + $0x180] sm:$0x3]  ;;  %v1267_v62 = vmax.f32 %v1265_v23, %v1266_v6  ;;  %v2597_v19 = vld [vmem:[%s6671_s0 + $0x104] sm:$0x3] }
  0xd2   :  { %v1124_v25 = vmax.f32 %v1122_v15, %v1123_v32  ;;  %v1183_v53 = vsel %vm267_vm0, %v2594_v41, -inf  ;;  %v1270_v7 = vsel %vm267_vm0, %v2619_v5, -inf  ;;  %v1190_v61 = vmax.f32 %v1185_v59, %v1189_v18  ;;  %v2620_v2 = vld [vmem:[%s6671_s0 + $0x162] sm:$0x3]  ;;  %v2635_v31 = vld [vmem:[%s6671_s0 + $0x1a0] sm:$0x3] }
  0xd3   :  { %v1182_v40 = vmax.f32 %v1180_v10, %v1181_v63  ;;  %v1192_v50 = vmax.f32 %v1186_v26, %v1191_v44  ;;  %v1269_v24 = vmax.f32 %v1267_v62, %v1268_v45  ;;  %v1280_v60 = vsel %vm267_vm0, %v2596_v17, -inf  ;;  %v2605_v52 = vld [vmem:[%s6671_s0 + $0x124] sm:$0x3]  ;;  %v2598_v11 = vld [vmem:[%s6671_s0 + $0x106] sm:$0x3] }
  0xd4   :  { %v1169_v12 = vmax.f32 %v1167_v42, %v1168_v49  ;;  %v1272_v30 = vsel %vm267_vm0, %v2627_v58, -inf  ;;  %v1281_v4 = vsel %vm267_vm0, %v2604_v33, -inf  ;;  %v1283_v35 = vsel %vm267_vm0, %v2612_v21, -inf  ;;  %v2613_v22 = vld [vmem:[%s6671_s0 + $0x144] sm:$0x3] }
  0xd5   :  { %v1184_v51 = vmax.f32 %v1182_v40, %v1183_v53  ;;  %v4910_v9 = vsel %vm267_vm0, %v1109_v56, -inf  ;;  %v2628_v34 = vld [vmem:[%s6671_s0 + $0x182] sm:$0x3]  ;;  %v1271_v16 = vmax.f32 %v1269_v24, %v1270_v7  ;;  %v1282_v39 = vmax.f32 %v1280_v60, %v1281_v4  ;;  %v2606_v3 = vld [vmem:[%s6671_s0 + $0x126] sm:$0x3] }
  0xd6   :  { %v1188_v54 = vsel %vm267_vm0, %v1124_v25, -inf  ;;  %v2621_v46 = vld [vmem:[%s6671_s0 + $0x164] sm:$0x3]  ;;  %v1274_v28 = vsel %vm267_vm0, %v2635_v31, -inf  ;;  %v1285_v8 = vsel %vm267_vm0, %v2620_v2, -inf  ;;  %v1295_v55 = vsel %vm267_vm0, %v2597_v19, -inf }
  0xd7   :  { %v4931_v20 = vmax.f32 %v1190_v61, %v1192_v50  ;;  %v2636_v57 = vld [vmem:[%s6671_s0 + $0x1a2] sm:$0x3]  ;;  %v2643_v14 = vld [vmem:[%s6671_s0 + $0x1c0] sm:$0x3]  ;;  %v1273_v1 = vmax.f32 %v1271_v16, %v1272_v30  ;;  %v1284_v0 = vmax.f32 %v1282_v39, %v1283_v35  ;;  %v1296_v48 = vsel %vm267_vm0, %v2605_v52, -inf }
  0xd8   :  { %v1193_v13 = vsel %vm267_vm0, %v1169_v12, -inf  ;;  %v2629_v38 = vld [vmem:[%s6671_s0 + $0x184] sm:$0x3]  ;;  %v1287_v43 = vsel %vm267_vm0, %v2628_v34, -inf  ;;  %v1297_v32 = vmax.f32 %v1295_v55, %v1296_v48  ;;  %v1298_v27 = vsel %vm267_vm0, %v2613_v22, -inf }
  0xd9   :  { %v1195_v37 = vsel %vm267_vm0, %v1184_v51, -inf  ;;  %v2614_v41 = vld [vmem:[%s6671_s0 + $0x146] sm:$0x3]  ;;  %v2644_v15 = vld [vmem:[%s6671_s0 + $0x1c2] sm:$0x3]  ;;  %v1275_v29 = vmax.f32 %v1273_v1, %v1274_v28  ;;  %v1286_v63 = vmax.f32 %v1284_v0, %v1285_v8  ;;  %v1300_v17 = vsel %vm267_vm0, %v2621_v46, -inf }
  0xda   :  { %v2599_v23 = vld [vmem:[%s6671_s0 + $0x108] sm:$0x3]  ;;  %v2651_v59 = vld [vmem:[%s6671_s0 + $0x1e0] sm:$0x3]  ;;  %v1276_v26 = vsel %vm267_vm0, %v2643_v14, -inf  ;;  %v1289_v18 = vsel %vm267_vm0, %v2636_v57, -inf  ;;  %v1299_v5 = vmax.f32 %v1297_v32, %v1298_v27  ;;  %v1194_v44 = vmax.f32 %v4910_v9, %v1193_v13 }
  0xdb   :  { %v2607_v42 = vld [vmem:[%s6671_s0 + $0x128] sm:$0x3]  ;;  %v1310_v10 = vsel %vm267_vm0, %v2598_v11, -inf  ;;  %v2622_v33 = vld [vmem:[%s6671_s0 + $0x166] sm:$0x3]  ;;  %v1288_v45 = vmax.f32 %v1286_v63, %v1287_v43  ;;  %v1302_v56 = vsel %vm267_vm0, %v2629_v38, -inf  ;;  %v1196_v21 = vmax.f32 %v1188_v54, %v1195_v37 }
  0xdc   :  { %v2652_v6 = vld [vmem:[%s6671_s0 + $0x1e2] sm:$0x3]  ;;  %v1311_v49 = vsel %vm267_vm0, %v2606_v3, -inf  ;;  %v2615_v58 = vld [vmem:[%s6671_s0 + $0x148] sm:$0x3]  ;;  %v1301_v25 = vmax.f32 %v1299_v5, %v1300_v17  ;;  %v1313_v53 = vsel %vm267_vm0, %v2614_v41, -inf  ;;  %v4988_v61 = vmax.f32 %v1275_v29, %v1276_v26 }
  0xdd   :  { %v2637_v62 = vld [vmem:[%s6671_s0 + $0x1a4] sm:$0x3]  ;;  %v1312_v40 = vmax.f32 %v1310_v10, %v1311_v49  ;;  %v4991_v50 = vsel %vm267_vm0, %v2651_v59, -inf  ;;  %v1290_v2 = vmax.f32 %v1288_v45, %v1289_v18  ;;  %v1291_v31 = vsel %vm267_vm0, %v2644_v15, -inf  ;;  %v2600_v24 = vld [vmem:[%s6671_s0 + $0x10a] sm:$0x3] }
  0xde   :  { %v2645_v19 = vld [vmem:[%s6671_s0 + $0x1c4] sm:$0x3]  ;;  %v2608_v60 = vld [vmem:[%s6671_s0 + $0x12a] sm:$0x3]  ;;  %v2623_v12 = vld [vmem:[%s6671_s0 + $0x168] sm:$0x3]  ;;  %v1303_v4 = vmax.f32 %v1301_v25, %v1302_v56  ;;  %v5017_v39 = vmax.f32 %v1194_v44, %v1196_v21  ;;  %v1279_v1 = vmax.f32 %v4988_v61, %v4991_v50 }
  0xdf   :  { %v2653_v7 = vld [vmem:[%s6671_s0 + $0x1e4] sm:$0x3]  ;;  %v2630_v52 = vld [vmem:[%s6671_s0 + $0x186] sm:$0x3]  ;;  %v5007_v30 = vsel %vm267_vm0, %v2652_v6, -inf  ;;  %v1314_v35 = vmax.f32 %v1312_v40, %v1313_v53  ;;  %v1315_v51 = vsel %vm267_vm0, %v2622_v33, -inf  ;;  %v5040_v0 = vmax.f32 %v1290_v2, %v1291_v31 }
  0xe0   :  { %v2638_v9 = vld [vmem:[%s6671_s0 + $0x1a6] sm:$0x3]  ;;  %v1304_v11 = vsel %vm267_vm0, %v2637_v62, -inf  ;;  %v1325_v22 = vsel %vm267_vm0, %v2599_v23, -inf  ;;  %v1326_v34 = vsel %vm267_vm0, %v2607_v42, -inf  ;;  %v1328_v16 = vsel %vm267_vm0, %v2615_v58, -inf }
  0xe1   :  { %v2616_v54 = vld [vmem:[%s6671_s0 + $0x14a] sm:$0x3]  ;;  %v2631_v3 = vld [vmem:[%s6671_s0 + $0x188] sm:$0x3]  ;;  %v1306_v46 = vsel %vm267_vm0, %v2645_v19, -inf  ;;  %v5027_v28 = vsel %vm267_vm0, %v2653_v7, -inf  ;;  %v1327_v8 = vmax.f32 %v1325_v22, %v1326_v34  ;;  %v1316_v48 = vmax.f32 %v1314_v35, %v1315_v51 }
  0xe2   :  { %v2601_v55 = vld [vmem:[%s6671_s0 + $0x10c] sm:$0x3]  ;;  %v2646_v57 = vld [vmem:[%s6671_s0 + $0x1c6] sm:$0x3]  ;;  %v1330_v13 = vsel %vm267_vm0, %v2623_v12, -inf  ;;  %v1305_v27 = vmax.f32 %v1303_v4, %v1304_v11  ;;  %v1317_v37 = vsel %vm267_vm0, %v2630_v52, -inf  ;;  %v1294_v56 = vmax.f32 %v5040_v0, %v5007_v30 }
  0xe3   :  { %v2654_v14 = vld [vmem:[%s6671_s0 + $0x1e6] sm:$0x3]  ;;  %v2609_v38 = vld [vmem:[%s6671_s0 + $0x12c] sm:$0x3]  ;;  %v2624_v43 = vld [vmem:[%s6671_s0 + $0x16a] sm:$0x3]  ;;  %v1329_v15 = vmax.f32 %v1327_v8, %v1328_v16  ;;  %v1318_v49 = vmax.f32 %v1316_v48, %v1317_v37 }
  0xe4   :  { %v2639_v32 = vld [vmem:[%s6671_s0 + $0x1a8] sm:$0x3]  ;;  %v1319_v41 = vsel %vm267_vm0, %v2638_v9, -inf  ;;  %v1332_v63 = vsel %vm267_vm0, %v2631_v3, -inf  ;;  %v1340_v17 = vsel %vm267_vm0, %v2600_v24, -inf  ;;  %v1341_v23 = vsel %vm267_vm0, %v2608_v60, -inf }
  0xe5   :  { %v2647_v29 = vld [vmem:[%s6671_s0 + $0x1c8] sm:$0x3]  ;;  %v1343_v42 = vsel %vm267_vm0, %v2616_v54, -inf  ;;  %v2602_v59 = vld [vmem:[%s6671_s0 + $0x10e] sm:$0x3]  ;;  %v1321_v5 = vsel %vm267_vm0, %v2646_v57, -inf  ;;  %v1331_v44 = vmax.f32 %v1329_v15, %v1330_v13  ;;  %v1342_v33 = vmax.f32 %v1340_v17, %v1341_v23 }
  0xe6   :  { %v2617_v26 = vld [vmem:[%s6671_s0 + $0x14c] sm:$0x3]  ;;  %v2632_v18 = vld [vmem:[%s6671_s0 + $0x18a] sm:$0x3]  ;;  %v5072_v10 = vsel %vm267_vm0, %v2654_v14, -inf  ;;  %v1334_v21 = vsel %vm267_vm0, %v2639_v32, -inf  ;;  %v5095_v31 = vmax.f32 %v1305_v27, %v1306_v46  ;;  %v1320_v22 = vmax.f32 %v1318_v49, %v1319_v41 }
  0xe7   :  { %v2610_v6 = vld [vmem:[%s6671_s0 + $0x12e] sm:$0x3]  ;;  %v2655_v45 = vld [vmem:[%s6671_s0 + $0x1e8] sm:$0x3]  ;;  %v1345_v58 = vsel %vm267_vm0, %v2624_v43, -inf  ;;  %v1333_v40 = vmax.f32 %v1331_v44, %v1332_v63  ;;  %v1336_v53 = vsel %vm267_vm0, %v2647_v29, -inf  ;;  %v1344_v19 = vmax.f32 %v1342_v33, %v1343_v42 }
  0xe8   :  { %v2625_v62 = vld [vmem:[%s6671_s0 + $0x16c] sm:$0x3]  ;;  %v2640_v25 = vld [vmem:[%s6671_s0 + $0x1aa] sm:$0x3]  ;;  %v1355_v7 = vsel %vm267_vm0, %v2601_v55, -inf  ;;  %v1347_v24 = vsel %vm267_vm0, %v2632_v18, -inf  ;;  %v1322_v63 = vmax.f32 %v1320_v22, %v1321_v5  ;;  %v1309_v18 = vmax.f32 %v5095_v31, %v5027_v28 }
  0xe9   :  { %v2618_v2 = vld [vmem:[%s6671_s0 + $0x14e] sm:$0x3]  ;;  %v1356_v60 = vsel %vm267_vm0, %v2609_v38, -inf  ;;  %v1358_v12 = vsel %vm267_vm0, %v2617_v26, -inf  ;;  %v2633_v52 = vld [vmem:[%s6671_s0 + $0x18c] sm:$0x3]  ;;  %v1335_v4 = vmax.f32 %v1333_v40, %v1334_v21  ;;  %v1346_v51 = vmax.f32 %v1344_v19, %v1345_v58 }
  0xea   :  { %v2648_v30 = vld [vmem:[%s6671_s0 + $0x1ca] sm:$0x3]  ;;  %v1338_v35 = vsel %vm267_vm0, %v2655_v45, -inf  ;;  %v1357_v9 = vmax.f32 %v1355_v7, %v1356_v60  ;;  %v2626_v11 = vld [vmem:[%s6671_s0 + $0x16e] sm:$0x3]  ;;  %v1349_v34 = vsel %vm267_vm0, %v2640_v25, -inf  ;;  %v1324_v61 = vmax.f32 %v1322_v63, %v5072_v10 }
  0xeb   :  { %v1360_v16 = vsel %vm267_vm0, %v2625_v62, -inf  ;;  %v1370_v54 = vsel %vm267_vm0, %v2602_v59, -inf  ;;  %v2641_v3 = vld [vmem:[%s6671_s0 + $0x1ac] sm:$0x3]  ;;  %v2656_v46 = vld [vmem:[%s6671_s0 + $0x1ea] sm:$0x3]  ;;  %v1337_v8 = vmax.f32 %v1335_v4, %v1336_v53  ;;  %v1348_v55 = vmax.f32 %v1346_v51, %v1347_v24 }
  0xec   :  { %v1359_v57 = vmax.f32 %v1357_v9, %v1358_v12  ;;  %v1371_v14 = vsel %vm267_vm0, %v2610_v6, -inf  ;;  %v2634_v0 = vld [vmem:[%s6671_s0 + $0x18e] sm:$0x3]  ;;  %v1351_v48 = vsel %vm267_vm0, %v2648_v30, -inf  ;;  %v1362_v13 = vsel %vm267_vm0, %v2633_v52, -inf }
  0xed   :  { %v1372_v38 = vmax.f32 %v1370_v54, %v1371_v14  ;;  %v1373_v43 = vsel %vm267_vm0, %v2618_v2, -inf  ;;  %v2649_v32 = vld [vmem:[%s6671_s0 + $0x1cc] sm:$0x3]  ;;  %v1339_v27 = vmax.f32 %v1337_v8, %v1338_v35  ;;  %v1350_v37 = vmax.f32 %v1348_v55, %v1349_v34  ;;  %v2642_v29 = vld [vmem:[%s6671_s0 + $0x1ae] sm:$0x3] }
  0xee   :  { %v1361_v41 = vmax.f32 %v1359_v57, %v1360_v16  ;;  %v1375_v15 = vsel %vm267_vm0, %v2626_v11, -inf  ;;  %v1353_v17 = vsel %vm267_vm0, %v2656_v46, -inf  ;;  %v1364_v23 = vsel %vm267_vm0, %v2641_v3, -inf  ;;  %v2650_v59 = vld [vmem:[%s6671_s0 + $0x1ce] sm:$0x3] }
  0xef   :  { %v1374_v42 = vmax.f32 %v1372_v38, %v1373_v43  ;;  %v2657_v26 = vld [vmem:[%s6671_s0 + $0x1ec] sm:$0x3]  ;;  %v1352_v44 = vmax.f32 %v1350_v37, %v1351_v48  ;;  %v1377_v5 = vsel %vm267_vm0, %v2634_v0, -inf  ;;  %v1366_v6 = vsel %vm267_vm0, %v2649_v32, -inf  ;;  %v2659_v58 = vld [vmem:[%s6671_s0 + $0x110] sm:$0x3] }
  0xf0   :  { %v1363_v33 = vmax.f32 %v1361_v41, %v1362_v13  ;;  %v1385_v49 = vsel %vm267_vm0, %v1279_v1, -inf  ;;  %v1389_v21 = vsel %vm267_vm0, %v1339_v27, -inf  ;;  %v2658_v28 = vld [vmem:[%s6671_s0 + $0x1ee] sm:$0x3]  ;;  %v1379_v40 = vsel %vm267_vm0, %v2642_v29, -inf }
  0xf1   :  { %v1376_v45 = vmax.f32 %v1374_v42, %v1375_v15  ;;  %v1354_v62 = vmax.f32 %v1352_v44, %v1353_v17  ;;  %v1386_v53 = vsel %vm267_vm0, %v1294_v56, -inf  ;;  %v1368_v50 = vsel %vm267_vm0, %v2657_v26, -inf  ;;  %v2667_v7 = vld [vmem:[%s6671_s0 + $0x130] sm:$0x3]  ;;  %v2660_v30 = vld [vmem:[%s6671_s0 + $0x112] sm:$0x3] }
  0xf2   :  { %v1365_v25 = vmax.f32 %v1363_v33, %v1364_v23  ;;  %v1381_v19 = vsel %vm267_vm0, %v2650_v59, -inf  ;;  %v2675_v2 = vld [vmem:[%s6671_s0 + $0x150] sm:$0x3]  ;;  %v1390_v24 = vmax.f32 %v1385_v49, %v1389_v21  ;;  %v1465_v56 = vsel %vm267_vm0, %v2659_v58, -inf  ;;  %v2668_v4 = vld [vmem:[%s6671_s0 + $0x132] sm:$0x3] }
  0xf3   :  { %v1378_v1 = vmax.f32 %v1376_v45, %v1377_v5  ;;  %v1391_v60 = vsel %vm267_vm0, %v1354_v62, -inf  ;;  %v5171_v10 = vmax.f32 %v4667_v36, %v4882_v47  ;;  %v2683_v35 = vld [vmem:[%s6671_s0 + $0x170] sm:$0x3]  ;;  %v1383_v47 = vsel %vm267_vm0, %v2658_v28, -inf  ;;  %v2676_v3 = vld [vmem:[%s6671_s0 + $0x152] sm:$0x3] }
  0xf4   :  { %v1367_v31 = vmax.f32 %v1365_v25, %v1366_v6  ;;  %v1392_v52 = vmax.f32 %v1386_v53, %v1391_v60  ;;  %v2691_v51 = vld [vmem:[%s6671_s0 + $0x190] sm:$0x3]  ;;  %v1466_v11 = vsel %vm267_vm0, %v2667_v7, -inf  ;;  %v1468_v22 = vsel %vm267_vm0, %v2675_v2, -inf  ;;  %v2684_v46 = vld [vmem:[%s6671_s0 + $0x172] sm:$0x3] }
  0xf5   :  { %v1380_v12 = vmax.f32 %v1378_v1, %v1379_v40  ;;  %v2699_v9 = vld [vmem:[%s6671_s0 + $0x1b0] sm:$0x3]  ;;  %v5193_v34 = vmax.f32 %v4931_v20, %v5017_v39  ;;  %v1387_v54 = vsel %vm267_vm0, %v1309_v18, -inf  ;;  %v1467_v8 = vmax.f32 %v1465_v56, %v1466_v11  ;;  %v2661_v20 = vld [vmem:[%s6671_s0 + $0x114] sm:$0x3] }
  0xf6   :  { %v1369_v36 = vmax.f32 %v1367_v31, %v1368_v50  ;;  %v1388_v55 = vsel %vm267_vm0, %v1324_v61, -inf  ;;  %v1397_v14 = vmax.f32 %v1390_v24, %v1392_v52  ;;  %v2669_v39 = vld [vmem:[%s6671_s0 + $0x134] sm:$0x3]  ;;  %v2707_v0 = vld [vmem:[%s6671_s0 + $0x1d0] sm:$0x3]  ;;  %v1470_v48 = vsel %vm267_vm0, %v2683_v35, -inf }
  0xf7   :  { %v1382_v16 = vmax.f32 %v1380_v12, %v1381_v19  ;;  %v2677_v38 = vld [vmem:[%s6671_s0 + $0x154] sm:$0x3]  ;;  %v2692_v43 = vld [vmem:[%s6671_s0 + $0x192] sm:$0x3]  ;;  %v2715_v32 = vld [vmem:[%s6671_s0 + $0x1f0] sm:$0x3]  ;;  %v1469_v27 = vmax.f32 %v1467_v8, %v1468_v22 }
  0xf8   :  { %v1393_v57 = vsel %vm267_vm0, %v1369_v36, -inf  ;;  %v1472_v37 = vsel %vm267_vm0, %v2691_v51, -inf  ;;  %v1474_v41 = vsel %vm267_vm0, %v2699_v9, -inf  ;;  %v2685_v29 = vld [vmem:[%s6671_s0 + $0x174] sm:$0x3]  ;;  %v1480_v63 = vsel %vm267_vm0, %v2660_v30, -inf }
  0xf9   :  { %v1384_v13 = vmax.f32 %v1382_v16, %v1383_v47  ;;  %v1394_v15 = vmax.f32 %v1387_v54, %v1393_v57  ;;  %v1481_v17 = vsel %vm267_vm0, %v2668_v4, -inf  ;;  %v1483_v23 = vsel %vm267_vm0, %v2676_v3, -inf  ;;  %v2693_v59 = vld [vmem:[%s6671_s0 + $0x194] sm:$0x3]  ;;  %v2700_v26 = vld [vmem:[%s6671_s0 + $0x1b2] sm:$0x3] }
  0xfa   :  { %v1471_v18 = vmax.f32 %v1469_v27, %v1470_v48  ;;  %v1476_v44 = vsel %vm267_vm0, %v2707_v0, -inf  ;;  %v1482_v33 = vmax.f32 %v1480_v63, %v1481_v17  ;;  %v2662_v6 = vld [vmem:[%s6671_s0 + $0x116] sm:$0x3]  ;;  %v2708_v45 = vld [vmem:[%s6671_s0 + $0x1d2] sm:$0x3]  ;;  %v5246_v49 = vsel %vm267_vm0, %v2715_v32, -inf }
  0xfb   :  { %v1395_v42 = vsel %vm267_vm0, %v1384_v13, -inf  ;;  %v1485_v21 = vsel %vm267_vm0, %v2684_v46, -inf  ;;  %v1487_v58 = vsel %vm267_vm0, %v2692_v43, -inf  ;;  %v2701_v28 = vld [vmem:[%s6671_s0 + $0x1b4] sm:$0x3]  ;;  %v1495_v53 = vsel %vm267_vm0, %v2661_v20, -inf }
  0xfc   :  { %v1396_v5 = vmax.f32 %v1388_v55, %v1395_v42  ;;  %v2716_v62 = vld [vmem:[%s6671_s0 + $0x1f2] sm:$0x3]  ;;  %v1473_v25 = vmax.f32 %v1471_v18, %v1472_v37  ;;  %v1484_v40 = vmax.f32 %v1482_v33, %v1483_v23  ;;  %v1496_v61 = vsel %vm267_vm0, %v2669_v39, -inf  ;;  %v2670_v1 = vld [vmem:[%s6671_s0 + $0x136] sm:$0x3] }
  0xfd   :  { %v2678_v19 = vld [vmem:[%s6671_s0 + $0x156] sm:$0x3]  ;;  %v1489_v7 = vsel %vm267_vm0, %v2700_v26, -inf  ;;  %v1497_v2 = vmax.f32 %v1495_v53, %v1496_v61  ;;  %v1498_v31 = vsel %vm267_vm0, %v2677_v38, -inf  ;;  %v2709_v60 = vld [vmem:[%s6671_s0 + $0x1d4] sm:$0x3] }
  0xfe   :  { %v1398_v50 = vmax.f32 %v1394_v15, %v1396_v5  ;;  %v2686_v24 = vld [vmem:[%s6671_s0 + $0x176] sm:$0x3]  ;;  %v1475_v56 = vmax.f32 %v1473_v25, %v1474_v41  ;;  %v1486_v12 = vmax.f32 %v1484_v40, %v1485_v21  ;;  %v1491_v52 = vsel %vm267_vm0, %v2708_v45, -inf  ;;  %v2663_v4 = vld [vmem:[%s6671_s0 + $0x118] sm:$0x3] }
  0xff   :  { %v1500_v30 = vsel %vm267_vm0, %v2685_v29, -inf  ;;  %v2717_v35 = vld [vmem:[%s6671_s0 + $0x1f4] sm:$0x3]  ;;  %v5281_v51 = vsel %vm267_vm0, %v2716_v62, -inf  ;;  %v1499_v36 = vmax.f32 %v1497_v2, %v1498_v31  ;;  %v1502_v47 = vsel %vm267_vm0, %v2693_v59, -inf }
 0x100   :  { %v1504_v9 = vsel %vm267_vm0, %v2701_v28, -inf  ;;  %v2671_v11 = vld [vmem:[%s6671_s0 + $0x138] sm:$0x3]  ;;  %v2694_v22 = vld [vmem:[%s6671_s0 + $0x196] sm:$0x3]  ;;  %v5291_v16 = vmax.f32 %v1475_v56, %v1476_v44  ;;  %v1488_v54 = vmax.f32 %v1486_v12, %v1487_v58  ;;  %v1510_v3 = vsel %vm267_vm0, %v2662_v6, -inf }
 0x101   :  { %v1511_v46 = vsel %vm267_vm0, %v2670_v1, -inf  ;;  %v5295_v8 = vmax.f32 %v1397_v14, %v1398_v50  ;;  %v2679_v55 = vld [vmem:[%s6671_s0 + $0x158] sm:$0x3]  ;;  %v1501_v20 = vmax.f32 %v1499_v36, %v1500_v30  ;;  %v1513_v0 = vsel %vm267_vm0, %v2678_v19, -inf  ;;  %v2702_v48 = vld [vmem:[%s6671_s0 + $0x1b6] sm:$0x3] }
 0x102   :  { %v2687_v57 = vld [vmem:[%s6671_s0 + $0x178] sm:$0x3]  ;;  %v1512_v39 = vmax.f32 %v1510_v3, %v1511_v46  ;;  %v1490_v13 = vmax.f32 %v1488_v54, %v1489_v7  ;;  %v1506_v14 = vsel %vm267_vm0, %v2709_v60, -inf  ;;  %v5309_v38 = vsel %vm267_vm0, %v2717_v35, -inf  ;;  %v2664_v32 = vld [vmem:[%s6671_s0 + $0x11a] sm:$0x3] }
 0x103   :  { %v1515_v43 = vsel %vm267_vm0, %v2686_v24, -inf  ;;  %v2672_v27 = vld [vmem:[%s6671_s0 + $0x13a] sm:$0x3]  ;;  %v2710_v41 = vld [vmem:[%s6671_s0 + $0x1d6] sm:$0x3]  ;;  %v1479_v29 = vmax.f32 %v5291_v16, %v5246_v49  ;;  %v1503_v63 = vmax.f32 %v1501_v20, %v1502_v47  ;;  %v1517_v23 = vsel %vm267_vm0, %v2694_v22, -inf }
 0x104   :  { %v2680_v37 = vld [vmem:[%s6671_s0 + $0x15a] sm:$0x3]  ;;  %v2718_v15 = vld [vmem:[%s6671_s0 + $0x1f6] sm:$0x3]  ;;  %v1514_v17 = vmax.f32 %v1512_v39, %v1513_v0  ;;  %v2695_v42 = vld [vmem:[%s6671_s0 + $0x198] sm:$0x3]  ;;  %v5333_v59 = vmax.f32 %v1490_v13, %v1491_v52 }
 0x105   :  { %v1525_v26 = vsel %vm267_vm0, %v2663_v4, -inf  ;;  %v1526_v18 = vsel %vm267_vm0, %v2671_v11, -inf  ;;  %v1528_v44 = vsel %vm267_vm0, %v2679_v55, -inf  ;;  %v2688_v33 = vld [vmem:[%s6671_s0 + $0x17a] sm:$0x3]  ;;  %v1505_v6 = vmax.f32 %v1503_v63, %v1504_v9 }
 0x106   :  { %v2703_v5 = vld [vmem:[%s6671_s0 + $0x1b8] sm:$0x3]  ;;  %v1516_v45 = vmax.f32 %v1514_v17, %v1515_v43  ;;  %v1519_v21 = vsel %vm267_vm0, %v2702_v48, -inf  ;;  %v1527_v58 = vmax.f32 %v1525_v26, %v1526_v18  ;;  %v2665_v28 = vld [vmem:[%s6671_s0 + $0x11c] sm:$0x3]  ;;  %v1494_v25 = vmax.f32 %v5333_v59, %v5281_v51 }
 0x107   :  { %v2711_v62 = vld [vmem:[%s6671_s0 + $0x1d8] sm:$0x3]  ;;  %v1521_v40 = vsel %vm267_vm0, %v2710_v41, -inf  ;;  %v5355_v53 = vsel %vm267_vm0, %v2718_v15, -inf  ;;  %v1530_v61 = vsel %vm267_vm0, %v2687_v57, -inf  ;;  %v5367_v7 = vmax.f32 %v1505_v6, %v1506_v14 }
 0x108   :  { %v2673_v50 = vld [vmem:[%s6671_s0 + $0x13c] sm:$0x3]  ;;  %v2696_v1 = vld [vmem:[%s6671_s0 + $0x19a] sm:$0x3]  ;;  %v2719_v19 = vld [vmem:[%s6671_s0 + $0x1f8] sm:$0x3]  ;;  %v1518_v2 = vmax.f32 %v1516_v45, %v1517_v23  ;;  %v1529_v31 = vmax.f32 %v1527_v58, %v1528_v44 }
 0x109   :  { %v1532_v24 = vsel %vm267_vm0, %v2695_v42, -inf  ;;  %v2681_v60 = vld [vmem:[%s6671_s0 + $0x15c] sm:$0x3]  ;;  %v1534_v56 = vsel %vm267_vm0, %v2703_v5, -inf  ;;  %v1540_v12 = vsel %vm267_vm0, %v2664_v32, -inf  ;;  %v1541_v52 = vsel %vm267_vm0, %v2672_v27, -inf }
 0x10a   :  { %v1543_v30 = vsel %vm267_vm0, %v2680_v37, -inf  ;;  %v2666_v4 = vld [vmem:[%s6671_s0 + $0x11e] sm:$0x3]  ;;  %v2704_v35 = vld [vmem:[%s6671_s0 + $0x1ba] sm:$0x3]  ;;  %v1520_v47 = vmax.f32 %v1518_v2, %v1519_v21  ;;  %v1531_v9 = vmax.f32 %v1529_v31, %v1530_v61  ;;  %v1536_v11 = vsel %vm267_vm0, %v2711_v62, -inf }
 0x10b   :  { %v2712_v36 = vld [vmem:[%s6671_s0 + $0x1da] sm:$0x3]  ;;  %v1542_v22 = vmax.f32 %v1540_v12, %v1541_v52  ;;  %v2674_v54 = vld [vmem:[%s6671_s0 + $0x13e] sm:$0x3]  ;;  %v1509_v46 = vmax.f32 %v5367_v7, %v5309_v38  ;;  %v1538_v55 = vsel %vm267_vm0, %v2719_v19, -inf  ;;  %v1545_v57 = vsel %vm267_vm0, %v2688_v33, -inf }
 0x10c   :  { %v2720_v3 = vld [vmem:[%s6671_s0 + $0x1fa] sm:$0x3]  ;;  %v1547_v20 = vsel %vm267_vm0, %v2696_v1, -inf  ;;  %v2682_v39 = vld [vmem:[%s6671_s0 + $0x15e] sm:$0x3]  ;;  %v5407_v13 = vmax.f32 %v1520_v47, %v1521_v40  ;;  %v1533_v14 = vmax.f32 %v1531_v9, %v1532_v24  ;;  %v1555_v32 = vsel %vm267_vm0, %v2665_v28, -inf }
 0x10d   :  { %v2689_v0 = vld [vmem:[%s6671_s0 + $0x17c] sm:$0x3]  ;;  %v1544_v43 = vmax.f32 %v1542_v22, %v1543_v30  ;;  %v2690_v27 = vld [vmem:[%s6671_s0 + $0x17e] sm:$0x3]  ;;  %v1549_v37 = vsel %vm267_vm0, %v2704_v35, -inf  ;;  %v1551_v41 = vsel %vm267_vm0, %v2712_v36, -inf }
 0x10e   :  { %v2697_v48 = vld [vmem:[%s6671_s0 + $0x19c] sm:$0x3]  ;;  %v1556_v15 = vsel %vm267_vm0, %v2673_v50, -inf  ;;  %v1558_v63 = vsel %vm267_vm0, %v2681_v60, -inf  ;;  %v1535_v42 = vmax.f32 %v1533_v14, %v1534_v56  ;;  %v1553_v18 = vsel %vm267_vm0, %v2720_v3, -inf }
 0x10f   :  { %v2705_v17 = vld [vmem:[%s6671_s0 + $0x1bc] sm:$0x3]  ;;  %v1546_v26 = vmax.f32 %v1544_v43, %v1545_v57  ;;  %v1557_v44 = vmax.f32 %v1555_v32, %v1556_v15  ;;  %v2698_v33 = vld [vmem:[%s6671_s0 + $0x19e] sm:$0x3]  ;;  %v1524_v5 = vmax.f32 %v5407_v13, %v5355_v53  ;;  %v1560_v6 = vsel %vm267_vm0, %v2689_v0, -inf }
 0x110   :  { %v2713_v23 = vld [vmem:[%s6671_s0 + $0x1dc] sm:$0x3]  ;;  %v1562_v45 = vsel %vm267_vm0, %v2697_v48, -inf  ;;  %v1570_v21 = vsel %vm267_vm0, %v2666_v4, -inf  ;;  %v2706_v58 = vld [vmem:[%s6671_s0 + $0x1be] sm:$0x3]  ;;  %v1537_v62 = vmax.f32 %v1535_v42, %v1536_v11 }
 0x111   :  { %v2721_v28 = vld [vmem:[%s6671_s0 + $0x1fc] sm:$0x3]  ;;  %v1548_v40 = vmax.f32 %v1546_v26, %v1547_v20  ;;  %v1559_v61 = vmax.f32 %v1557_v44, %v1558_v63  ;;  %v1571_v50 = vsel %vm267_vm0, %v2674_v54, -inf  ;;  %v2714_v53 = vld [vmem:[%s6671_s0 + $0x1de] sm:$0x3]  ;;  %v1564_v1 = vsel %vm267_vm0, %v2705_v17, -inf }
 0x112   :  { %v1566_v19 = vsel %vm267_vm0, %v2713_v23, -inf  ;;  %v1572_v2 = vmax.f32 %v1570_v21, %v1571_v50  ;;  %v1573_v31 = vsel %vm267_vm0, %v2682_v39, -inf  ;;  %v1539_v24 = vmax.f32 %v1537_v62, %v1538_v55  ;;  %v2722_v20 = vld [vmem:[%s6671_s0 + $0x1fe] sm:$0x3]  ;;  %v1643_v17 = vld [vmem:[%s6671_s0 + $0x40] sm:$0x3] }
 0x113   :  { %v1550_v60 = vmax.f32 %v1548_v40, %v1549_v37  ;;  %v1561_v56 = vmax.f32 %v1559_v61, %v1560_v6  ;;  %v1575_v12 = vsel %vm267_vm0, %v2690_v27, -inf  ;;  %v1568_v52 = vsel %vm267_vm0, %v2721_v28, -inf  ;;  %v1633_v37 = vld [vmem:[%s6671_s0] sm:$0x3]  ;;  %v1635_v38 = vld [vmem:[%s6671_s0 + $0x4] sm:$0x3] }
 0x114   :  { %v1574_v30 = vmax.f32 %v1572_v2, %v1573_v31  ;;  %v1577_v4 = vsel %vm267_vm0, %v2698_v33, -inf  ;;  %v1585_v35 = vsel %vm267_vm0, %v1479_v29, -inf  ;;  %v1579_v9 = vsel %vm267_vm0, %v2706_v58, -inf  ;;  %v1639_v7 = vld [vmem:[%s6671_s0 + $0x22] sm:$0x3] }
 0x115   :  { %v1552_v36 = vmax.f32 %v1550_v60, %v1551_v41  ;;  %v1563_v47 = vmax.f32 %v1561_v56, %v1562_v45  ;;  %v1581_v11 = vsel %vm267_vm0, %v2714_v53, -inf  ;;  %v1586_v54 = vsel %vm267_vm0, %v1494_v25, -inf  ;;  %v1644_v33 = vld [vmem:[%s6671_s0 + $0x42] sm:$0x3]  ;;  %v1640_v58 = vld [vmem:[%s6671_s0 + $0x24] sm:$0x3] }
 0x116   :  { %v1576_v22 = vmax.f32 %v1574_v30, %v1575_v12  ;;  %v1589_v3 = vsel %vm267_vm0, %v1539_v24, -inf  ;;  %v1601_v55 = vrot.slane %v5171_v10, 1  ;;  %v1604_v29 = vrot.slane %v5193_v34, 1  ;;  %v1649_v28 = vld [vmem:[%s6671_s0 + $0x62] sm:$0x3] }
 0x117   :  { %v1554_v57 = vmax.f32 %v1552_v36, %v1553_v18  ;;  %v1565_v49 = vmax.f32 %v1563_v47, %v1564_v1  ;;  %v1590_v16 = vmax.f32 %v1585_v35, %v1589_v3  ;;  %v1606_v0 = vrot.slane %v5295_v8, 1  ;;  %v1636_v50 = vld [vmem:[%s6671_s0 + $0x6] sm:$0x3]  ;;  %v1645_v1 = vld [vmem:[%s6671_s0 + $0x44] sm:$0x3] }
 0x118   :  { %v1578_v39 = vmax.f32 %v1576_v22, %v1577_v4  ;;  %v1609_v51 = vperm.slane %v5193_v34, 0  ;;  %v1613_v59 = vperm.slane %v5295_v8, 0  ;;  %v1610_v13 = vperm.slane %v1604_v29, 0  ;;  %v1638_v34 = vld [vmem:[%s6671_s0 + $0x20] sm:$0x3] }
 0x119   :  { %v1567_v25 = vmax.f32 %v1565_v49, %v1566_v19  ;;  %v1591_v48 = vsel %vm267_vm0, %v1554_v57, -inf  ;;  %v1614_v32 = vperm.slane %v1606_v0, 0  ;;  %v1583_v41 = vsel %vm267_vm0, %v2722_v20, -inf  ;;  %v1641_v53 = vld [vmem:[%s6671_s0 + $0x26] sm:$0x3] }
 0x11a   :  { %v1580_v14 = vmax.f32 %v1578_v39, %v1579_v9  ;;  %v1592_v43 = vmax.f32 %v1586_v54, %v1591_v48  ;;  %v1622_v27 = vsel %vm1621_vm2, %v5171_v10, %v1609_v51  ;;  %v1587_v15 = vsel %vm267_vm0, %v1509_v46, -inf  ;;  %v1634_v10 = vld [vmem:[%s6671_s0 + $0x2] sm:$0x3]  ;;  %v1648_v46 = vld [vmem:[%s6671_s0 + $0x60] sm:$0x3] }
 0x11b   :  { %v1569_v8 = vmax.f32 %v1567_v25, %v1568_v52  ;;  %v1623_v63 = vsel %vm1621_vm2, %v1601_v55, %v1610_v13  ;;  %v1588_v42 = vsel %vm267_vm0, %v1524_v5, -inf  ;;  %v5500_v44 = vsel %vm1624_vm3, %v1622_v27, %v1613_v59  ;;  %v1653_v60 = vld [vmem:[%s6671_s0 + $0x80] sm:$0x3]  ;;  %v1654_v56 = vld [vmem:[%s6671_s0 + $0x82] sm:$0x3] }
 0x11c   :  { %v1582_v23 = vmax.f32 %v1580_v14, %v1581_v11  ;;  %v1597_v26 = vmax.f32 %v1590_v16, %v1592_v43  ;;  %v1658_v5 = vsel %vm267_vm0, %v1633_v37, -inf  ;;  %v1659_v6 = vsel %vm267_vm0, %v1638_v34, -inf  ;;  %v1650_v35 = vld [vmem:[%s6671_s0 + $0x64] sm:$0x3]  ;;  %v1637_v9 = vld [vmem:[%s6671_s0 + $0x8] sm:$0x3] }
 0x11d   :  { %v1593_v18 = vsel %vm267_vm0, %v1569_v8, -inf  ;;  %v5508_v21 = vsel %vm1624_vm3, %v1623_v63, %v1614_v32  ;;  %v1660_v62 = vmax.f32 %v1658_v5, %v1659_v6  ;;  %v1661_v40 = vsel %vm267_vm0, %v1643_v17, -inf  ;;  %v1646_v11 = vld [vmem:[%s6671_s0 + $0x46] sm:$0x3]  ;;  %v1642_v49 = vld [vmem:[%s6671_s0 + $0x28] sm:$0x3] }
 0x11e   :  { %v1584_v45 = vmax.f32 %v1582_v23, %v1583_v41  ;;  %v1594_v61 = vmax.f32 %v1587_v15, %v1593_v18  ;;  %v1663_v19 = vsel %vm267_vm0, %v1648_v46, -inf  ;;  %v1667_v2 = vsel %vm267_vm0, %v1634_v10, -inf  ;;  %v1651_v16 = vld [vmem:[%s6671_s0 + $0x66] sm:$0x3]  ;;  %v1655_v29 = vld [vmem:[%s6671_s0 + $0x84] sm:$0x3] }
 0x11f   :  { %v1668_v31 = vsel %vm267_vm0, %v1639_v7, -inf  ;;  %vm1627_vm4 = vcmask 1042432   ;;  %v1662_v12 = vmax.f32 %v1660_v62, %v1661_v40  ;;  %v1670_v30 = vsel %vm267_vm0, %v1644_v33, -inf  ;;  %v1647_v51 = vld [vmem:[%s6671_s0 + $0x48] sm:$0x3] }
 0x120   :  { %v1595_v24 = vsel %vm267_vm0, %v1584_v45, -inf  ;;  %v1669_v52 = vmax.f32 %v1667_v2, %v1668_v31  ;;  %vm1630_vm5 = vcmask 27648   ;;  %v1672_v36 = vsel %vm267_vm0, %v1649_v28, -inf  ;;  %v1652_v43 = vld [vmem:[%s6671_s0 + $0x68] sm:$0x3] }
 0x121   :  { %v1596_v4 = vmax.f32 %v1588_v42, %v1595_v24  ;;  %v1676_v47 = vsel %vm267_vm0, %v1635_v38, -inf  ;;  %v1664_v22 = vmax.f32 %v1662_v12, %v1663_v19  ;;  %v1677_v3 = vsel %vm267_vm0, %v1640_v58, -inf  ;;  %v1656_v32 = vld [vmem:[%s6671_s0 + $0x86] sm:$0x3]  ;;  %v1657_v8 = vld [vmem:[%s6671_s0 + $0x88] sm:$0x3] }
 0x122   :  { %v1671_v54 = vmax.f32 %v1669_v52, %v1670_v30  ;;  %v1679_v55 = vsel %vm267_vm0, %v1645_v1, -inf  ;;  %v1665_v20 = vsel %vm267_vm0, %v1653_v60, -inf  ;;  %v1674_v39 = vsel %vm267_vm0, %v1654_v56, -inf  ;;  %v2723_v38 = vld [vmem:[%s6671_s0 + $0xa] sm:$0x3] }
 0x123   :  { %v1598_v57 = vmax.f32 %v1594_v61, %v1596_v4  ;;  %v1678_v0 = vmax.f32 %v1676_v47, %v1677_v3  ;;  %v1681_v25 = vsel %vm267_vm0, %v1650_v35, -inf  ;;  %v1685_v48 = vsel %vm267_vm0, %v1636_v50, -inf  ;;  %v2729_v7 = vld [vmem:[%s6671_s0 + $0x2a] sm:$0x3]  ;;  %v2724_v6 = vld [vmem:[%s6671_s0 + $0xc] sm:$0x3] }
 0x124   :  { %v1673_v59 = vmax.f32 %v1671_v54, %v1672_v36  ;;  %v1686_v13 = vsel %vm267_vm0, %v1641_v53, -inf  ;;  %v1688_v34 = vsel %vm267_vm0, %v1646_v11, -inf  ;;  %v1666_v41 = vmax.f32 %v1664_v22, %v1665_v20  ;;  %v2730_v45 = vld [vmem:[%s6671_s0 + $0x2c] sm:$0x3]  ;;  %v2735_v61 = vld [vmem:[%s6671_s0 + $0x4a] sm:$0x3] }
 0x125   :  { %v1599_v14 = vmax.f32 %v1597_v26, %v1598_v57  ;;  %v1680_v27 = vmax.f32 %v1678_v0, %v1679_v55  ;;  %v1687_v37 = vmax.f32 %v1685_v48, %v1686_v13  ;;  %v1683_v15 = vsel %vm267_vm0, %v1655_v29, -inf  ;;  %v2741_v50 = vld [vmem:[%s6671_s0 + $0x6a] sm:$0x3]  ;;  %v2725_v19 = vld [vmem:[%s6671_s0 + $0xe] sm:$0x3] }
 0x126   :  { %v1690_v63 = vsel %vm267_vm0, %v1651_v16, -inf  ;;  %v1694_v10 = vsel %vm267_vm0, %v1637_v9, -inf  ;;  %v1675_v46 = vmax.f32 %v1673_v59, %v1674_v39  ;;  %v1692_v18 = vsel %vm267_vm0, %v1656_v32, -inf  ;;  %v2736_v56 = vld [vmem:[%s6671_s0 + $0x4c] sm:$0x3] }
 0x127   :  { %v1608_v17 = vrot.slane %v1599_v14, 1  ;;  %v1617_v23 = vperm.slane %v1599_v14, 0  ;;  %v1682_v42 = vmax.f32 %v1680_v27, %v1681_v25  ;;  %v1689_v26 = vmax.f32 %v1687_v37, %v1688_v34  ;;  %v2742_v12 = vld [vmem:[%s6671_s0 + $0x6c] sm:$0x3]  ;;  %v2747_v4 = vld [vmem:[%s6671_s0 + $0x8a] sm:$0x3] }
 0x128   :  { %v1695_v33 = vsel %vm267_vm0, %v1642_v49, -inf  ;;  %v1697_v5 = vsel %vm267_vm0, %v1647_v51, -inf  ;;  %v1699_v1 = vsel %vm267_vm0, %v1652_v43, -inf  ;;  %v1743_v2 = vsel %vm267_vm0, %v2723_v38, -inf  ;;  %v2726_v9 = vld [vmem:[%s6671_s0 + $0x10] sm:$0x3] }
 0x129   :  { %v1618_v58 = vperm.slane %v1608_v17, 0  ;;  %v1628_v28 = vsel %vm1627_vm4, %v5500_v44, %v1617_v23  ;;  %v1684_v62 = vmax.f32 %v1682_v42, %v1683_v15  ;;  %v1691_v40 = vmax.f32 %v1689_v26, %v1690_v63  ;;  %v2731_v11 = vld [vmem:[%s6671_s0 + $0x2e] sm:$0x3]  ;;  %v2748_v16 = vld [vmem:[%s6671_s0 + $0x8c] sm:$0x3] }
 0x12a   :  { %1631 = vst.msk [vmem:[%s6673_s2] sm:$0xf] %vm1630_vm5, %v1628_v28  ;;  %v1696_v53 = vmax.f32 %v1694_v10, %v1695_v33  ;;  %v1701_v44 = vsel %vm267_vm0, %v1657_v8, -inf  ;;  %v1703_v60 = vsel %vm267_vm0, %v1666_v41, -inf  ;;  %v1744_v52 = vsel %vm267_vm0, %v2729_v7, -inf }
 0x12b   :  { %v1629_v31 = vsel %vm1627_vm4, %v5508_v21, %v1618_v58  ;;  %v1693_v24 = vmax.f32 %v1691_v40, %v1692_v18  ;;  %v1704_v21 = vsel %vm267_vm0, %v1675_v46, -inf  ;;  %v1745_v35 = vmax.f32 %v1743_v2, %v1744_v52  ;;  %v2737_v49 = vld [vmem:[%s6671_s0 + $0x4e] sm:$0x3]  ;;  %v2727_v13 = vld [vmem:[%s6671_s0 + $0x12] sm:$0x3] }
 0x12c   :  { %1632 = vst.msk [vmem:[%s6673_s2 + $0x4] sm:$0xf] %vm1630_vm5, %v1629_v31  ;;  %v1698_v30 = vmax.f32 %v1696_v53, %v1697_v5  ;;  %v1746_v36 = vsel %vm267_vm0, %v2735_v61, -inf  ;;  %v5633_v47 = vsel %vm267_vm0, %v1684_v62, -inf  ;;  %v1748_v22 = vsel %vm267_vm0, %v2741_v50, -inf }
 0x12d   :  { %v1752_v54 = vsel %vm267_vm0, %v2724_v6, -inf  ;;  %v1753_v3 = vsel %vm267_vm0, %v2730_v45, -inf  ;;  %v5645_v57 = vsel %vm267_vm0, %v1693_v24, -inf  ;;  %v1747_v29 = vmax.f32 %v1745_v35, %v1746_v36  ;;  %v2743_v39 = vld [vmem:[%s6671_s0 + $0x6e] sm:$0x3] }
 0x12e   :  { %v1700_v55 = vmax.f32 %v1698_v30, %v1699_v1  ;;  %v1754_v20 = vmax.f32 %v1752_v54, %v1753_v3  ;;  %v1750_v0 = vsel %vm267_vm0, %v2747_v4, -inf  ;;  %v1755_v51 = vsel %vm267_vm0, %v2736_v56, -inf  ;;  %v2732_v14 = vld [vmem:[%s6671_s0 + $0x30] sm:$0x3]  ;;  %v2749_v41 = vld [vmem:[%s6671_s0 + $0x8e] sm:$0x3] }
 0x12f   :  { %v1757_v59 = vsel %vm267_vm0, %v2742_v12, -inf  ;;  %v1761_v25 = vsel %vm267_vm0, %v2725_v19, -inf  ;;  %v2738_v43 = vld [vmem:[%s6671_s0 + $0x50] sm:$0x3]  ;;  %v1749_v32 = vmax.f32 %v1747_v29, %v1748_v22  ;;  %v1762_v37 = vsel %vm267_vm0, %v2731_v11, -inf }
 0x130   :  { %v1702_v48 = vmax.f32 %v1700_v55, %v1701_v44  ;;  %v1756_v27 = vmax.f32 %v1754_v20, %v1755_v51  ;;  %v1710_v34 = vmax.f32 %v5633_v47, %v5645_v57  ;;  %v2744_v8 = vld [vmem:[%s6671_s0 + $0x70] sm:$0x3]  ;;  %v1759_v15 = vsel %vm267_vm0, %v2748_v16, -inf  ;;  %v2728_v23 = vld [vmem:[%s6671_s0 + $0x14] sm:$0x3] }
 0x131   :  { %v1763_v63 = vmax.f32 %v1761_v25, %v1762_v37  ;;  %v1764_v10 = vsel %vm267_vm0, %v2737_v49, -inf  ;;  %v2733_v42 = vld [vmem:[%s6671_s0 + $0x32] sm:$0x3]  ;;  %v1766_v38 = vsel %vm267_vm0, %v2743_v39, -inf  ;;  %v1770_v7 = vsel %vm267_vm0, %v2726_v9, -inf }
 0x132   :  { %v1707_v17 = vsel %vm267_vm0, %v1702_v48, -inf  ;;  %v1758_v26 = vmax.f32 %v1756_v27, %v1757_v59  ;;  %v2734_v18 = vld [vmem:[%s6671_s0 + $0x34] sm:$0x3]  ;;  %v2739_v33 = vld [vmem:[%s6671_s0 + $0x52] sm:$0x3]  ;;  %v1771_v6 = vsel %vm267_vm0, %v2732_v14, -inf  ;;  %v1751_v62 = vmax.f32 %v1749_v32, %v1750_v0 }
 0x133   :  { %v1708_v46 = vmax.f32 %v1703_v60, %v1707_v17  ;;  %v1765_v5 = vmax.f32 %v1763_v63, %v1764_v10  ;;  %v1773_v45 = vsel %vm267_vm0, %v2738_v43, -inf  ;;  %v2745_v58 = vld [vmem:[%s6671_s0 + $0x72] sm:$0x3]  ;;  %v2750_v28 = vld [vmem:[%s6671_s0 + $0x90] sm:$0x3]  ;;  %v1768_v40 = vsel %vm267_vm0, %v2749_v41, -inf }
 0x134   :  { %v1772_v61 = vmax.f32 %v1770_v7, %v1771_v6  ;;  %v1775_v50 = vsel %vm267_vm0, %v2744_v8, -inf  ;;  %v2740_v1 = vld [vmem:[%s6671_s0 + $0x54] sm:$0x3]  ;;  %v1779_v2 = vsel %vm267_vm0, %v2727_v13, -inf  ;;  %v1780_v31 = vsel %vm267_vm0, %v2733_v42, -inf }
 0x135   :  { %v1709_v53 = vmax.f32 %v1708_v46, %v1704_v21  ;;  %v2746_v44 = vld [vmem:[%s6671_s0 + $0x74] sm:$0x3]  ;;  %v1767_v19 = vmax.f32 %v1765_v5, %v1766_v38  ;;  %v2751_v24 = vld [vmem:[%s6671_s0 + $0x92] sm:$0x3]  ;;  %v1760_v56 = vmax.f32 %v1758_v26, %v1759_v15  ;;  %v1781_v52 = vmax.f32 %v1779_v2, %v1780_v31  ;;  %v2753_v47 = vld [vmem:[%s6671_s0 + $0x16] sm:$0x3] }
 0x136   :  { %v2752_v60 = vld [vmem:[%s6671_s0 + $0x94] sm:$0x3]  ;;  %v1774_v12 = vmax.f32 %v1772_v61, %v1773_v45  ;;  %v1782_v30 = vsel %vm267_vm0, %v2739_v33, -inf  ;;  %v1777_v4 = vsel %vm267_vm0, %v2750_v28, -inf  ;;  %v1784_v35 = vsel %vm267_vm0, %v2745_v58, -inf }
 0x137   :  { %v1769_v21 = vmax.f32 %v1767_v19, %v1768_v40  ;;  %v1788_v36 = vsel %vm267_vm0, %v2728_v23, -inf  ;;  %v1783_v11 = vmax.f32 %v1781_v52, %v1782_v30  ;;  %v1789_v22 = vsel %vm267_vm0, %v2734_v18, -inf  ;;  %v2758_v3 = vld [vmem:[%s6671_s0 + $0x36] sm:$0x3]  ;;  %v2754_v20 = vld [vmem:[%s6671_s0 + $0x18] sm:$0x3] }
 0x138   :  { %v1776_v9 = vmax.f32 %v1774_v12, %v1775_v50  ;;  %v1791_v54 = vsel %vm267_vm0, %v2740_v1, -inf  ;;  %v2763_v55 = vld [vmem:[%s6671_s0 + $0x56] sm:$0x3]  ;;  %v5734_v57 = vmax.f32 %v1709_v53, %v1710_v34  ;;  %v1786_v49 = vsel %vm267_vm0, %v2751_v24, -inf  ;;  %v2759_v25 = vld [vmem:[%s6671_s0 + $0x38] sm:$0x3] }
 0x139   :  { %v1790_v16 = vmax.f32 %v1788_v36, %v1789_v22  ;;  %v1793_v29 = vsel %vm267_vm0, %v2746_v44, -inf  ;;  %v1785_v0 = vmax.f32 %v1783_v11, %v1784_v35  ;;  %v1795_v51 = vsel %vm267_vm0, %v2752_v60, -inf  ;;  %v2768_v48 = vld [vmem:[%s6671_s0 + $0x76] sm:$0x3]  ;;  %v2764_v14 = vld [vmem:[%s6671_s0 + $0x58] sm:$0x3] }
 0x13a   :  { %v1778_v39 = vmax.f32 %v1776_v9, %v1777_v4  ;;  %v1797_v59 = vsel %vm267_vm0, %v1751_v62, -inf  ;;  %v1834_v43 = vsel %vm267_vm0, %v2753_v47, -inf  ;;  %v1835_v32 = vsel %vm267_vm0, %v2758_v3, -inf  ;;  %v2755_v41 = vld [vmem:[%s6671_s0 + $0x1a] sm:$0x3] }
 0x13b   :  { %v1792_v13 = vmax.f32 %v1790_v16, %v1791_v54  ;;  %v1837_v27 = vsel %vm267_vm0, %v2763_v55, -inf  ;;  %v1787_v37 = vmax.f32 %v1785_v0, %v1786_v49  ;;  %v5756_v34 = vsel %vm267_vm0, %v1769_v21, -inf  ;;  %v2760_v15 = vld [vmem:[%s6671_s0 + $0x3a] sm:$0x3]  ;;  %v2769_v23 = vld [vmem:[%s6671_s0 + $0x78] sm:$0x3] }
 0x13c   :  { %v5759_v8 = vsel %vm267_vm0, %v1778_v39, -inf  ;;  %v1836_v63 = vmax.f32 %v1834_v43, %v1835_v32  ;;  %v1798_v17 = vsel %vm267_vm0, %v1760_v56, -inf  ;;  %v1839_v42 = vsel %vm267_vm0, %v2768_v48, -inf  ;;  %v2756_v7 = vld [vmem:[%s6671_s0 + $0x1c] sm:$0x3] }
 0x13d   :  { %v1794_v10 = vmax.f32 %v1792_v13, %v1793_v29  ;;  %v1843_v26 = vsel %vm267_vm0, %v2754_v20, -inf  ;;  %v1801_v38 = vsel %vm267_vm0, %v1787_v37, -inf  ;;  %v2765_v46 = vld [vmem:[%s6671_s0 + $0x5a] sm:$0x3]  ;;  %v1844_v33 = vsel %vm267_vm0, %v2759_v25, -inf }
 0x13e   :  { %v1838_v18 = vmax.f32 %v1836_v63, %v1837_v27  ;;  %v1846_v5 = vsel %vm267_vm0, %v2764_v14, -inf  ;;  %v1802_v45 = vmax.f32 %v1797_v59, %v1801_v38  ;;  %v1806_v58 = vmax.f32 %v5756_v34, %v5759_v8  ;;  %v2770_v28 = vld [vmem:[%s6671_s0 + $0x7a] sm:$0x3]  ;;  %v2773_v62 = vld [vmem:[%s6671_s0 + $0x96] sm:$0x3] }
 0x13f   :  { %v1796_v6 = vmax.f32 %v1794_v10, %v1795_v51  ;;  %v2774_v40 = vld [vmem:[%s6671_s0 + $0x98] sm:$0x3]  ;;  %v1845_v61 = vmax.f32 %v1843_v26, %v1844_v33  ;;  %v2757_v50 = vld [vmem:[%s6671_s0 + $0x1e] sm:$0x3]  ;;  %v2761_v53 = vld [vmem:[%s6671_s0 + $0x3c] sm:$0x3] }
 0x140   :  { %v1840_v1 = vmax.f32 %v1838_v18, %v1839_v42  ;;  %v1848_v44 = vsel %vm267_vm0, %v2769_v23, -inf  ;;  %v1852_v19 = vsel %vm267_vm0, %v2755_v41, -inf  ;;  %v1853_v2 = vsel %vm267_vm0, %v2760_v15, -inf  ;;  %v2766_v24 = vld [vmem:[%s6671_s0 + $0x5c] sm:$0x3] }
 0x141   :  { %v1803_v31 = vsel %vm267_vm0, %v1796_v6, -inf  ;;  %v2775_v60 = vld [vmem:[%s6671_s0 + $0x9a] sm:$0x3]  ;;  %v1847_v56 = vmax.f32 %v1845_v61, %v1846_v5  ;;  %v1854_v12 = vmax.f32 %v1852_v19, %v1853_v2  ;;  %v1855_v52 = vsel %vm267_vm0, %v2765_v46, -inf  ;;  %v2771_v21 = vld [vmem:[%s6671_s0 + $0x7c] sm:$0x3] }
 0x142   :  { %v1804_v30 = vmax.f32 %v1798_v17, %v1803_v31  ;;  %v1841_v4 = vsel %vm267_vm0, %v2773_v62, -inf  ;;  %v1850_v35 = vsel %vm267_vm0, %v2774_v40, -inf  ;;  %v1857_v36 = vsel %vm267_vm0, %v2770_v28, -inf  ;;  %v2762_v47 = vld [vmem:[%s6671_s0 + $0x3e] sm:$0x3] }
 0x143   :  { %v2767_v9 = vld [vmem:[%s6671_s0 + $0x5e] sm:$0x3]  ;;  %v1849_v11 = vmax.f32 %v1847_v56, %v1848_v44  ;;  %v1856_v22 = vmax.f32 %v1854_v12, %v1855_v52  ;;  %v1861_v54 = vsel %vm267_vm0, %v2756_v7, -inf  ;;  %v1862_v3 = vsel %vm267_vm0, %v2761_v53, -inf  ;;  %v2776_v16 = vld [vmem:[%s6671_s0 + $0x9c] sm:$0x3] }
 0x144   :  { %v1805_v55 = vmax.f32 %v1802_v45, %v1804_v30  ;;  %v2772_v49 = vld [vmem:[%s6671_s0 + $0x7e] sm:$0x3]  ;;  %v1859_v29 = vsel %vm267_vm0, %v2775_v60, -inf  ;;  %v1863_v20 = vmax.f32 %v1861_v54, %v1862_v3  ;;  %v1864_v39 = vsel %vm267_vm0, %v2766_v24, -inf  ;;  %v2778_v13 = vld [vmem:[%s6671_s0 + $0xa0] sm:$0x3] }
 0x145   :  { %v2777_v0 = vld [vmem:[%s6671_s0 + $0x9e] sm:$0x3]  ;;  %v1842_v51 = vmax.f32 %v1840_v1, %v1841_v4  ;;  %v1858_v59 = vmax.f32 %v1856_v22, %v1857_v36  ;;  %v1866_v25 = vsel %vm267_vm0, %v2771_v21, -inf  ;;  %v1870_v48 = vsel %vm267_vm0, %v2757_v50, -inf  ;;  %v2779_v37 = vld [vmem:[%s6671_s0 + $0xa2] sm:$0x3] }
 0x146   :  { %v1851_v14 = vmax.f32 %v1849_v11, %v1850_v35  ;;  %v1865_v43 = vmax.f32 %v1863_v20, %v1864_v39  ;;  %v1871_v32 = vsel %vm267_vm0, %v2762_v47, -inf  ;;  %v1873_v27 = vsel %vm267_vm0, %v2767_v9, -inf  ;;  %v2783_v34 = vld [vmem:[%s6671_s0 + $0xc0] sm:$0x3]  ;;  %v2784_v17 = vld [vmem:[%s6671_s0 + $0xc2] sm:$0x3] }
 0x147   :  { %v2788_v8 = vld [vmem:[%s6671_s0 + $0xe0] sm:$0x3]  ;;  %v5851_v41 = vmax.f32 %v1805_v55, %v1806_v58  ;;  %v1860_v15 = vmax.f32 %v1858_v59, %v1859_v29  ;;  %v1868_v63 = vsel %vm267_vm0, %v2776_v16, -inf  ;;  %v1872_v10 = vmax.f32 %v1870_v48, %v1871_v32  ;;  %v2789_v23 = vld [vmem:[%s6671_s0 + $0xe2] sm:$0x3] }
 0x148   :  { %v1867_v42 = vmax.f32 %v1865_v43, %v1866_v25  ;;  %v1875_v26 = vsel %vm267_vm0, %v2772_v49, -inf  ;;  %v1877_v38 = vsel %vm267_vm0, %v2777_v0, -inf  ;;  %v2793_v7 = vld [vmem:[%s6671_s0 + $0x100] sm:$0x3]  ;;  %v1919_v46 = vsel %vm267_vm0, %v2778_v13, -inf }
 0x149   :  { %v1874_v18 = vmax.f32 %v1872_v10, %v1873_v27  ;;  %v1879_v33 = vsel %vm267_vm0, %v1842_v51, -inf  ;;  %v2780_v5 = vld [vmem:[%s6671_s0 + $0xa4] sm:$0x3]  ;;  %v2794_v6 = vld [vmem:[%s6671_s0 + $0x102] sm:$0x3]  ;;  %v1920_v45 = vsel %vm267_vm0, %v2783_v34, -inf }
 0x14a   :  { %v1922_v58 = vsel %vm267_vm0, %v2788_v8, -inf  ;;  %v1869_v28 = vmax.f32 %v1867_v42, %v1868_v63  ;;  %v1880_v62 = vsel %vm267_vm0, %v1851_v14, -inf  ;;  %v1881_v40 = vsel %vm267_vm0, %v1860_v15, -inf  ;;  %v2798_v61 = vld [vmem:[%s6671_s0 + $0x120] sm:$0x3] }
 0x14b   :  { %v2803_v50 = vld [vmem:[%s6671_s0 + $0x140] sm:$0x3]  ;;  %v1921_v53 = vmax.f32 %v1919_v46, %v1920_v45  ;;  %v1876_v1 = vmax.f32 %v1874_v18, %v1875_v26  ;;  %v2785_v44 = vld [vmem:[%s6671_s0 + $0xc4] sm:$0x3]  ;;  %v1924_v19 = vsel %vm267_vm0, %v2793_v7, -inf  ;;  %v1930_v2 = vsel %vm267_vm0, %v2779_v37, -inf }
 0x14c   :  { %v1931_v31 = vsel %vm267_vm0, %v2784_v17, -inf  ;;  %v1882_v24 = vsel %vm267_vm0, %v1869_v28, -inf  ;;  %v2781_v60 = vld [vmem:[%s6671_s0 + $0xa6] sm:$0x3]  ;;  %v2790_v56 = vld [vmem:[%s6671_s0 + $0xe4] sm:$0x3] }
 0x14d   :  { %v2799_v12 = vld [vmem:[%s6671_s0 + $0x122] sm:$0x3]  ;;  %v1923_v52 = vmax.f32 %v1921_v53, %v1922_v58  ;;  %v1932_v30 = vmax.f32 %v1930_v2, %v1931_v31  ;;  %v1933_v21 = vsel %vm267_vm0, %v2789_v23, -inf  ;;  %v1878_v4 = vmax.f32 %v1876_v1, %v1877_v38  ;;  %v2786_v35 = vld [vmem:[%s6671_s0 + $0xc6] sm:$0x3] }
 0x14e   :  { %v1926_v36 = vsel %vm267_vm0, %v2798_v61, -inf  ;;  %v5905_v47 = vsel %vm267_vm0, %v2803_v50, -inf  ;;  %v1935_v9 = vsel %vm267_vm0, %v2794_v6, -inf  ;;  %v1886_v11 = vmax.f32 %v1881_v40, %v1882_v24  ;;  %v2795_v22 = vld [vmem:[%s6671_s0 + $0x104] sm:$0x3] }
 0x14f   :  { %v2804_v54 = vld [vmem:[%s6671_s0 + $0x142] sm:$0x3]  ;;  %v1925_v3 = vmax.f32 %v1923_v52, %v1924_v19  ;;  %v1934_v55 = vmax.f32 %v1932_v30, %v1933_v21  ;;  %v1941_v49 = vsel %vm267_vm0, %v2780_v5, -inf  ;;  %v1883_v16 = vsel %vm267_vm0, %v1878_v4, -inf  ;;  %v2800_v29 = vld [vmem:[%s6671_s0 + $0x124] sm:$0x3] }
 0x150   :  { %v1937_v20 = vsel %vm267_vm0, %v2799_v12, -inf  ;;  %v1942_v39 = vsel %vm267_vm0, %v2785_v44, -inf  ;;  %v1944_v0 = vsel %vm267_vm0, %v2790_v56, -inf  ;;  %v1884_v51 = vmax.f32 %v1879_v33, %v1883_v16  ;;  %v2782_v59 = vld [vmem:[%s6671_s0 + $0xa8] sm:$0x3] }
 0x151   :  { %v2787_v25 = vld [vmem:[%s6671_s0 + $0xc8] sm:$0x3]  ;;  %v2791_v48 = vld [vmem:[%s6671_s0 + $0xe6] sm:$0x3]  ;;  %v2805_v14 = vld [vmem:[%s6671_s0 + $0x144] sm:$0x3]  ;;  %v1927_v43 = vmax.f32 %v1925_v3, %v1926_v36  ;;  %v1936_v32 = vmax.f32 %v1934_v55, %v1935_v9  ;;  %v1943_v27 = vmax.f32 %v1941_v49, %v1942_v39 }
 0x152   :  { %v2796_v13 = vld [vmem:[%s6671_s0 + $0x106] sm:$0x3]  ;;  %v1939_v34 = vsel %vm267_vm0, %v2804_v54, -inf  ;;  %v1946_v8 = vsel %vm267_vm0, %v2795_v22, -inf  ;;  %v1952_v15 = vsel %vm267_vm0, %v2781_v60, -inf  ;;  %v1953_v63 = vsel %vm267_vm0, %v2786_v35, -inf }
 0x153   :  { %v2801_v37 = vld [vmem:[%s6671_s0 + $0x126] sm:$0x3]  ;;  %v1885_v10 = vmax.f32 %v1884_v51, %v1880_v62  ;;  %v2792_v17 = vld [vmem:[%s6671_s0 + $0xe8] sm:$0x3]  ;;  %v1938_v42 = vmax.f32 %v1936_v32, %v1937_v20  ;;  %v1945_v26 = vmax.f32 %v1943_v27, %v1944_v0  ;;  %v1948_v38 = vsel %vm267_vm0, %v2800_v29, -inf }
 0x154   :  { %v2797_v23 = vld [vmem:[%s6671_s0 + $0x108] sm:$0x3]  ;;  %v2806_v46 = vld [vmem:[%s6671_s0 + $0x146] sm:$0x3]  ;;  %v1929_v18 = vmax.f32 %v1927_v43, %v5905_v47  ;;  %v1950_v33 = vsel %vm267_vm0, %v2805_v14, -inf  ;;  %v1954_v5 = vmax.f32 %v1952_v15, %v1953_v63  ;;  %v1955_v6 = vsel %vm267_vm0, %v2791_v48, -inf }
 0x155   :  { %v2802_v7 = vld [vmem:[%s6671_s0 + $0x128] sm:$0x3]  ;;  %v5960_v45 = vmax.f32 %v1885_v10, %v1886_v11  ;;  %v1947_v28 = vmax.f32 %v1945_v26, %v1946_v8  ;;  %v1957_v62 = vsel %vm267_vm0, %v2796_v13, -inf  ;;  %v1959_v40 = vsel %vm267_vm0, %v2801_v37, -inf  ;;  %v2808_v61 = vld [vmem:[%s6671_s0 + $0xaa] sm:$0x3] }
 0x156   :  { %v2807_v58 = vld [vmem:[%s6671_s0 + $0x148] sm:$0x3]  ;;  %v1956_v50 = vmax.f32 %v1954_v5, %v1955_v6  ;;  %v1963_v53 = vsel %vm267_vm0, %v2782_v59, -inf  ;;  %v1964_v1 = vsel %vm267_vm0, %v2787_v25, -inf  ;;  %v1966_v44 = vsel %vm267_vm0, %v2792_v17, -inf }
 0x157   :  { %v2814_v19 = vld [vmem:[%s6671_s0 + $0xca] sm:$0x3]  ;;  %v1940_v2 = vmax.f32 %v1938_v42, %v1939_v34  ;;  %v1949_v31 = vmax.f32 %v1947_v28, %v1948_v38  ;;  %v1961_v24 = vsel %vm267_vm0, %v2806_v46, -inf  ;;  %v1965_v60 = vmax.f32 %v1963_v53, %v1964_v1  ;;  %v2809_v56 = vld [vmem:[%s6671_s0 + $0xac] sm:$0x3] }
 0x158   :  { %v2820_v12 = vld [vmem:[%s6671_s0 + $0xea] sm:$0x3]  ;;  %v1958_v52 = vmax.f32 %v1956_v50, %v1957_v62  ;;  %v1968_v30 = vsel %vm267_vm0, %v2797_v23, -inf  ;;  %v1970_v21 = vsel %vm267_vm0, %v2802_v7, -inf  ;;  %v1972_v4 = vsel %vm267_vm0, %v2807_v58, -inf }
 0x159   :  { %v2826_v35 = vld [vmem:[%s6671_s0 + $0x10a] sm:$0x3]  ;;  %v1951_v36 = vmax.f32 %v1949_v31, %v1950_v33  ;;  %v1967_v47 = vmax.f32 %v1965_v60, %v1966_v44  ;;  %v2815_v9 = vld [vmem:[%s6671_s0 + $0xcc] sm:$0x3]  ;;  %v2020_v22 = vsel %vm267_vm0, %v2808_v61, -inf  ;;  %v2021_v54 = vsel %vm267_vm0, %v2814_v19, -inf }
 0x15a   :  { %v2821_v11 = vld [vmem:[%s6671_s0 + $0xec] sm:$0x3]  ;;  %v1960_v3 = vmax.f32 %v1958_v52, %v1959_v40  ;;  %v1974_v55 = vsel %vm267_vm0, %v1929_v18, -inf  ;;  %v2810_v49 = vld [vmem:[%s6671_s0 + $0xae] sm:$0x3]  ;;  %v2022_v20 = vmax.f32 %v2020_v22, %v2021_v54  ;;  %v2023_v39 = vsel %vm267_vm0, %v2820_v12, -inf }
 0x15b   :  { %v2827_v16 = vld [vmem:[%s6671_s0 + $0x10c] sm:$0x3]  ;;  %v2832_v29 = vld [vmem:[%s6671_s0 + $0x12a] sm:$0x3]  ;;  %v1969_v0 = vmax.f32 %v1967_v47, %v1968_v30  ;;  %v1975_v51 = vsel %vm267_vm0, %v1940_v2, -inf  ;;  %v6010_v59 = vsel %vm267_vm0, %v1951_v36, -inf }
 0x15c   :  { %v2838_v25 = vld [vmem:[%s6671_s0 + $0x14a] sm:$0x3]  ;;  %v2025_v48 = vsel %vm267_vm0, %v2826_v35, -inf  ;;  %v1962_v13 = vmax.f32 %v1960_v3, %v1961_v24  ;;  %v2816_v14 = vld [vmem:[%s6671_s0 + $0xce] sm:$0x3]  ;;  %v2024_v32 = vmax.f32 %v2022_v20, %v2023_v39  ;;  %v2031_v27 = vsel %vm267_vm0, %v2809_v56, -inf }
 0x15d   :  { %v2833_v43 = vld [vmem:[%s6671_s0 + $0x12c] sm:$0x3]  ;;  %v2032_v37 = vsel %vm267_vm0, %v2815_v9, -inf  ;;  %v1971_v34 = vmax.f32 %v1969_v0, %v1970_v21  ;;  %v2811_v8 = vld [vmem:[%s6671_s0 + $0xb0] sm:$0x3]  ;;  %v2027_v10 = vsel %vm267_vm0, %v2832_v29, -inf }
 0x15e   :  { %v2822_v15 = vld [vmem:[%s6671_s0 + $0xee] sm:$0x3]  ;;  %v2839_v63 = vld [vmem:[%s6671_s0 + $0x14c] sm:$0x3]  ;;  %v2033_v17 = vmax.f32 %v2031_v27, %v2032_v37  ;;  %v2034_v23 = vsel %vm267_vm0, %v2821_v11, -inf  ;;  %v1977_v42 = vsel %vm267_vm0, %v1962_v13, -inf  ;;  %v2026_v38 = vmax.f32 %v2024_v32, %v2025_v48 }
 0x15f   :  { %v2817_v26 = vld [vmem:[%s6671_s0 + $0xd0] sm:$0x3]  ;;  %v6040_v7 = vsel %vm267_vm0, %v2838_v25, -inf  ;;  %v2036_v46 = vsel %vm267_vm0, %v2827_v16, -inf  ;;  %v1973_v18 = vmax.f32 %v1971_v34, %v1972_v4  ;;  %v2828_v33 = vld [vmem:[%s6671_s0 + $0x10e] sm:$0x3]  ;;  %v1981_v19 = vmax.f32 %v6010_v59, %v1977_v42 }
 0x160   :  { %v2834_v5 = vld [vmem:[%s6671_s0 + $0x12e] sm:$0x3]  ;;  %v2035_v6 = vmax.f32 %v2033_v17, %v2034_v23  ;;  %v2038_v58 = vsel %vm267_vm0, %v2833_v43, -inf  ;;  %v2042_v28 = vsel %vm267_vm0, %v2810_v49, -inf  ;;  %v2812_v62 = vld [vmem:[%s6671_s0 + $0xb2] sm:$0x3]  ;;  %v6057_v61 = vmax.f32 %v2026_v38, %v2027_v10 }
 0x161   :  { %v2823_v40 = vld [vmem:[%s6671_s0 + $0xf0] sm:$0x3]  ;;  %v6060_v50 = vsel %vm267_vm0, %v2839_v63, -inf  ;;  %v2043_v53 = vsel %vm267_vm0, %v2816_v14, -inf  ;;  %v2045_v1 = vsel %vm267_vm0, %v2822_v15, -inf  ;;  %v1978_v44 = vsel %vm267_vm0, %v1973_v18, -inf }
 0x162   :  { %v2818_v2 = vld [vmem:[%s6671_s0 + $0xd2] sm:$0x3]  ;;  %v2829_v31 = vld [vmem:[%s6671_s0 + $0x110] sm:$0x3]  ;;  %v2840_v24 = vld [vmem:[%s6671_s0 + $0x14e] sm:$0x3]  ;;  %v2037_v60 = vmax.f32 %v2035_v6, %v2036_v46  ;;  %v2044_v56 = vmax.f32 %v2042_v28, %v2043_v53  ;;  %v1979_v12 = vmax.f32 %v1974_v55, %v1978_v44  ;;  %v2030_v16 = vmax.f32 %v6057_v61, %v6040_v7 }
 0x163   :  { %v2835_v52 = vld [vmem:[%s6671_s0 + $0x130] sm:$0x3]  ;;  %v2047_v30 = vsel %vm267_vm0, %v2828_v33, -inf  ;;  %v2049_v21 = vsel %vm267_vm0, %v2834_v5, -inf  ;;  %v2053_v4 = vsel %vm267_vm0, %v2811_v8, -inf  ;;  %v2054_v22 = vsel %vm267_vm0, %v2817_v26, -inf }
 0x164   :  { %v2813_v35 = vld [vmem:[%s6671_s0 + $0xb4] sm:$0x3]  ;;  %v2824_v47 = vld [vmem:[%s6671_s0 + $0xf2] sm:$0x3]  ;;  %v2039_v9 = vmax.f32 %v2037_v60, %v2038_v58  ;;  %v2046_v11 = vmax.f32 %v2044_v56, %v2045_v1  ;;  %v2056_v54 = vsel %vm267_vm0, %v2823_v40, -inf  ;;  %v1980_v3 = vmax.f32 %v1979_v12, %v1975_v51 }
 0x165   :  { %v2819_v36 = vld [vmem:[%s6671_s0 + $0xd4] sm:$0x3]  ;;  %v2841_v49 = vld [vmem:[%s6671_s0 + $0x150] sm:$0x3]  ;;  %v2051_v29 = vsel %vm267_vm0, %v2840_v24, -inf  ;;  %v2055_v20 = vmax.f32 %v2053_v4, %v2054_v22  ;;  %v2058_v51 = vsel %vm267_vm0, %v2829_v31, -inf }
 0x166   :  { %v2825_v55 = vld [vmem:[%s6671_s0 + $0xf4] sm:$0x3]  ;;  %v2830_v39 = vld [vmem:[%s6671_s0 + $0x112] sm:$0x3]  ;;  %v2048_v0 = vmax.f32 %v2046_v11, %v2047_v30  ;;  %v2060_v59 = vsel %vm267_vm0, %v2835_v52, -inf  ;;  %v2064_v25 = vsel %vm267_vm0, %v2812_v62, -inf  ;;  %v2041_v14 = vmax.f32 %v2039_v9, %v6060_v50 }
 0x167   :  { %v2831_v48 = vld [vmem:[%s6671_s0 + $0x114] sm:$0x3]  ;;  %v2836_v13 = vld [vmem:[%s6671_s0 + $0x132] sm:$0x3]  ;;  %v2057_v43 = vmax.f32 %v2055_v20, %v2056_v54  ;;  %v2065_v32 = vsel %vm267_vm0, %v2818_v2, -inf  ;;  %v2067_v27 = vsel %vm267_vm0, %v2824_v47, -inf  ;;  %v6116_v37 = vmax.f32 %v1980_v3, %v1981_v19 }
 0x168   :  { %v2837_v34 = vld [vmem:[%s6671_s0 + $0x134] sm:$0x3]  ;;  %v2842_v8 = vld [vmem:[%s6671_s0 + $0x152] sm:$0x3]  ;;  %v2050_v15 = vmax.f32 %v2048_v0, %v2049_v21  ;;  %v2062_v63 = vsel %vm267_vm0, %v2841_v49, -inf  ;;  %v2066_v10 = vmax.f32 %v2064_v25, %v2065_v32  ;;  %v2069_v42 = vsel %vm267_vm0, %v2830_v39, -inf }
 0x169   :  { %v2843_v17 = vld [vmem:[%s6671_s0 + $0x154] sm:$0x3]  ;;  %v2059_v23 = vmax.f32 %v2057_v43, %v2058_v51  ;;  %v2075_v26 = vsel %vm267_vm0, %v2813_v35, -inf  ;;  %v2076_v38 = vsel %vm267_vm0, %v2819_v36, -inf  ;;  %v2071_v46 = vsel %vm267_vm0, %v2836_v13, -inf }
 0x16a   :  { %v2068_v7 = vmax.f32 %v2066_v10, %v2067_v27  ;;  %v2077_v18 = vmax.f32 %v2075_v26, %v2076_v38  ;;  %v2078_v33 = vsel %vm267_vm0, %v2825_v55, -inf  ;;  %v2844_v5 = vld [vmem:[%s6671_s0 + $0xb6] sm:$0x3]  ;;  %v2052_v58 = vmax.f32 %v2050_v15, %v2051_v29  ;;  %v2845_v19 = vld [vmem:[%s6671_s0 + $0xb8] sm:$0x3] }
 0x16b   :  { %v2849_v6 = vld [vmem:[%s6671_s0 + $0xd6] sm:$0x3]  ;;  %v2061_v28 = vmax.f32 %v2059_v23, %v2060_v59  ;;  %v2073_v62 = vsel %vm267_vm0, %v2842_v8, -inf  ;;  %v2080_v40 = vsel %vm267_vm0, %v2831_v48, -inf  ;;  %v2082_v1 = vsel %vm267_vm0, %v2837_v34, -inf }
 0x16c   :  { %v2854_v61 = vld [vmem:[%s6671_s0 + $0xf6] sm:$0x3]  ;;  %v2070_v50 = vmax.f32 %v2068_v7, %v2069_v42  ;;  %v2079_v53 = vmax.f32 %v2077_v18, %v2078_v33  ;;  %v2084_v44 = vsel %vm267_vm0, %v2843_v17, -inf  ;;  %v2850_v2 = vld [vmem:[%s6671_s0 + $0xd8] sm:$0x3]  ;;  %v6156_v60 = vsel %vm267_vm0, %v2030_v16, -inf }
 0x16d   :  { %v2859_v31 = vld [vmem:[%s6671_s0 + $0x116] sm:$0x3]  ;;  %v2063_v24 = vmax.f32 %v2061_v28, %v2062_v63  ;;  %v2128_v12 = vsel %vm267_vm0, %v2844_v5, -inf  ;;  %v2129_v52 = vsel %vm267_vm0, %v2849_v6, -inf  ;;  %v2855_v4 = vld [vmem:[%s6671_s0 + $0xf8] sm:$0x3] }
 0x16e   :  { %v2864_v56 = vld [vmem:[%s6671_s0 + $0x136] sm:$0x3]  ;;  %v2072_v30 = vmax.f32 %v2070_v50, %v2071_v46  ;;  %v2081_v21 = vmax.f32 %v2079_v53, %v2080_v40  ;;  %v2130_v36 = vmax.f32 %v2128_v12, %v2129_v52  ;;  %v2131_v47 = vsel %vm267_vm0, %v2854_v61, -inf  ;;  %v2846_v49 = vld [vmem:[%s6671_s0 + $0xba] sm:$0x3] }
 0x16f   :  { %v2869_v35 = vld [vmem:[%s6671_s0 + $0x156] sm:$0x3]  ;;  %v2087_v9 = vsel %vm267_vm0, %v2041_v14, -inf  ;;  %v6172_v11 = vsel %vm267_vm0, %v2052_v58, -inf  ;;  %v6175_v22 = vsel %vm267_vm0, %v2063_v24, -inf  ;;  %v2133_v54 = vsel %vm267_vm0, %v2859_v31, -inf }
 0x170   :  { %v2074_v3 = vmax.f32 %v2072_v30, %v2073_v62  ;;  %v2083_v55 = vmax.f32 %v2081_v21, %v2082_v1  ;;  %v2860_v16 = vld [vmem:[%s6671_s0 + $0x118] sm:$0x3]  ;;  %v2132_v29 = vmax.f32 %v2130_v36, %v2131_v47  ;;  %v2135_v20 = vsel %vm267_vm0, %v2864_v56, -inf  ;;  %v2851_v39 = vld [vmem:[%s6671_s0 + $0xda] sm:$0x3] }
 0x171   :  { %v6189_v0 = vsel %vm267_vm0, %v2869_v35, -inf  ;;  %v2139_v51 = vsel %vm267_vm0, %v2845_v19, -inf  ;;  %v2140_v59 = vsel %vm267_vm0, %v2850_v2, -inf  ;;  %v2142_v25 = vsel %vm267_vm0, %v2855_v4, -inf  ;;  %v2847_v14 = vld [vmem:[%s6671_s0 + $0xbc] sm:$0x3] }
 0x172   :  { %v2085_v48 = vmax.f32 %v2083_v55, %v2084_v44  ;;  %v2090_v13 = vsel %vm267_vm0, %v2074_v3, -inf  ;;  %v2856_v43 = vld [vmem:[%s6671_s0 + $0xfa] sm:$0x3]  ;;  %v2865_v32 = vld [vmem:[%s6671_s0 + $0x138] sm:$0x3]  ;;  %v2134_v27 = vmax.f32 %v2132_v29, %v2133_v54  ;;  %v2141_v34 = vmax.f32 %v2139_v51, %v2140_v59 }
 0x173   :  { %v2091_v8 = vmax.f32 %v6156_v60, %v2090_v13  ;;  %v2095_v15 = vmax.f32 %v6172_v11, %v6175_v22  ;;  %v2861_v63 = vld [vmem:[%s6671_s0 + $0x11a] sm:$0x3]  ;;  %v2870_v10 = vld [vmem:[%s6671_s0 + $0x158] sm:$0x3]  ;;  %v2144_v17 = vsel %vm267_vm0, %v2860_v16, -inf  ;;  %v2150_v23 = vsel %vm267_vm0, %v2846_v49, -inf }
 0x174   :  { %v2092_v42 = vsel %vm267_vm0, %v2085_v48, -inf  ;;  %v2852_v26 = vld [vmem:[%s6671_s0 + $0xdc] sm:$0x3]  ;;  %v2866_v38 = vld [vmem:[%s6671_s0 + $0x13a] sm:$0x3]  ;;  %v2136_v7 = vmax.f32 %v2134_v27, %v2135_v20  ;;  %v2143_v46 = vmax.f32 %v2141_v34, %v2142_v25  ;;  %v2151_v18 = vsel %vm267_vm0, %v2851_v39, -inf }
 0x175   :  { %v2093_v33 = vmax.f32 %v2087_v9, %v2092_v42  ;;  %v2848_v5 = vld [vmem:[%s6671_s0 + $0xbe] sm:$0x3]  ;;  %v2857_v58 = vld [vmem:[%s6671_s0 + $0xfc] sm:$0x3]  ;;  %v2871_v28 = vld [vmem:[%s6671_s0 + $0x15a] sm:$0x3]  ;;  %v2152_v40 = vmax.f32 %v2150_v23, %v2151_v18 }
 0x176   :  { %v2853_v6 = vld [vmem:[%s6671_s0 + $0xde] sm:$0x3]  ;;  %v2146_v62 = vsel %vm267_vm0, %v2865_v32, -inf  ;;  %v2153_v61 = vsel %vm267_vm0, %v2856_v43, -inf  ;;  %v2862_v50 = vld [vmem:[%s6671_s0 + $0x11c] sm:$0x3]  ;;  %v2138_v1 = vmax.f32 %v2136_v7, %v6189_v0  ;;  %v2145_v44 = vmax.f32 %v2143_v46, %v2144_v17 }
 0x177   :  { %v2867_v53 = vld [vmem:[%s6671_s0 + $0x13c] sm:$0x3]  ;;  %v2148_v19 = vsel %vm267_vm0, %v2870_v10, -inf  ;;  %v2155_v2 = vsel %vm267_vm0, %v2861_v63, -inf  ;;  %v2858_v31 = vld [vmem:[%s6671_s0 + $0xfe] sm:$0x3]  ;;  %v2154_v24 = vmax.f32 %v2152_v40, %v2153_v61  ;;  %v6260_v47 = vmax.f32 %v2091_v8, %v2093_v33 }
 0x178   :  { %v2157_v60 = vsel %vm267_vm0, %v2866_v38, -inf  ;;  %v2161_v56 = vsel %vm267_vm0, %v2847_v14, -inf  ;;  %v2162_v12 = vsel %vm267_vm0, %v2852_v26, -inf  ;;  %v2863_v52 = vld [vmem:[%s6671_s0 + $0x11e] sm:$0x3]  ;;  %v2147_v21 = vmax.f32 %v2145_v44, %v2146_v62 }
 0x179   :  { %v2872_v30 = vld [vmem:[%s6671_s0 + $0x15c] sm:$0x3]  ;;  %v2159_v4 = vsel %vm267_vm0, %v2871_v28, -inf  ;;  %v2163_v35 = vmax.f32 %v2161_v56, %v2162_v12  ;;  %v2164_v36 = vsel %vm267_vm0, %v2857_v58, -inf  ;;  %v2868_v9 = vld [vmem:[%s6671_s0 + $0x13e] sm:$0x3]  ;;  %v2156_v3 = vmax.f32 %v2154_v24, %v2155_v2 }
 0x17a   :  { %v2873_v54 = vld [vmem:[%s6671_s0 + $0x15e] sm:$0x3]  ;;  %v2166_v55 = vsel %vm267_vm0, %v2862_v50, -inf  ;;  %v2168_v49 = vsel %vm267_vm0, %v2867_v53, -inf  ;;  %v2149_v16 = vmax.f32 %v2147_v21, %v2148_v19  ;;  %v2172_v20 = vsel %vm267_vm0, %v2848_v5, -inf }
 0x17b   :  { %v2165_v29 = vmax.f32 %v2163_v35, %v2164_v36  ;;  %v2173_v39 = vsel %vm267_vm0, %v2853_v6, -inf  ;;  %v2874_v0 = vld [vmem:[%s6671_s0 + $0x160] sm:$0x3]  ;;  %v2158_v51 = vmax.f32 %v2156_v3, %v2157_v60  ;;  %v2170_v59 = vsel %vm267_vm0, %v2872_v30, -inf  ;;  %v2875_v13 = vld [vmem:[%s6671_s0 + $0x162] sm:$0x3] }
 0x17c   :  { %v2174_v25 = vmax.f32 %v2172_v20, %v2173_v39  ;;  %v2175_v48 = vsel %vm267_vm0, %v2858_v31, -inf  ;;  %v2879_v14 = vld [vmem:[%s6671_s0 + $0x180] sm:$0x3]  ;;  %v2177_v27 = vsel %vm267_vm0, %v2863_v52, -inf  ;;  %v2179_v34 = vsel %vm267_vm0, %v2868_v9, -inf }
 0x17d   :  { %v2884_v43 = vld [vmem:[%s6671_s0 + $0x1a0] sm:$0x3]  ;;  %v2167_v32 = vmax.f32 %v2165_v29, %v2166_v55  ;;  %v2181_v8 = vsel %vm267_vm0, %v2873_v54, -inf  ;;  %v2160_v10 = vmax.f32 %v2158_v51, %v2159_v4  ;;  %v2183_v23 = vsel %vm267_vm0, %v2138_v1, -inf  ;;  %v2876_v42 = vld [vmem:[%s6671_s0 + $0x164] sm:$0x3] }
 0x17e   :  { %v2889_v63 = vld [vmem:[%s6671_s0 + $0x1c0] sm:$0x3]  ;;  %v2176_v17 = vmax.f32 %v2174_v25, %v2175_v48  ;;  %v2880_v26 = vld [vmem:[%s6671_s0 + $0x182] sm:$0x3]  ;;  %v2218_v7 = vsel %vm267_vm0, %v2874_v0, -inf  ;;  %v2184_v18 = vsel %vm267_vm0, %v2149_v16, -inf }
 0x17f   :  { %v2885_v38 = vld [vmem:[%s6671_s0 + $0x1a2] sm:$0x3]  ;;  %v2169_v46 = vmax.f32 %v2167_v32, %v2168_v49  ;;  %v2894_v33 = vld [vmem:[%s6671_s0 + $0x1e0] sm:$0x3]  ;;  %v2219_v5 = vsel %vm267_vm0, %v2879_v14, -inf  ;;  %v2221_v6 = vsel %vm267_vm0, %v2884_v43, -inf }
 0x180   :  { %v2178_v58 = vmax.f32 %v2176_v17, %v2177_v27  ;;  %v6310_v28 = vsel %vm267_vm0, %v2160_v10, -inf  ;;  %v2881_v62 = vld [vmem:[%s6671_s0 + $0x184] sm:$0x3]  ;;  %v2890_v40 = vld [vmem:[%s6671_s0 + $0x1c2] sm:$0x3]  ;;  %v2220_v61 = vmax.f32 %v2218_v7, %v2219_v5  ;;  %v2223_v50 = vsel %vm267_vm0, %v2889_v63, -inf }
 0x181   :  { %v2171_v53 = vmax.f32 %v2169_v46, %v2170_v59  ;;  %v2877_v1 = vld [vmem:[%s6671_s0 + $0x166] sm:$0x3]  ;;  %v2895_v44 = vld [vmem:[%s6671_s0 + $0x1e2] sm:$0x3]  ;;  %v2227_v19 = vsel %vm267_vm0, %v2875_v13, -inf  ;;  %v2228_v2 = vsel %vm267_vm0, %v2880_v26, -inf }
 0x182   :  { %v2230_v31 = vsel %vm267_vm0, %v2885_v38, -inf  ;;  %v2180_v24 = vmax.f32 %v2178_v58, %v2179_v34  ;;  %v2886_v60 = vld [vmem:[%s6671_s0 + $0x1a4] sm:$0x3]  ;;  %v2222_v12 = vmax.f32 %v2220_v61, %v2221_v6  ;;  %v2225_v52 = vsel %vm267_vm0, %v2894_v33, -inf  ;;  %v2882_v3 = vld [vmem:[%s6671_s0 + $0x186] sm:$0x3] }
 0x183   :  { %v2891_v56 = vld [vmem:[%s6671_s0 + $0x1c4] sm:$0x3]  ;;  %v2229_v30 = vmax.f32 %v2227_v19, %v2228_v2  ;;  %v2186_v21 = vsel %vm267_vm0, %v2171_v53, -inf  ;;  %v2232_v35 = vsel %vm267_vm0, %v2890_v40, -inf  ;;  %v2236_v36 = vsel %vm267_vm0, %v2876_v42, -inf }
 0x184   :  { %v2896_v4 = vld [vmem:[%s6671_s0 + $0x1e4] sm:$0x3]  ;;  %v2237_v9 = vsel %vm267_vm0, %v2881_v62, -inf  ;;  %v2182_v54 = vmax.f32 %v2180_v24, %v2181_v8  ;;  %v2887_v55 = vld [vmem:[%s6671_s0 + $0x1a6] sm:$0x3]  ;;  %v2224_v49 = vmax.f32 %v2222_v12, %v2223_v50  ;;  %v2234_v29 = vsel %vm267_vm0, %v2895_v44, -inf }
 0x185   :  { %v2231_v16 = vmax.f32 %v2229_v30, %v2230_v31  ;;  %v2190_v20 = vmax.f32 %v6310_v28, %v2186_v21  ;;  %v2878_v39 = vld [vmem:[%s6671_s0 + $0x168] sm:$0x3]  ;;  %v2892_v0 = vld [vmem:[%s6671_s0 + $0x1c6] sm:$0x3]  ;;  %v2238_v51 = vmax.f32 %v2236_v36, %v2237_v9  ;;  %v2239_v59 = vsel %vm267_vm0, %v2886_v60, -inf }
 0x186   :  { %v2241_v25 = vsel %vm267_vm0, %v2891_v56, -inf  ;;  %v2187_v48 = vsel %vm267_vm0, %v2182_v54, -inf  ;;  %v2883_v13 = vld [vmem:[%s6671_s0 + $0x188] sm:$0x3]  ;;  %v2243_v43 = vsel %vm267_vm0, %v2896_v4, -inf  ;;  %v2245_v32 = vsel %vm267_vm0, %v2877_v1, -inf }
 0x187   :  { %v2233_v14 = vmax.f32 %v2231_v16, %v2232_v35  ;;  %v2188_v27 = vmax.f32 %v2183_v23, %v2187_v48  ;;  %v2888_v34 = vld [vmem:[%s6671_s0 + $0x1a8] sm:$0x3]  ;;  %v2240_v8 = vmax.f32 %v2238_v51, %v2239_v59  ;;  %v2246_v63 = vsel %vm267_vm0, %v2882_v3, -inf  ;;  %v2897_v42 = vld [vmem:[%s6671_s0 + $0x1e6] sm:$0x3] }
 0x188   :  { %v2248_v10 = vsel %vm267_vm0, %v2887_v55, -inf  ;;  %v2893_v17 = vld [vmem:[%s6671_s0 + $0x1c8] sm:$0x3]  ;;  %v2226_v26 = vmax.f32 %v2224_v49, %v2225_v52  ;;  %v2247_v23 = vmax.f32 %v2245_v32, %v2246_v63  ;;  %v2250_v7 = vsel %vm267_vm0, %v2892_v0, -inf  ;;  %v2899_v28 = vld [vmem:[%s6671_s0 + $0x16a] sm:$0x3] }
 0x189   :  { %v2235_v38 = vmax.f32 %v2233_v14, %v2234_v29  ;;  %v2189_v46 = vmax.f32 %v2188_v27, %v2184_v18  ;;  %v2898_v33 = vld [vmem:[%s6671_s0 + $0x1e8] sm:$0x3]  ;;  %v2242_v5 = vmax.f32 %v2240_v8, %v2241_v25  ;;  %v2254_v6 = vsel %vm267_vm0, %v2878_v39, -inf  ;;  %v2905_v50 = vld [vmem:[%s6671_s0 + $0x18a] sm:$0x3] }
 0x18a   :  { %v2255_v58 = vsel %vm267_vm0, %v2883_v13, -inf  ;;  %v6388_v62 = vmax.f32 %v6260_v47, %v2095_v15  ;;  %v2249_v18 = vmax.f32 %v2247_v23, %v2248_v10  ;;  %v2257_v61 = vsel %vm267_vm0, %v2888_v34, -inf  ;;  %v2911_v53 = vld [vmem:[%s6671_s0 + $0x1aa] sm:$0x3]  ;;  %v2900_v15 = vld [vmem:[%s6671_s0 + $0x16c] sm:$0x3] }
 0x18b   :  { %v2256_v40 = vmax.f32 %v2254_v6, %v2255_v58  ;;  %v6397_v1 = vmax.f32 %v2189_v46, %v2190_v20  ;;  %v2244_v44 = vmax.f32 %v2242_v5, %v2243_v43  ;;  %v2252_v11 = vsel %vm267_vm0, %v2897_v42, -inf  ;;  %v2906_v47 = vld [vmem:[%s6671_s0 + $0x18c] sm:$0x3]  ;;  %v2901_v24 = vld [vmem:[%s6671_s0 + $0x16e] sm:$0x3] }
 0x18c   :  { %v2259_v22 = vsel %vm267_vm0, %v2893_v17, -inf  ;;  %v2251_v19 = vmax.f32 %v2249_v18, %v2250_v7  ;;  %v2261_v31 = vsel %vm267_vm0, %v2898_v33, -inf  ;;  %v2912_v60 = vld [vmem:[%s6671_s0 + $0x1ac] sm:$0x3]  ;;  %v2917_v56 = vld [vmem:[%s6671_s0 + $0x1ca] sm:$0x3] }
 0x18d   :  { %v2258_v2 = vmax.f32 %v2256_v40, %v2257_v61  ;;  %v2303_v12 = vsel %vm267_vm0, %v2899_v28, -inf  ;;  %v2263_v52 = vsel %vm267_vm0, %v2226_v26, -inf  ;;  %v2264_v30 = vsel %vm267_vm0, %v2235_v38, -inf  ;;  %v2907_v21 = vld [vmem:[%s6671_s0 + $0x18e] sm:$0x3] }
 0x18e   :  { %v2304_v4 = vsel %vm267_vm0, %v2905_v50, -inf  ;;  %v2306_v35 = vsel %vm267_vm0, %v2911_v53, -inf  ;;  %v2253_v36 = vmax.f32 %v2251_v19, %v2252_v11  ;;  %v6426_v54 = vsel %vm267_vm0, %v2244_v44, -inf  ;;  %v2918_v3 = vld [vmem:[%s6671_s0 + $0x1cc] sm:$0x3] }
 0x18f   :  { %v2260_v9 = vmax.f32 %v2258_v2, %v2259_v22  ;;  %v2923_v55 = vld [vmem:[%s6671_s0 + $0x1ea] sm:$0x3]  ;;  %v2305_v49 = vmax.f32 %v2303_v12, %v2304_v4  ;;  %v2902_v16 = vld [vmem:[%s6671_s0 + $0x170] sm:$0x3]  ;;  %v2308_v29 = vsel %vm267_vm0, %v2917_v56, -inf  ;;  %v2312_v20 = vsel %vm267_vm0, %v2900_v15, -inf }
 0x190   :  { %v2313_v39 = vsel %vm267_vm0, %v2906_v47, -inf  ;;  %v2315_v0 = vsel %vm267_vm0, %v2912_v60, -inf  ;;  %v2266_v59 = vsel %vm267_vm0, %v2253_v36, -inf  ;;  %v2908_v25 = vld [vmem:[%s6671_s0 + $0x190] sm:$0x3]  ;;  %v2310_v27 = vsel %vm267_vm0, %v2923_v55, -inf }
 0x191   :  { %v2262_v51 = vmax.f32 %v2260_v9, %v2261_v31  ;;  %v2913_v48 = vld [vmem:[%s6671_s0 + $0x1ae] sm:$0x3]  ;;  %v2307_v14 = vmax.f32 %v2305_v49, %v2306_v35  ;;  %v2314_v43 = vmax.f32 %v2312_v20, %v2313_v39  ;;  %v2924_v32 = vld [vmem:[%s6671_s0 + $0x1ec] sm:$0x3]  ;;  %v2317_v34 = vsel %vm267_vm0, %v2918_v3, -inf }
 0x192   :  { %v2919_v13 = vld [vmem:[%s6671_s0 + $0x1ce] sm:$0x3]  ;;  %v2321_v8 = vsel %vm267_vm0, %v2901_v24, -inf  ;;  %v2322_v63 = vsel %vm267_vm0, %v2907_v21, -inf  ;;  %v2903_v17 = vld [vmem:[%s6671_s0 + $0x172] sm:$0x3]  ;;  %v2270_v33 = vmax.f32 %v6426_v54, %v2266_v59 }
 0x193   :  { %v2267_v10 = vsel %vm267_vm0, %v2262_v51, -inf  ;;  %v2914_v42 = vld [vmem:[%s6671_s0 + $0x1b0] sm:$0x3]  ;;  %v2925_v26 = vld [vmem:[%s6671_s0 + $0x1ee] sm:$0x3]  ;;  %v2309_v38 = vmax.f32 %v2307_v14, %v2308_v29  ;;  %v2316_v23 = vmax.f32 %v2314_v43, %v2315_v0  ;;  %v2323_v7 = vmax.f32 %v2321_v8, %v2322_v63 }
 0x194   :  { %v2268_v46 = vmax.f32 %v2263_v52, %v2267_v10  ;;  %v2909_v5 = vld [vmem:[%s6671_s0 + $0x192] sm:$0x3]  ;;  %v2920_v6 = vld [vmem:[%s6671_s0 + $0x1d0] sm:$0x3]  ;;  %v2324_v58 = vsel %vm267_vm0, %v2913_v48, -inf  ;;  %v2326_v28 = vsel %vm267_vm0, %v2919_v13, -inf }
 0x195   :  { %v2904_v18 = vld [vmem:[%s6671_s0 + $0x174] sm:$0x3]  ;;  %v2915_v61 = vld [vmem:[%s6671_s0 + $0x1b2] sm:$0x3]  ;;  %v2318_v50 = vmax.f32 %v2316_v23, %v2317_v34  ;;  %v2319_v53 = vsel %vm267_vm0, %v2924_v32, -inf  ;;  %v2325_v44 = vmax.f32 %v2323_v7, %v2324_v58  ;;  %v2330_v11 = vsel %vm267_vm0, %v2902_v16, -inf }
 0x196   :  { %v2910_v40 = vld [vmem:[%s6671_s0 + $0x194] sm:$0x3]  ;;  %v2926_v22 = vld [vmem:[%s6671_s0 + $0x1f0] sm:$0x3]  ;;  %v2311_v15 = vmax.f32 %v2309_v38, %v2310_v27  ;;  %v2328_v47 = vsel %vm267_vm0, %v2925_v26, -inf  ;;  %v2331_v19 = vsel %vm267_vm0, %v2908_v25, -inf  ;;  %v2269_v31 = vmax.f32 %v2268_v46, %v2264_v30 }
 0x197   :  { %v2333_v2 = vsel %vm267_vm0, %v2914_v42, -inf  ;;  %v2916_v24 = vld [vmem:[%s6671_s0 + $0x1b4] sm:$0x3]  ;;  %v2921_v60 = vld [vmem:[%s6671_s0 + $0x1d2] sm:$0x3]  ;;  %v2327_v56 = vmax.f32 %v2325_v44, %v2326_v28  ;;  %v2332_v12 = vmax.f32 %v2330_v11, %v2331_v19  ;;  %v2335_v52 = vsel %vm267_vm0, %v2920_v6, -inf }
 0x198   :  { %v2922_v21 = vld [vmem:[%s6671_s0 + $0x1d4] sm:$0x3]  ;;  %v2320_v4 = vmax.f32 %v2318_v50, %v2319_v53  ;;  %v2339_v35 = vsel %vm267_vm0, %v2903_v17, -inf  ;;  %v2340_v30 = vsel %vm267_vm0, %v2909_v5, -inf  ;;  %v2342_v36 = vsel %vm267_vm0, %v2915_v61, -inf }
 0x199   :  { %v2927_v9 = vld [vmem:[%s6671_s0 + $0x1f2] sm:$0x3]  ;;  %v2928_v54 = vld [vmem:[%s6671_s0 + $0x1f4] sm:$0x3]  ;;  %v2329_v3 = vmax.f32 %v2327_v56, %v2328_v47  ;;  %v2334_v55 = vmax.f32 %v2332_v12, %v2333_v2  ;;  %v2337_v49 = vsel %vm267_vm0, %v2926_v22, -inf  ;;  %v2341_v16 = vmax.f32 %v2339_v35, %v2340_v30 }
 0x19a   :  { %v2344_v29 = vsel %vm267_vm0, %v2921_v60, -inf  ;;  %v2348_v20 = vsel %vm267_vm0, %v2904_v18, -inf  ;;  %v2349_v39 = vsel %vm267_vm0, %v2910_v40, -inf  ;;  %v2351_v0 = vsel %vm267_vm0, %v2916_v24, -inf  ;;  %v2929_v51 = vld [vmem:[%s6671_s0 + $0x176] sm:$0x3] }
 0x19b   :  { %v6521_v59 = vmax.f32 %v2269_v31, %v2270_v33  ;;  %v2336_v25 = vmax.f32 %v2334_v55, %v2335_v52  ;;  %v2343_v48 = vmax.f32 %v2341_v16, %v2342_v36  ;;  %v2350_v13 = vmax.f32 %v2348_v20, %v2349_v39  ;;  %v2930_v14 = vld [vmem:[%s6671_s0 + $0x178] sm:$0x3]  ;;  %v2934_v43 = vld [vmem:[%s6671_s0 + $0x196] sm:$0x3]  ;;  %v2931_v40 = vld [vmem:[%s6671_s0 + $0x17a] sm:$0x3] }
 0x19c   :  { %v2935_v32 = vld [vmem:[%s6671_s0 + $0x198] sm:$0x3]  ;;  %v2939_v27 = vld [vmem:[%s6671_s0 + $0x1b6] sm:$0x3]  ;;  %v2346_v34 = vsel %vm267_vm0, %v2927_v9, -inf  ;;  %v2353_v8 = vsel %vm267_vm0, %v2922_v21, -inf }
 0x19d   :  { %v2355_v63 = vsel %vm267_vm0, %v2928_v54, -inf  ;;  %v2357_v10 = vsel %vm267_vm0, %v2311_v15, -inf  ;;  %v2944_v17 = vld [vmem:[%s6671_s0 + $0x1d6] sm:$0x3]  ;;  %v2345_v42 = vmax.f32 %v2343_v48, %v2344_v29  ;;  %v2352_v26 = vmax.f32 %v2350_v13, %v2351_v0  ;;  %v2940_v23 = vld [vmem:[%s6671_s0 + $0x1b8] sm:$0x3] }
 0x19e   :  { %v2358_v38 = vsel %vm267_vm0, %v2320_v4, -inf  ;;  %v2949_v7 = vld [vmem:[%s6671_s0 + $0x1f6] sm:$0x3]  ;;  %v2394_v46 = vsel %vm267_vm0, %v2929_v51, -inf  ;;  %v2338_v33 = vmax.f32 %v2336_v25, %v2337_v49  ;;  %v6551_v5 = vsel %vm267_vm0, %v2329_v3, -inf }
 0x19f   :  { %v2395_v6 = vsel %vm267_vm0, %v2934_v43, -inf  ;;  %v2397_v58 = vsel %vm267_vm0, %v2939_v27, -inf  ;;  %v2347_v28 = vmax.f32 %v2345_v42, %v2346_v34  ;;  %v2354_v18 = vmax.f32 %v2352_v26, %v2353_v8  ;;  %v2945_v61 = vld [vmem:[%s6671_s0 + $0x1d8] sm:$0x3]  ;;  %v2932_v44 = vld [vmem:[%s6671_s0 + $0x17c] sm:$0x3] }
 0x1a0   :  { %v2396_v50 = vmax.f32 %v2394_v46, %v2395_v6  ;;  %v2399_v53 = vsel %vm267_vm0, %v2944_v17, -inf  ;;  %v2936_v11 = vld [vmem:[%s6671_s0 + $0x19a] sm:$0x3]  ;;  %v2401_v22 = vsel %vm267_vm0, %v2949_v7, -inf  ;;  %v2403_v15 = vsel %vm267_vm0, %v2930_v14, -inf }
 0x1a1   :  { %v2404_v47 = vsel %vm267_vm0, %v2935_v32, -inf  ;;  %v2406_v19 = vsel %vm267_vm0, %v2940_v23, -inf  ;;  %v2356_v2 = vmax.f32 %v2354_v18, %v2355_v63  ;;  %v2361_v31 = vsel %vm267_vm0, %v2347_v28, -inf  ;;  %v2941_v24 = vld [vmem:[%s6671_s0 + $0x1ba] sm:$0x3] }
 0x1a2   :  { %v2950_v60 = vld [vmem:[%s6671_s0 + $0x1f8] sm:$0x3]  ;;  %v2398_v56 = vmax.f32 %v2396_v50, %v2397_v58  ;;  %v2405_v12 = vmax.f32 %v2403_v15, %v2404_v47  ;;  %v2360_v52 = vsel %vm267_vm0, %v2338_v33, -inf  ;;  %v2362_v21 = vmax.f32 %v2357_v10, %v2361_v31  ;;  %v2946_v4 = vld [vmem:[%s6671_s0 + $0x1da] sm:$0x3] }
 0x1a3   :  { %v2408_v35 = vsel %vm267_vm0, %v2945_v61, -inf  ;;  %v2412_v30 = vsel %vm267_vm0, %v2931_v40, -inf  ;;  %v2363_v36 = vsel %vm267_vm0, %v2356_v2, -inf  ;;  %v2937_v9 = vld [vmem:[%s6671_s0 + $0x19c] sm:$0x3]  ;;  %v2413_v49 = vsel %vm267_vm0, %v2936_v11, -inf }
 0x1a4   :  { %v2942_v54 = vld [vmem:[%s6671_s0 + $0x1bc] sm:$0x3]  ;;  %v2400_v3 = vmax.f32 %v2398_v56, %v2399_v53  ;;  %v2407_v55 = vmax.f32 %v2405_v12, %v2406_v19  ;;  %v2364_v16 = vmax.f32 %v2358_v38, %v2363_v36  ;;  %v2933_v29 = vld [vmem:[%s6671_s0 + $0x17e] sm:$0x3]  ;;  %v2951_v20 = vld [vmem:[%s6671_s0 + $0x1fa] sm:$0x3]  ;;  %v2414_v0 = vmax.f32 %v2412_v30, %v2413_v49 }
 0x1a5   :  { %v2410_v39 = vsel %vm267_vm0, %v2950_v60, -inf  ;;  %v2415_v51 = vsel %vm267_vm0, %v2941_v24, -inf  ;;  %v2366_v25 = vmax.f32 %v6551_v5, %v2360_v52  ;;  %v2938_v48 = vld [vmem:[%s6671_s0 + $0x19e] sm:$0x3]  ;;  %v2947_v13 = vld [vmem:[%s6671_s0 + $0x1dc] sm:$0x3] }
 0x1a6   :  { %v2409_v14 = vmax.f32 %v2407_v55, %v2408_v35  ;;  %v2417_v43 = vsel %vm267_vm0, %v2946_v4, -inf  ;;  %v2421_v32 = vsel %vm267_vm0, %v2932_v44, -inf  ;;  %v2365_v27 = vmax.f32 %v2362_v21, %v2364_v16  ;;  %v2943_v34 = vld [vmem:[%s6671_s0 + $0x1be] sm:$0x3]  ;;  %v2952_v8 = vld [vmem:[%s6671_s0 + $0x1fc] sm:$0x3] }
 0x1a7   :  { %v2416_v63 = vmax.f32 %v2414_v0, %v2415_v51  ;;  %v2422_v10 = vsel %vm267_vm0, %v2937_v9, -inf  ;;  %v2424_v17 = vsel %vm267_vm0, %v2942_v54, -inf  ;;  %v2948_v42 = vld [vmem:[%s6671_s0 + $0x1de] sm:$0x3]  ;;  %v2402_v38 = vmax.f32 %v2400_v3, %v2401_v22 }
 0x1a8   :  { %v2953_v26 = vld [vmem:[%s6671_s0 + $0x1fe] sm:$0x3]  ;;  %v2411_v23 = vmax.f32 %v2409_v14, %v2410_v39  ;;  %v2419_v7 = vsel %vm267_vm0, %v2951_v20, -inf  ;;  %v2423_v46 = vmax.f32 %v2421_v32, %v2422_v10  ;;  %v2426_v5 = vsel %vm267_vm0, %v2947_v13, -inf }
 0x1a9   :  { %v2418_v33 = vmax.f32 %v2416_v63, %v2417_v43  ;;  %v2430_v6 = vsel %vm267_vm0, %v2933_v29, -inf  ;;  %v2431_v58 = vsel %vm267_vm0, %v2938_v48, -inf  ;;  %v2428_v18 = vsel %vm267_vm0, %v2952_v8, -inf }
 0x1aa   :  { %v2425_v28 = vmax.f32 %v2423_v46, %v2424_v17  ;;  %v2432_v40 = vmax.f32 %v2430_v6, %v2431_v58  ;;  %v2433_v61 = vsel %vm267_vm0, %v2943_v34, -inf  ;;  %v2367_v50 = vmax.f32 %v2365_v27, %v2366_v25 }
 0x1ab   :  { %v2420_v53 = vmax.f32 %v2418_v33, %v2419_v7  ;;  %v2435_v44 = vsel %vm267_vm0, %v2948_v42, -inf  ;;  %v2437_v11 = vsel %vm267_vm0, %v2953_v26, -inf  ;;  %v2439_v47 = vsel %vm267_vm0, %v2402_v38, -inf }
 0x1ac   :  { %v2427_v22 = vmax.f32 %v2425_v28, %v2426_v5  ;;  %v2434_v15 = vmax.f32 %v2432_v40, %v2433_v61  ;;  %v2452_v19 = vrot.slane %v5851_v41, 1  ;;  %v2440_v2 = vsel %vm267_vm0, %v2411_v23, -inf }
 0x1ad   :  { %v2449_v31 = vrot.slane %v5734_v57, 1  ;;  %v2454_v24 = vrot.slane %v5960_v45, 1  ;;  %v2456_v60 = vrot.slane %v6116_v37, 1  ;;  %v2441_v52 = vsel %vm267_vm0, %v2420_v53, -inf }
 0x1ae   :  { %v2429_v56 = vmax.f32 %v2427_v22, %v2428_v18  ;;  %v2436_v12 = vmax.f32 %v2434_v15, %v2435_v44  ;;  %v2458_v21 = vrot.slane %v6388_v62, 1  ;;  %v2460_v4 = vrot.slane %v6397_v1, 1 }
 0x1af   :  { %v2462_v35 = vrot.slane %v6521_v59, 1  ;;  %v2464_v30 = vrot.slane %v2367_v50, 1  ;;  %v2468_v36 = vperm.slane %v5851_v41, 0  ;;  %v2469_v3 = vperm.slane %v2452_v19, 0 }
 0x1b0   :  { %v2438_v9 = vmax.f32 %v2436_v12, %v2437_v11  ;;  %v2442_v54 = vsel %vm267_vm0, %v2429_v56, -inf  ;;  %v2472_v55 = vperm.slane %v5960_v45, 0  ;;  %v2473_v16 = vperm.slane %v2454_v24, 0 }
 0x1b1   :  { %v2446_v49 = vmax.f32 %v2441_v52, %v2442_v54  ;;  %v2476_v29 = vperm.slane %v6116_v37, 0  ;;  %v2477_v20 = vperm.slane %v2456_v60, 0  ;;  %v2480_v0 = vperm.slane %v6388_v62, 0 }
 0x1b2   :  { %v2443_v39 = vsel %vm267_vm0, %v2438_v9, -inf  ;;  %v2481_v51 = vperm.slane %v2458_v21, 0  ;;  %v2484_v25 = vperm.slane %v6397_v1, 0  ;;  %v2485_v41 = vperm.slane %v2460_v4, 0 }
 0x1b3   :  { %v2444_v48 = vmax.f32 %v2439_v47, %v2443_v39  ;;  %v2488_v13 = vperm.slane %v6521_v59, 0  ;;  %v2489_v14 = vperm.slane %v2462_v35, 0  ;;  %v2492_v43 = vperm.slane %v2367_v50, 0 }
 0x1b4   :  { %v2496_v45 = vsel %vm1621_vm2, %v5734_v57, %v2468_v36  ;;  %v2497_v32 = vsel %vm1621_vm2, %v2449_v31, %v2469_v3  ;;  %vm2502_vm6 = vcmask 1043456   ;;  %vm2505_vm7 = vcmask 1044480  }
 0x1b5   :  { %v2445_v37 = vmax.f32 %v2444_v48, %v2440_v2  ;;  %v2498_v27 = vsel %vm1624_vm3, %v2496_v45, %v2472_v55  ;;  %v2499_v62 = vsel %vm1624_vm3, %v2497_v32, %v2473_v16  ;;  %v2493_v34 = vperm.slane %v2464_v30, 0 }
 0x1b6   :  { %v2500_v1 = vsel %vm1627_vm4, %v2498_v27, %v2476_v29  ;;  %v2501_v8 = vsel %vm1627_vm4, %v2499_v62, %v2477_v20  ;;  %vm2508_vm8 = vcmask 1045504   ;;  %vm2511_vm9 = vcmask 1046528  }
 0x1b7   :  { %v2447_v59 = vmax.f32 %v2445_v37, %v2446_v49  ;;  %v2503_v63 = vsel %vm2502_vm6, %v2500_v1, %v2480_v0  ;;  %v2504_v10 = vsel %vm2502_vm6, %v2501_v8, %v2481_v51  ;;  %vm2514_vm10 = vcmask 31744  }
 0x1b8   :  { %v2506_v57 = vsel %vm2505_vm7, %v2503_v63, %v2484_v25  ;;  %v2507_v17 = vsel %vm2505_vm7, %v2504_v10, %v2485_v41 }
 0x1b9   :  { %v2466_v42 = vrot.slane %v2447_v59, 1  ;;  %v2509_v26 = vsel %vm2508_vm8, %v2506_v57, %v2488_v13  ;;  %v2510_v38 = vsel %vm2508_vm8, %v2507_v17, %v2489_v14  ;;  %2516 = vst.msk [vmem:[%s6674_s3 + $0x8] sm:$0x1] %vm798_vm1, %v2447_v59 }
 0x1ba   :  { %v2512_v23 = vsel %vm2511_vm9, %v2509_v26, %v2492_v43  ;;  %v2513_v7 = vsel %vm2511_vm9, %v2510_v38, %v2493_v34 }
 0x1bb   :  { %2515 = vst.msk [vmem:[%s6674_s3] sm:$0xff] %vm2514_vm10, %v2512_v23 }
 0x1bc   :  { %2517 = vst.msk [vmem:[%s6674_s3 + $0x10] sm:$0xff] %vm2514_vm10, %v2513_v7 }
 0x1bd   :  { %2518 = vst.msk [vmem:[%s6674_s3 + $0x18] sm:$0x1] %vm798_vm1, %v2466_v42 }

</bundles_post_ra>
